<compile_context>
chip_gen: v6e
topology: v6e:2x2x1
jax: 0.10.0
libtpu: 0.0.40
codegen_flags: <defaults>
</compile_context>

<pallas_src>
import jax
import jax.numpy as jnp
from jax import lax
from jax.experimental import pallas as pl
from jax.experimental.pallas import tpu as pltpu


def _round_up(n, m):
    return ((n + m - 1) // m) * m


# ---------------------------------------------------------------------------
# Kernel: one (batch-tile, time-chunk) grid step.
#   prologue  : layer-0 input projection for the whole chunk (one MXU GEMM)
#   recurrence: fused block-diagonal recurrent GEMM + sliced activations
#   epilogue  : pad_packed masking + final fc (one MXU GEMM)
# ---------------------------------------------------------------------------
def pvad1et_kernel(x_ref, emb_ref, len_ref,
                   wx0_ref, we0_ref, wrec_ref, wih1_ref,
                   b0_ref, b1_ref, wfc_ref, bfc_ref,
                   out_ref,
                   gx_scr, h_scr, eb_scr, carry_scr):
    tT, Bt, Din = x_ref.shape
    H = wih1_ref.shape[0]
    OUT = wfc_ref.shape[1]
    tc = pl.program_id(1)

    # ---- Once per batch tile (first time chunk) -----------------------------
    @pl.when(tc == 0)
    def _():
        # emb @ Wih0[Din:] + (bih0 + bhh0): reused by every chunk of this tile.
        eb_scr[...] = (jnp.dot(emb_ref[...], we0_ref[...],
                               preferred_element_type=jnp.float32)
                       + b0_ref[...])
        carry_scr[...] = jnp.zeros_like(carry_scr)

    # ---- Chunk prologue: hoisted layer-0 input projection --------------------
    x2d = x_ref[...].reshape(tT * Bt, Din)
    xproj = jnp.dot(x2d, wx0_ref[...], preferred_element_type=jnp.float32)
    gx_scr[...] = xproj.reshape(tT, Bt, 4 * H) + eb_scr[...]

    wrec = wrec_ref[...]          # (2H, 8H) = blockdiag(Whh0, Whh1)
    wih1 = wih1_ref[...]
    b1 = b1_ref[...]

    def act(g):
        # EUP work on slices only (gate order i, f, g, o).
        sif = jax.nn.sigmoid(g[:, 0:2 * H])          # i|f: one 128-lane vreg
        gt = jnp.tanh(g[:, 2 * H:3 * H])
        so = jax.nn.sigmoid(g[:, 3 * H:4 * H])
        return sif[:, 0:H], sif[:, H:2 * H], gt, so

    def step(t, carry):
        h01, c0, c1 = carry
        # One fused MXU GEMM for both layers' recurrent contributions
        # (K = 2H = full lane width; zero blocks are free at tiny M = Bt).
        rec = jnp.dot(h01, wrec, preferred_element_type=jnp.float32)  # (Bt, 8H)

        g0 = gx_scr[t] + rec[:, 0:4 * H]
        i0, f0, gg0, o0 = act(g0)
        c0 = f0 * c0 + i0 * gg0
        h0 = o0 * jnp.tanh(c0)

        g1 = rec[:, 4 * H:8 * H] + jnp.dot(
            h0, wih1, preferred_element_type=jnp.float32) + b1
        i1, f1, gg1, o1 = act(g1)
        c1 = f1 * c1 + i1 * gg1
        h1 = o1 * jnp.tanh(c1)

        h_scr[t] = h1
        return jnp.concatenate([h0, h1], axis=1), c0, c1

    # LSTM state carried across time chunks via scratch (reset at tc == 0).
    init = (carry_scr[:, 0:2 * H],
            carry_scr[:, 2 * H:3 * H],
            carry_scr[:, 3 * H:4 * H])
    # Partial unroll keeps adjacent steps in one basic block (MXU/EUP overlap).
    h01, c0, c1 = lax.fori_loop(0, tT, step, init, unroll=8)
    carry_scr[:, 0:2 * H] = h01
    carry_scr[:, 2 * H:3 * H] = c0
    carry_scr[:, 3 * H:4 * H] = c1

    # ---- Chunk epilogue: pad_packed masking + final fc as one GEMM -----------
    t_idx = tc * tT + lax.broadcasted_iota(jnp.int32, (tT, Bt, 1), 0)
    mask = (t_idx < len_ref[...]).astype(jnp.float32)              # (tT, Bt, 1)
    h_all = h_scr[...] * mask
    out2d = jnp.dot(h_all.reshape(tT * Bt, H), wfc_ref[...],
                    preferred_element_type=jnp.float32) + bfc_ref[...]
    out_ref[...] = out2d.reshape(tT, Bt, OUT)


# ---------------------------------------------------------------------------
# VMEM footprint estimate (lane/sublane padded) for vmem_limit_bytes.
# ---------------------------------------------------------------------------
def _vmem_bytes(tT, Bt, Din, E, H, OUT):
    lane = lambda n: _round_up(max(n, 1), 128)
    sub = lambda n: _round_up(max(n, 1), 8)
    blocks = 2 * (tT * sub(Bt) * lane(Din)          # x chunk (double-buffered)
                  + sub(Bt) * lane(E)               # speaker emb
                  + sub(Bt) * lane(1)               # lengths
                  + tT * sub(Bt) * lane(OUT))       # out chunk
    weights = 2 * (sub(Din) * lane(4 * H) + sub(E) * lane(4 * H)
                   + sub(2 * H) * lane(8 * H) + sub(H) * lane(4 * H)
                   + 2 * sub(1) * lane(4 * H)
                   + sub(H) * lane(OUT) + sub(1) * lane(OUT))
    scratch = (tT * sub(Bt) * lane(4 * H)           # gate pre-activations
               + tT * sub(Bt) * lane(H)             # layer-1 hidden states
               + 2 * sub(Bt) * lane(4 * H))         # emb proj + state carry
    return (blocks + weights + scratch) * 4


# ---------------------------------------------------------------------------
# Wrapper
# ---------------------------------------------------------------------------
def pvad1et_forward(x, speaker_embeddings, lengths, params,
                    batch_tile=64, time_chunk=64):
    B, T, Din = x.shape
    E = speaker_embeddings.shape[1]
    H = params["whh0"].shape[0]
    OUT = params["wfc"].shape[1]

    # Full-sublane batch tiles; time chunks that are multiples of 8.
    Bt = min(batch_tile, _round_up(B, 8))
    Bp = _round_up(B, Bt)
    tT = min(time_chunk, _round_up(T, 8))
    Tp = _round_up(T, tT)

    x_p = jnp.pad(x, ((0, Bp - B), (0, Tp - T), (0, 0)))
    emb_p = jnp.pad(speaker_embeddings, ((0, Bp - B), (0, 0)))
    len_p = jnp.pad(lengths.astype(jnp.int32), (0, Bp - B)).reshape(Bp, 1)

    # Split the packed-input projection so cat([x, emb]) is never materialized,
    # and fuse the two recurrent weights into one block-diagonal matrix so the
    # per-step recurrent GEMM has K = 2H (full lane width) in a single issue.
    wx0 = params["wih0"][:Din]                               # (Din, 4H)
    we0 = params["wih0"][Din:]                               # (E,   4H)
    w_rec = jnp.zeros((2 * H, 8 * H), jnp.float32)
    w_rec = w_rec.at[:H, :4 * H].set(params["whh0"])
    w_rec = w_rec.at[H:, 4 * H:].set(params["whh1"])
    b0 = (params["bih0"] + params["bhh0"]).reshape(1, 4 * H)
    b1 = (params["bih1"] + params["bhh1"]).reshape(1, 4 * H)

    x_t = jnp.transpose(x_p, (1, 0, 2))                      # (Tp, Bp, Din)

    vmem_limit = int(min(max(2 * _vmem_bytes(tT, Bt, Din, E, H, OUT), 32 << 20),
                         64 << 20))

    grid_spec = pltpu.PrefetchScalarGridSpec(
        num_scalar_prefetch=0,
        grid=(Bp // Bt, Tp // tT),
        in_specs=[
            pl.BlockSpec((tT, Bt, Din), lambda bi, tc: (tc, bi, 0)),   # x chunk
            pl.BlockSpec((Bt, E), lambda bi, tc: (bi, 0)),             # emb
            pl.BlockSpec((Bt, 1), lambda bi, tc: (bi, 0)),             # lengths
            pl.BlockSpec((Din, 4 * H), lambda bi, tc: (0, 0)),         # wx0
            pl.BlockSpec((E, 4 * H), lambda bi, tc: (0, 0)),           # we0
            pl.BlockSpec((2 * H, 8 * H), lambda bi, tc: (0, 0)),       # w_rec
            pl.BlockSpec((H, 4 * H), lambda bi, tc: (0, 0)),           # wih1
            pl.BlockSpec((1, 4 * H), lambda bi, tc: (0, 0)),           # b0
            pl.BlockSpec((1, 4 * H), lambda bi, tc: (0, 0)),           # b1
            pl.BlockSpec((H, OUT), lambda bi, tc: (0, 0)),             # wfc
            pl.BlockSpec((1, OUT), lambda bi, tc: (0, 0)),             # bfc
        ],
        out_specs=pl.BlockSpec((tT, Bt, OUT), lambda bi, tc: (tc, bi, 0)),
        scratch_shapes=[
            pltpu.VMEM((tT, Bt, 4 * H), jnp.float32),   # gate pre-activations
            pltpu.VMEM((tT, Bt, H), jnp.float32),       # layer-1 hidden states
            pltpu.VMEM((Bt, 4 * H), jnp.float32),       # emb projection + bias
            pltpu.VMEM((Bt, 4 * H), jnp.float32),       # h0|h1|c0|c1 carry
        ],
    )

    out_tbo = pl.pallas_call(
        pvad1et_kernel,
        out_shape=jax.ShapeDtypeStruct((Tp, Bp, OUT), jnp.float32),
        grid_spec=grid_spec,
        compiler_params=pltpu.CompilerParams(
            dimension_semantics=("parallel", "arbitrary"),
            vmem_limit_bytes=vmem_limit),
    )(x_t, emb_p, len_p,
      wx0, we0, w_rec, params["wih1"], b0, b1,
      params["wfc"], params["bfc"])

    out = jnp.transpose(out_tbo, (1, 0, 2))[:B, :T]           # (B, T, OUT)
    return out, lengths


# ---------------------------------------------------------------------------
# Pure-JAX reference (lax.scan LSTM) for correctness checking.
# ---------------------------------------------------------------------------
def pvad1et_reference(x, emb, lengths, p):
    B, T, _ = x.shape
    H = p["whh0"].shape[0]
    hi = lax.Precision.HIGHEST
    xin = jnp.concatenate(
        [x, jnp.broadcast_to(emb[:, None, :], (B, T, emb.shape[1]))], axis=-1)

    def run_layer(seq, wih, whh, bih, bhh):
        def cell(carry, xt):
            h, c = carry
            g = (jnp.dot(xt, wih, precision=hi)
                 + jnp.dot(h, whh, precision=hi) + bih + bhh)
            i = jax.nn.sigmoid(g[:, :H])
            f = jax.nn.sigmoid(g[:, H:2 * H])
            gg = jnp.tanh(g[:, 2 * H:3 * H])
            o = jax.nn.sigmoid(g[:, 3 * H:])
            c = f * c + i * gg
            h = o * jnp.tanh(c)
            return (h, c), h
        init = (jnp.zeros((B, H), jnp.float32), jnp.zeros((B, H), jnp.float32))
        _, hs = lax.scan(cell, init, seq)
        return hs                                                 # (T, B, H)

    seq = jnp.transpose(xin, (1, 0, 2))
    h0 = run_layer(seq, p["wih0"], p["whh0"], p["bih0"], p["bhh0"])
    h1 = run_layer(h0, p["wih1"], p["whh1"], p["bih1"], p["bhh1"])
    mask = (jnp.arange(T)[:, None, None] < lengths[None, :, None]).astype(jnp.float32)
    out = jnp.dot(h1 * mask, p["wfc"], precision=hi) + p["bfc"]
    return jnp.transpose(out, (1, 0, 2)), lengths


# ---------------------------------------------------------------------------
# Deterministic synthetic parameters.  Linear/LSTM weights stored as
# (in_features, out_features) so kernels compute x @ W; gate order (i, f, g, o).
# ---------------------------------------------------------------------------
def init_params(key, input_dim, hidden_dim, out_dim, emb_dim):
    cat_dim = input_dim + emb_dim
    names_shapes = [
        ("wih0", (cat_dim, 4 * hidden_dim)), ("whh0", (hidden_dim, 4 * hidden_dim)),
        ("bih0", (1, 4 * hidden_dim)), ("bhh0", (1, 4 * hidden_dim)),
        ("wih1", (hidden_dim, 4 * hidden_dim)), ("whh1", (hidden_dim, 4 * hidden_dim)),
        ("bih1", (1, 4 * hidden_dim)), ("bhh1", (1, 4 * hidden_dim)),
        ("wfc", (hidden_dim, out_dim)), ("bfc", (1, out_dim)),
    ]
    keys = jax.random.split(key, len(names_shapes))
    scale = 1.0 / jnp.sqrt(jnp.float32(hidden_dim))   # PyTorch-style 1/sqrt(H)
    params = {}
    for (name, shape), k in zip(names_shapes, keys):
        params[name] = jax.random.uniform(k, shape, jnp.float32, -1.0, 1.0) * scale
    return params


if __name__ == "__main__":
    B, T = 2, 8
    INPUT_DIM, HIDDEN_DIM, OUT_DIM = 40, 64, 3
    EMB_DIM = 256

    root = jax.random.PRNGKey(0)
    k_par, k_x, k_e = jax.random.split(root, 3)

    params = init_params(k_par, INPUT_DIM, HIDDEN_DIM, OUT_DIM, EMB_DIM)
    x = jax.random.normal(k_x, (B, T, INPUT_DIM), jnp.float32)
    speaker_embeddings = jax.random.normal(k_e, (B, EMB_DIM), jnp.float32)
    lengths = jnp.array([8, 5], dtype=jnp.int32)

    fwd = jax.jit(pvad1et_forward)
    out_padded, out_lengths = fwd(x, speaker_embeddings, lengths, params)
    out_padded = jax.block_until_ready(out_padded)

    # Correctness vs. a pure-JAX LSTM reference.
    ref_out, _ = pvad1et_reference(x, speaker_embeddings, lengths, params)
    assert jnp.allclose(out_padded, ref_out, atol=1e-3, rtol=1e-3), (
        float(jnp.max(jnp.abs(out_padded - ref_out))))

    # pad_packed_sequence(batch_first=True) pads only up to max(lengths).
    max_len = int(jax.device_get(lengths).max())
    out_padded = out_padded[:, :max_len]

    assert out_padded.shape == (B, max_len, OUT_DIM)
    assert bool(jnp.all(jnp.isfinite(out_padded)))
    print("KERNEL_OK")
</pallas_src>

<mosaic_0001>
module attributes {stable_mosaic.version = 11 : i64} {
  func.func @pvad1et_kernel(%arg0: i32, %arg1: i32, %arg2: memref<8x8x40xf32, #tpu.memory_space<vmem>>, %arg3: memref<8x256xf32, #tpu.memory_space<vmem>>, %arg4: memref<8x1xi32, #tpu.memory_space<vmem>>, %arg5: memref<40x256xf32, #tpu.memory_space<vmem>>, %arg6: memref<256x256xf32, #tpu.memory_space<vmem>>, %arg7: memref<128x512xf32, #tpu.memory_space<vmem>>, %arg8: memref<64x256xf32, #tpu.memory_space<vmem>>, %arg9: memref<1x256xf32, #tpu.memory_space<vmem>>, %arg10: memref<1x256xf32, #tpu.memory_space<vmem>>, %arg11: memref<64x3xf32, #tpu.memory_space<vmem>>, %arg12: memref<1x3xf32, #tpu.memory_space<vmem>>, %arg13: memref<8x8x3xf32, #tpu.memory_space<vmem>>, %arg14: memref<8x8x256xf32, #tpu.memory_space<vmem>>, %arg15: memref<8x8x64xf32, #tpu.memory_space<vmem>>, %arg16: memref<8x256xf32, #tpu.memory_space<vmem>>, %arg17: memref<8x256xf32, #tpu.memory_space<vmem>>) attributes {dimension_semantics = [#tpu.dimension_semantics<parallel>, #tpu.dimension_semantics<arbitrary>], iteration_bounds = array<i64: 1, 1>, scalar_prefetch = 0 : i64, scratch_operands = 4 : i64, tpu.core_type = #tpu.core_type<tc>, window_params = [{transform_indices = @transform_0, window_bounds = array<i64: 8, 8, 40>}, {transform_indices = @transform_1, window_bounds = array<i64: 8, 256>}, {transform_indices = @transform_2, window_bounds = array<i64: 8, 1>}, {pipeline_mode = #tpu.pipeline_mode<synchronous>, transform_indices = @transform_3, window_bounds = array<i64: 40, 256>}, {pipeline_mode = #tpu.pipeline_mode<synchronous>, transform_indices = @transform_4, window_bounds = array<i64: 256, 256>}, {pipeline_mode = #tpu.pipeline_mode<synchronous>, transform_indices = @transform_5, window_bounds = array<i64: 128, 512>}, {pipeline_mode = #tpu.pipeline_mode<synchronous>, transform_indices = @transform_6, window_bounds = array<i64: 64, 256>}, {pipeline_mode = #tpu.pipeline_mode<synchronous>, transform_indices = @transform_7, window_bounds = array<i64: 1, 256>}, {pipeline_mode = #tpu.pipeline_mode<synchronous>, transform_indices = @transform_8, window_bounds = array<i64: 1, 256>}, {pipeline_mode = #tpu.pipeline_mode<synchronous>, transform_indices = @transform_9, window_bounds = array<i64: 64, 3>}, {pipeline_mode = #tpu.pipeline_mode<synchronous>, transform_indices = @transform_10, window_bounds = array<i64: 1, 3>}, {transform_indices = @transform_11, window_bounds = array<i64: 8, 8, 3>}]} {
    %c0_i32 = arith.constant 0 : i32
    %0 = arith.cmpi eq, %arg1, %c0_i32 : i32
    %1 = arith.extui %0 : i1 to i32
    %c0_i32_0 = arith.constant 0 : i32
    %2 = arith.cmpi ne, %1, %c0_i32_0 : i32
    scf.if %2 {
      %c0_121 = arith.constant 0 : index
      %c0_122 = arith.constant 0 : index
      %507 = vector.load %arg3[%c0_121, %c0_122] : memref<8x256xf32, #tpu.memory_space<vmem>>, vector<8x256xf32>
      %c0_123 = arith.constant 0 : index
      %c0_124 = arith.constant 0 : index
      %508 = vector.load %arg6[%c0_123, %c0_124] : memref<256x256xf32, #tpu.memory_space<vmem>>, vector<256x256xf32>
      %cst_125 = arith.constant dense<0.000000e+00> : vector<8x256xf32>
      %509 = tpu.matmul %507, %508, %cst_125 {dimension_numbers = #tpu.dot_dimension_numbers<[1], [0], [0], [1], [0, 0, 1, 1], [], []>} : vector<8x256xf32>, vector<256x256xf32>, vector<8x256xf32> -> vector<8x256xf32>
      %c0_126 = arith.constant 0 : index
      %c0_127 = arith.constant 0 : index
      %510 = vector.load %arg9[%c0_126, %c0_127] : memref<1x256xf32, #tpu.memory_space<vmem>>, vector<1x256xf32>
      %511 = vector.broadcast %510 : vector<1x256xf32> to vector<8x256xf32>
      %512 = arith.addf %509, %511 : vector<8x256xf32>
      %c0_128 = arith.constant 0 : index
      %c0_129 = arith.constant 0 : index
      %513 = vector.load %arg16[%c0_128, %c0_129] : memref<8x256xf32, #tpu.memory_space<vmem>>, vector<8x256xf32>
      tpu.vector_store %arg16[%c0_128, %c0_129], %512 {strides = array<i32>} : memref<8x256xf32, #tpu.memory_space<vmem>>, vector<8x256xf32>,
      %cst_130 = arith.constant 0.000000e+00 : f32
      %514 = vector.broadcast %cst_130 : f32 to vector<8x256xf32>
      %c0_131 = arith.constant 0 : index
      %c0_132 = arith.constant 0 : index
      %515 = vector.load %arg17[%c0_131, %c0_132] : memref<8x256xf32, #tpu.memory_space<vmem>>, vector<8x256xf32>
      tpu.vector_store %arg17[%c0_131, %c0_132], %514 {strides = array<i32>} : memref<8x256xf32, #tpu.memory_space<vmem>>, vector<8x256xf32>,
    } else {
    }
    %c0 = arith.constant 0 : index
    %c0_1 = arith.constant 0 : index
    %c0_2 = arith.constant 0 : index
    %3 = vector.load %arg2[%c0, %c0_1, %c0_2] : memref<8x8x40xf32, #tpu.memory_space<vmem>>, vector<8x8x40xf32>
    %4 = vector.shape_cast %3 : vector<8x8x40xf32> to vector<64x40xf32>
    %c0_3 = arith.constant 0 : index
    %c0_4 = arith.constant 0 : index
    %5 = vector.load %arg5[%c0_3, %c0_4] : memref<40x256xf32, #tpu.memory_space<vmem>>, vector<40x256xf32>
    %cst = arith.constant dense<0.000000e+00> : vector<64x256xf32>
    %6 = tpu.matmul %4, %5, %cst {dimension_numbers = #tpu.dot_dimension_numbers<[1], [0], [0], [1], [0, 0, 1, 1], [], []>} : vector<64x40xf32>, vector<40x256xf32>, vector<64x256xf32> -> vector<64x256xf32>
    %7 = vector.shape_cast %6 : vector<64x256xf32> to vector<8x8x256xf32>
    %c0_5 = arith.constant 0 : index
    %c0_6 = arith.constant 0 : index
    %8 = vector.load %arg16[%c0_5, %c0_6] : memref<8x256xf32, #tpu.memory_space<vmem>>, vector<8x256xf32>
    %9 = vector.shape_cast %8 : vector<8x256xf32> to vector<1x8x256xf32>
    %10 = vector.broadcast %9 : vector<1x8x256xf32> to vector<8x8x256xf32>
    %11 = arith.addf %7, %10 : vector<8x8x256xf32>
    %c0_7 = arith.constant 0 : index
    %c0_8 = arith.constant 0 : index
    %c0_9 = arith.constant 0 : index
    %12 = vector.load %arg14[%c0_7, %c0_8, %c0_9] : memref<8x8x256xf32, #tpu.memory_space<vmem>>, vector<8x8x256xf32>
    tpu.vector_store %arg14[%c0_7, %c0_8, %c0_9], %11 {strides = array<i32>} : memref<8x8x256xf32, #tpu.memory_space<vmem>>, vector<8x8x256xf32>,
    %c0_10 = arith.constant 0 : index
    %c0_11 = arith.constant 0 : index
    %13 = vector.load %arg7[%c0_10, %c0_11] : memref<128x512xf32, #tpu.memory_space<vmem>>, vector<128x512xf32>
    %c0_12 = arith.constant 0 : index
    %c0_13 = arith.constant 0 : index
    %14 = vector.load %arg8[%c0_12, %c0_13] : memref<64x256xf32, #tpu.memory_space<vmem>>, vector<64x256xf32>
    %c0_14 = arith.constant 0 : index
    %c0_15 = arith.constant 0 : index
    %15 = vector.load %arg10[%c0_14, %c0_15] : memref<1x256xf32, #tpu.memory_space<vmem>>, vector<1x256xf32>
    %c0_16 = arith.constant 0 : index
    %c0_17 = arith.constant 0 : index
    %16 = vector.load %arg17[%c0_16, %c0_17] : memref<8x256xf32, #tpu.memory_space<vmem>>, vector<8x128xf32>
    %c0_18 = arith.constant 0 : index
    %c128 = arith.constant 128 : index
    %17 = vector.load %arg17[%c0_18, %c128] : memref<8x256xf32, #tpu.memory_space<vmem>>, vector<8x64xf32>
    %c0_19 = arith.constant 0 : index
    %c192 = arith.constant 192 : index
    %18 = vector.load %arg17[%c0_19, %c192] : memref<8x256xf32, #tpu.memory_space<vmem>>, vector<8x64xf32>
    %c0_i32_20 = arith.constant 0 : i32
    %cst_21 = arith.constant dense<0.000000e+00> : vector<8x512xf32>
    %19 = tpu.matmul %16, %13, %cst_21 {dimension_numbers = #tpu.dot_dimension_numbers<[1], [0], [0], [1], [0, 0, 1, 1], [], []>} : vector<8x128xf32>, vector<128x512xf32>, vector<8x512xf32> -> vector<8x512xf32>
    %20 = arith.index_cast %c0_i32_20 : i32 to index
    %c0_22 = arith.constant 0 : index
    %c0_23 = arith.constant 0 : index
    %21 = vector.load %arg14[%20, %c0_22, %c0_23] : memref<8x8x256xf32, #tpu.memory_space<vmem>>, vector<1x8x256xf32>
    %22 = vector.shape_cast %21 : vector<1x8x256xf32> to vector<8x256xf32>
    %23 = vector.extract_strided_slice %19 {offsets = [0, 0], sizes = [8, 256], strides = [1, 1]} : vector<8x512xf32> to vector<8x256xf32>
    %24 = arith.addf %22, %23 : vector<8x256xf32>
    %25 = vector.extract_strided_slice %24 {offsets = [0, 0], sizes = [8, 128], strides = [1, 1]} : vector<8x256xf32> to vector<8x128xf32>
    %26 = arith.negf %25 : vector<8x128xf32>
    %27 = math.exp %26 : vector<8x128xf32>
    %cst_24 = arith.constant 1.000000e+00 : f32
    %28 = vector.broadcast %cst_24 : f32 to vector<8x128xf32>
    %29 = arith.addf %28, %27 : vector<8x128xf32>
    %30 = arith.divf %28, %29 : vector<8x128xf32>
    %31 = vector.extract_strided_slice %24 {offsets = [0, 128], sizes = [8, 64], strides = [1, 1]} : vector<8x256xf32> to vector<8x64xf32>
    %32 = math.tanh %31 : vector<8x64xf32>
    %33 = vector.extract_strided_slice %24 {offsets = [0, 192], sizes = [8, 64], strides = [1, 1]} : vector<8x256xf32> to vector<8x64xf32>
    %34 = arith.negf %33 : vector<8x64xf32>
    %35 = math.exp %34 : vector<8x64xf32>
    %cst_25 = arith.constant 1.000000e+00 : f32
    %36 = vector.broadcast %cst_25 : f32 to vector<8x64xf32>
    %37 = arith.addf %36, %35 : vector<8x64xf32>
    %38 = arith.divf %36, %37 : vector<8x64xf32>
    %39 = vector.extract_strided_slice %30 {offsets = [0, 0], sizes = [8, 64], strides = [1, 1]} : vector<8x128xf32> to vector<8x64xf32>
    %40 = vector.extract_strided_slice %30 {offsets = [0, 64], sizes = [8, 64], strides = [1, 1]} : vector<8x128xf32> to vector<8x64xf32>
    %41 = arith.mulf %40, %17 : vector<8x64xf32>
    %42 = arith.mulf %39, %32 : vector<8x64xf32>
    %43 = arith.addf %41, %42 : vector<8x64xf32>
    %44 = math.tanh %43 : vector<8x64xf32>
    %45 = arith.mulf %38, %44 : vector<8x64xf32>
    %46 = vector.extract_strided_slice %19 {offsets = [0, 256], sizes = [8, 256], strides = [1, 1]} : vector<8x512xf32> to vector<8x256xf32>
    %cst_26 = arith.constant dense<0.000000e+00> : vector<8x256xf32>
    %47 = tpu.matmul %45, %14, %cst_26 {dimension_numbers = #tpu.dot_dimension_numbers<[1], [0], [0], [1], [0, 0, 1, 1], [], []>} : vector<8x64xf32>, vector<64x256xf32>, vector<8x256xf32> -> vector<8x256xf32>
    %48 = arith.addf %46, %47 : vector<8x256xf32>
    %49 = vector.broadcast %15 : vector<1x256xf32> to vector<8x256xf32>
    %50 = arith.addf %48, %49 : vector<8x256xf32>
    %51 = vector.extract_strided_slice %50 {offsets = [0, 0], sizes = [8, 128], strides = [1, 1]} : vector<8x256xf32> to vector<8x128xf32>
    %52 = arith.negf %51 : vector<8x128xf32>
    %53 = math.exp %52 : vector<8x128xf32>
    %cst_27 = arith.constant 1.000000e+00 : f32
    %54 = vector.broadcast %cst_27 : f32 to vector<8x128xf32>
    %55 = arith.addf %54, %53 : vector<8x128xf32>
    %56 = arith.divf %54, %55 : vector<8x128xf32>
    %57 = vector.extract_strided_slice %50 {offsets = [0, 128], sizes = [8, 64], strides = [1, 1]} : vector<8x256xf32> to vector<8x64xf32>
    %58 = math.tanh %57 : vector<8x64xf32>
    %59 = vector.extract_strided_slice %50 {offsets = [0, 192], sizes = [8, 64], strides = [1, 1]} : vector<8x256xf32> to vector<8x64xf32>
    %60 = arith.negf %59 : vector<8x64xf32>
    %61 = math.exp %60 : vector<8x64xf32>
    %cst_28 = arith.constant 1.000000e+00 : f32
    %62 = vector.broadcast %cst_28 : f32 to vector<8x64xf32>
    %63 = arith.addf %62, %61 : vector<8x64xf32>
    %64 = arith.divf %62, %63 : vector<8x64xf32>
    %65 = vector.extract_strided_slice %56 {offsets = [0, 0], sizes = [8, 64], strides = [1, 1]} : vector<8x128xf32> to vector<8x64xf32>
    %66 = vector.extract_strided_slice %56 {offsets = [0, 64], sizes = [8, 64], strides = [1, 1]} : vector<8x128xf32> to vector<8x64xf32>
    %67 = arith.mulf %66, %18 : vector<8x64xf32>
    %68 = arith.mulf %65, %58 : vector<8x64xf32>
    %69 = arith.addf %67, %68 : vector<8x64xf32>
    %70 = math.tanh %69 : vector<8x64xf32>
    %71 = arith.mulf %64, %70 : vector<8x64xf32>
    %72 = arith.index_cast %c0_i32_20 : i32 to index
    %c0_29 = arith.constant 0 : index
    %c0_30 = arith.constant 0 : index
    %73 = vector.load %arg15[%72, %c0_29, %c0_30] : memref<8x8x64xf32, #tpu.memory_space<vmem>>, vector<1x8x64xf32>
    %74 = vector.shape_cast %73 : vector<1x8x64xf32> to vector<8x64xf32>
    %75 = vector.shape_cast %71 : vector<8x64xf32> to vector<1x8x64xf32>
    tpu.vector_store %arg15[%72, %c0_29, %c0_30], %75 {strides = array<i32>} : memref<8x8x64xf32, #tpu.memory_space<vmem>>, vector<1x8x64xf32>,
    %76 = tpu.concatenate %45, %71 in 1 : vector<8x64xf32>, vector<8x64xf32> -> vector<8x128xf32>
    %c1_i32 = arith.constant 1 : i32
    %cst_31 = arith.constant dense<0.000000e+00> : vector<8x512xf32>
    %77 = tpu.matmul %76, %13, %cst_31 {dimension_numbers = #tpu.dot_dimension_numbers<[1], [0], [0], [1], [0, 0, 1, 1], [], []>} : vector<8x128xf32>, vector<128x512xf32>, vector<8x512xf32> -> vector<8x512xf32>
    %78 = arith.index_cast %c1_i32 : i32 to index
    %c0_32 = arith.constant 0 : index
    %c0_33 = arith.constant 0 : index
    %79 = vector.load %arg14[%78, %c0_32, %c0_33] : memref<8x8x256xf32, #tpu.memory_space<vmem>>, vector<1x8x256xf32>
    %80 = vector.shape_cast %79 : vector<1x8x256xf32> to vector<8x256xf32>
    %81 = vector.extract_strided_slice %77 {offsets = [0, 0], sizes = [8, 256], strides = [1, 1]} : vector<8x512xf32> to vector<8x256xf32>
    %82 = arith.addf %80, %81 : vector<8x256xf32>
    %83 = vector.extract_strided_slice %82 {offsets = [0, 0], sizes = [8, 128], strides = [1, 1]} : vector<8x256xf32> to vector<8x128xf32>
    %84 = arith.negf %83 : vector<8x128xf32>
    %85 = math.exp %84 : vector<8x128xf32>
    %cst_34 = arith.constant 1.000000e+00 : f32
    %86 = vector.broadcast %cst_34 : f32 to vector<8x128xf32>
    %87 = arith.addf %86, %85 : vector<8x128xf32>
    %88 = arith.divf %86, %87 : vector<8x128xf32>
    %89 = vector.extract_strided_slice %82 {offsets = [0, 128], sizes = [8, 64], strides = [1, 1]} : vector<8x256xf32> to vector<8x64xf32>
    %90 = math.tanh %89 : vector<8x64xf32>
    %91 = vector.extract_strided_slice %82 {offsets = [0, 192], sizes = [8, 64], strides = [1, 1]} : vector<8x256xf32> to vector<8x64xf32>
    %92 = arith.negf %91 : vector<8x64xf32>
    %93 = math.exp %92 : vector<8x64xf32>
    %cst_35 = arith.constant 1.000000e+00 : f32
    %94 = vector.broadcast %cst_35 : f32 to vector<8x64xf32>
    %95 = arith.addf %94, %93 : vector<8x64xf32>
    %96 = arith.divf %94, %95 : vector<8x64xf32>
    %97 = vector.extract_strided_slice %88 {offsets = [0, 0], sizes = [8, 64], strides = [1, 1]} : vector<8x128xf32> to vector<8x64xf32>
    %98 = vector.extract_strided_slice %88 {offsets = [0, 64], sizes = [8, 64], strides = [1, 1]} : vector<8x128xf32> to vector<8x64xf32>
    %99 = arith.mulf %98, %43 : vector<8x64xf32>
    %100 = arith.mulf %97, %90 : vector<8x64xf32>
    %101 = arith.addf %99, %100 : vector<8x64xf32>
    %102 = math.tanh %101 : vector<8x64xf32>
    %103 = arith.mulf %96, %102 : vector<8x64xf32>
    %104 = vector.extract_strided_slice %77 {offsets = [0, 256], sizes = [8, 256], strides = [1, 1]} : vector<8x512xf32> to vector<8x256xf32>
    %cst_36 = arith.constant dense<0.000000e+00> : vector<8x256xf32>
    %105 = tpu.matmul %103, %14, %cst_36 {dimension_numbers = #tpu.dot_dimension_numbers<[1], [0], [0], [1], [0, 0, 1, 1], [], []>} : vector<8x64xf32>, vector<64x256xf32>, vector<8x256xf32> -> vector<8x256xf32>
    %106 = arith.addf %104, %105 : vector<8x256xf32>
    %107 = vector.broadcast %15 : vector<1x256xf32> to vector<8x256xf32>
    %108 = arith.addf %106, %107 : vector<8x256xf32>
    %109 = vector.extract_strided_slice %108 {offsets = [0, 0], sizes = [8, 128], strides = [1, 1]} : vector<8x256xf32> to vector<8x128xf32>
    %110 = arith.negf %109 : vector<8x128xf32>
    %111 = math.exp %110 : vector<8x128xf32>
    %cst_37 = arith.constant 1.000000e+00 : f32
    %112 = vector.broadcast %cst_37 : f32 to vector<8x128xf32>
    %113 = arith.addf %112, %111 : vector<8x128xf32>
    %114 = arith.divf %112, %113 : vector<8x128xf32>
    %115 = vector.extract_strided_slice %108 {offsets = [0, 128], sizes = [8, 64], strides = [1, 1]} : vector<8x256xf32> to vector<8x64xf32>
    %116 = math.tanh %115 : vector<8x64xf32>
    %117 = vector.extract_strided_slice %108 {offsets = [0, 192], sizes = [8, 64], strides = [1, 1]} : vector<8x256xf32> to vector<8x64xf32>
    %118 = arith.negf %117 : vector<8x64xf32>
    %119 = math.exp %118 : vector<8x64xf32>
    %cst_38 = arith.constant 1.000000e+00 : f32
    %120 = vector.broadcast %cst_38 : f32 to vector<8x64xf32>
    %121 = arith.addf %120, %119 : vector<8x64xf32>
    %122 = arith.divf %120, %121 : vector<8x64xf32>
    %123 = vector.extract_strided_slice %114 {offsets = [0, 0], sizes = [8, 64], strides = [1, 1]} : vector<8x128xf32> to vector<8x64xf32>
    %124 = vector.extract_strided_slice %114 {offsets = [0, 64], sizes = [8, 64], strides = [1, 1]} : vector<8x128xf32> to vector<8x64xf32>
    %125 = arith.mulf %124, %69 : vector<8x64xf32>
    %126 = arith.mulf %123, %116 : vector<8x64xf32>
    %127 = arith.addf %125, %126 : vector<8x64xf32>
    %128 = math.tanh %127 : vector<8x64xf32>
    %129 = arith.mulf %122, %128 : vector<8x64xf32>
    %130 = arith.index_cast %c1_i32 : i32 to index
    %c0_39 = arith.constant 0 : index
    %c0_40 = arith.constant 0 : index
    %131 = vector.load %arg15[%130, %c0_39, %c0_40] : memref<8x8x64xf32, #tpu.memory_space<vmem>>, vector<1x8x64xf32>
    %132 = vector.shape_cast %131 : vector<1x8x64xf32> to vector<8x64xf32>
    %133 = vector.shape_cast %129 : vector<8x64xf32> to vector<1x8x64xf32>
    tpu.vector_store %arg15[%130, %c0_39, %c0_40], %133 {strides = array<i32>} : memref<8x8x64xf32, #tpu.memory_space<vmem>>, vector<1x8x64xf32>,
    %134 = tpu.concatenate %103, %129 in 1 : vector<8x64xf32>, vector<8x64xf32> -> vector<8x128xf32>
    %c2_i32 = arith.constant 2 : i32
    %cst_41 = arith.constant dense<0.000000e+00> : vector<8x512xf32>
    %135 = tpu.matmul %134, %13, %cst_41 {dimension_numbers = #tpu.dot_dimension_numbers<[1], [0], [0], [1], [0, 0, 1, 1], [], []>} : vector<8x128xf32>, vector<128x512xf32>, vector<8x512xf32> -> vector<8x512xf32>
    %136 = arith.index_cast %c2_i32 : i32 to index
    %c0_42 = arith.constant 0 : index
    %c0_43 = arith.constant 0 : index
    %137 = vector.load %arg14[%136, %c0_42, %c0_43] : memref<8x8x256xf32, #tpu.memory_space<vmem>>, vector<1x8x256xf32>
    %138 = vector.shape_cast %137 : vector<1x8x256xf32> to vector<8x256xf32>
    %139 = vector.extract_strided_slice %135 {offsets = [0, 0], sizes = [8, 256], strides = [1, 1]} : vector<8x512xf32> to vector<8x256xf32>
    %140 = arith.addf %138, %139 : vector<8x256xf32>
    %141 = vector.extract_strided_slice %140 {offsets = [0, 0], sizes = [8, 128], strides = [1, 1]} : vector<8x256xf32> to vector<8x128xf32>
    %142 = arith.negf %141 : vector<8x128xf32>
    %143 = math.exp %142 : vector<8x128xf32>
    %cst_44 = arith.constant 1.000000e+00 : f32
    %144 = vector.broadcast %cst_44 : f32 to vector<8x128xf32>
    %145 = arith.addf %144, %143 : vector<8x128xf32>
    %146 = arith.divf %144, %145 : vector<8x128xf32>
    %147 = vector.extract_strided_slice %140 {offsets = [0, 128], sizes = [8, 64], strides = [1, 1]} : vector<8x256xf32> to vector<8x64xf32>
    %148 = math.tanh %147 : vector<8x64xf32>
    %149 = vector.extract_strided_slice %140 {offsets = [0, 192], sizes = [8, 64], strides = [1, 1]} : vector<8x256xf32> to vector<8x64xf32>
    %150 = arith.negf %149 : vector<8x64xf32>
    %151 = math.exp %150 : vector<8x64xf32>
    %cst_45 = arith.constant 1.000000e+00 : f32
    %152 = vector.broadcast %cst_45 : f32 to vector<8x64xf32>
    %153 = arith.addf %152, %151 : vector<8x64xf32>
    %154 = arith.divf %152, %153 : vector<8x64xf32>
    %155 = vector.extract_strided_slice %146 {offsets = [0, 0], sizes = [8, 64], strides = [1, 1]} : vector<8x128xf32> to vector<8x64xf32>
    %156 = vector.extract_strided_slice %146 {offsets = [0, 64], sizes = [8, 64], strides = [1, 1]} : vector<8x128xf32> to vector<8x64xf32>
    %157 = arith.mulf %156, %101 : vector<8x64xf32>
    %158 = arith.mulf %155, %148 : vector<8x64xf32>
    %159 = arith.addf %157, %158 : vector<8x64xf32>
    %160 = math.tanh %159 : vector<8x64xf32>
    %161 = arith.mulf %154, %160 : vector<8x64xf32>
    %162 = vector.extract_strided_slice %135 {offsets = [0, 256], sizes = [8, 256], strides = [1, 1]} : vector<8x512xf32> to vector<8x256xf32>
    %cst_46 = arith.constant dense<0.000000e+00> : vector<8x256xf32>
    %163 = tpu.matmul %161, %14, %cst_46 {dimension_numbers = #tpu.dot_dimension_numbers<[1], [0], [0], [1], [0, 0, 1, 1], [], []>} : vector<8x64xf32>, vector<64x256xf32>, vector<8x256xf32> -> vector<8x256xf32>
    %164 = arith.addf %162, %163 : vector<8x256xf32>
    %165 = vector.broadcast %15 : vector<1x256xf32> to vector<8x256xf32>
    %166 = arith.addf %164, %165 : vector<8x256xf32>
    %167 = vector.extract_strided_slice %166 {offsets = [0, 0], sizes = [8, 128], strides = [1, 1]} : vector<8x256xf32> to vector<8x128xf32>
    %168 = arith.negf %167 : vector<8x128xf32>
    %169 = math.exp %168 : vector<8x128xf32>
    %cst_47 = arith.constant 1.000000e+00 : f32
    %170 = vector.broadcast %cst_47 : f32 to vector<8x128xf32>
    %171 = arith.addf %170, %169 : vector<8x128xf32>
    %172 = arith.divf %170, %171 : vector<8x128xf32>
    %173 = vector.extract_strided_slice %166 {offsets = [0, 128], sizes = [8, 64], strides = [1, 1]} : vector<8x256xf32> to vector<8x64xf32>
    %174 = math.tanh %173 : vector<8x64xf32>
    %175 = vector.extract_strided_slice %166 {offsets = [0, 192], sizes = [8, 64], strides = [1, 1]} : vector<8x256xf32> to vector<8x64xf32>
    %176 = arith.negf %175 : vector<8x64xf32>
    %177 = math.exp %176 : vector<8x64xf32>
    %cst_48 = arith.constant 1.000000e+00 : f32
    %178 = vector.broadcast %cst_48 : f32 to vector<8x64xf32>
    %179 = arith.addf %178, %177 : vector<8x64xf32>
    %180 = arith.divf %178, %179 : vector<8x64xf32>
    %181 = vector.extract_strided_slice %172 {offsets = [0, 0], sizes = [8, 64], strides = [1, 1]} : vector<8x128xf32> to vector<8x64xf32>
    %182 = vector.extract_strided_slice %172 {offsets = [0, 64], sizes = [8, 64], strides = [1, 1]} : vector<8x128xf32> to vector<8x64xf32>
    %183 = arith.mulf %182, %127 : vector<8x64xf32>
    %184 = arith.mulf %181, %174 : vector<8x64xf32>
    %185 = arith.addf %183, %184 : vector<8x64xf32>
    %186 = math.tanh %185 : vector<8x64xf32>
    %187 = arith.mulf %180, %186 : vector<8x64xf32>
    %188 = arith.index_cast %c2_i32 : i32 to index
    %c0_49 = arith.constant 0 : index
    %c0_50 = arith.constant 0 : index
    %189 = vector.load %arg15[%188, %c0_49, %c0_50] : memref<8x8x64xf32, #tpu.memory_space<vmem>>, vector<1x8x64xf32>
    %190 = vector.shape_cast %189 : vector<1x8x64xf32> to vector<8x64xf32>
    %191 = vector.shape_cast %187 : vector<8x64xf32> to vector<1x8x64xf32>
    tpu.vector_store %arg15[%188, %c0_49, %c0_50], %191 {strides = array<i32>} : memref<8x8x64xf32, #tpu.memory_space<vmem>>, vector<1x8x64xf32>,
    %192 = tpu.concatenate %161, %187 in 1 : vector<8x64xf32>, vector<8x64xf32> -> vector<8x128xf32>
    %c3_i32 = arith.constant 3 : i32
    %cst_51 = arith.constant dense<0.000000e+00> : vector<8x512xf32>
    %193 = tpu.matmul %192, %13, %cst_51 {dimension_numbers = #tpu.dot_dimension_numbers<[1], [0], [0], [1], [0, 0, 1, 1], [], []>} : vector<8x128xf32>, vector<128x512xf32>, vector<8x512xf32> -> vector<8x512xf32>
    %194 = arith.index_cast %c3_i32 : i32 to index
    %c0_52 = arith.constant 0 : index
    %c0_53 = arith.constant 0 : index
    %195 = vector.load %arg14[%194, %c0_52, %c0_53] : memref<8x8x256xf32, #tpu.memory_space<vmem>>, vector<1x8x256xf32>
    %196 = vector.shape_cast %195 : vector<1x8x256xf32> to vector<8x256xf32>
    %197 = vector.extract_strided_slice %193 {offsets = [0, 0], sizes = [8, 256], strides = [1, 1]} : vector<8x512xf32> to vector<8x256xf32>
    %198 = arith.addf %196, %197 : vector<8x256xf32>
    %199 = vector.extract_strided_slice %198 {offsets = [0, 0], sizes = [8, 128], strides = [1, 1]} : vector<8x256xf32> to vector<8x128xf32>
    %200 = arith.negf %199 : vector<8x128xf32>
    %201 = math.exp %200 : vector<8x128xf32>
    %cst_54 = arith.constant 1.000000e+00 : f32
    %202 = vector.broadcast %cst_54 : f32 to vector<8x128xf32>
    %203 = arith.addf %202, %201 : vector<8x128xf32>
    %204 = arith.divf %202, %203 : vector<8x128xf32>
    %205 = vector.extract_strided_slice %198 {offsets = [0, 128], sizes = [8, 64], strides = [1, 1]} : vector<8x256xf32> to vector<8x64xf32>
    %206 = math.tanh %205 : vector<8x64xf32>
    %207 = vector.extract_strided_slice %198 {offsets = [0, 192], sizes = [8, 64], strides = [1, 1]} : vector<8x256xf32> to vector<8x64xf32>
    %208 = arith.negf %207 : vector<8x64xf32>
    %209 = math.exp %208 : vector<8x64xf32>
    %cst_55 = arith.constant 1.000000e+00 : f32
    %210 = vector.broadcast %cst_55 : f32 to vector<8x64xf32>
    %211 = arith.addf %210, %209 : vector<8x64xf32>
    %212 = arith.divf %210, %211 : vector<8x64xf32>
    %213 = vector.extract_strided_slice %204 {offsets = [0, 0], sizes = [8, 64], strides = [1, 1]} : vector<8x128xf32> to vector<8x64xf32>
    %214 = vector.extract_strided_slice %204 {offsets = [0, 64], sizes = [8, 64], strides = [1, 1]} : vector<8x128xf32> to vector<8x64xf32>
    %215 = arith.mulf %214, %159 : vector<8x64xf32>
    %216 = arith.mulf %213, %206 : vector<8x64xf32>
    %217 = arith.addf %215, %216 : vector<8x64xf32>
    %218 = math.tanh %217 : vector<8x64xf32>
    %219 = arith.mulf %212, %218 : vector<8x64xf32>
    %220 = vector.extract_strided_slice %193 {offsets = [0, 256], sizes = [8, 256], strides = [1, 1]} : vector<8x512xf32> to vector<8x256xf32>
    %cst_56 = arith.constant dense<0.000000e+00> : vector<8x256xf32>
    %221 = tpu.matmul %219, %14, %cst_56 {dimension_numbers = #tpu.dot_dimension_numbers<[1], [0], [0], [1], [0, 0, 1, 1], [], []>} : vector<8x64xf32>, vector<64x256xf32>, vector<8x256xf32> -> vector<8x256xf32>
    %222 = arith.addf %220, %221 : vector<8x256xf32>
    %223 = vector.broadcast %15 : vector<1x256xf32> to vector<8x256xf32>
    %224 = arith.addf %222, %223 : vector<8x256xf32>
    %225 = vector.extract_strided_slice %224 {offsets = [0, 0], sizes = [8, 128], strides = [1, 1]} : vector<8x256xf32> to vector<8x128xf32>
    %226 = arith.negf %225 : vector<8x128xf32>
    %227 = math.exp %226 : vector<8x128xf32>
    %cst_57 = arith.constant 1.000000e+00 : f32
    %228 = vector.broadcast %cst_57 : f32 to vector<8x128xf32>
    %229 = arith.addf %228, %227 : vector<8x128xf32>
    %230 = arith.divf %228, %229 : vector<8x128xf32>
    %231 = vector.extract_strided_slice %224 {offsets = [0, 128], sizes = [8, 64], strides = [1, 1]} : vector<8x256xf32> to vector<8x64xf32>
    %232 = math.tanh %231 : vector<8x64xf32>
    %233 = vector.extract_strided_slice %224 {offsets = [0, 192], sizes = [8, 64], strides = [1, 1]} : vector<8x256xf32> to vector<8x64xf32>
    %234 = arith.negf %233 : vector<8x64xf32>
    %235 = math.exp %234 : vector<8x64xf32>
    %cst_58 = arith.constant 1.000000e+00 : f32
    %236 = vector.broadcast %cst_58 : f32 to vector<8x64xf32>
    %237 = arith.addf %236, %235 : vector<8x64xf32>
    %238 = arith.divf %236, %237 : vector<8x64xf32>
    %239 = vector.extract_strided_slice %230 {offsets = [0, 0], sizes = [8, 64], strides = [1, 1]} : vector<8x128xf32> to vector<8x64xf32>
    %240 = vector.extract_strided_slice %230 {offsets = [0, 64], sizes = [8, 64], strides = [1, 1]} : vector<8x128xf32> to vector<8x64xf32>
    %241 = arith.mulf %240, %185 : vector<8x64xf32>
    %242 = arith.mulf %239, %232 : vector<8x64xf32>
    %243 = arith.addf %241, %242 : vector<8x64xf32>
    %244 = math.tanh %243 : vector<8x64xf32>
    %245 = arith.mulf %238, %244 : vector<8x64xf32>
    %246 = arith.index_cast %c3_i32 : i32 to index
    %c0_59 = arith.constant 0 : index
    %c0_60 = arith.constant 0 : index
    %247 = vector.load %arg15[%246, %c0_59, %c0_60] : memref<8x8x64xf32, #tpu.memory_space<vmem>>, vector<1x8x64xf32>
    %248 = vector.shape_cast %247 : vector<1x8x64xf32> to vector<8x64xf32>
    %249 = vector.shape_cast %245 : vector<8x64xf32> to vector<1x8x64xf32>
    tpu.vector_store %arg15[%246, %c0_59, %c0_60], %249 {strides = array<i32>} : memref<8x8x64xf32, #tpu.memory_space<vmem>>, vector<1x8x64xf32>,
    %250 = tpu.concatenate %219, %245 in 1 : vector<8x64xf32>, vector<8x64xf32> -> vector<8x128xf32>
    %c4_i32 = arith.constant 4 : i32
    %cst_61 = arith.constant dense<0.000000e+00> : vector<8x512xf32>
    %251 = tpu.matmul %250, %13, %cst_61 {dimension_numbers = #tpu.dot_dimension_numbers<[1], [0], [0], [1], [0, 0, 1, 1], [], []>} : vector<8x128xf32>, vector<128x512xf32>, vector<8x512xf32> -> vector<8x512xf32>
    %252 = arith.index_cast %c4_i32 : i32 to index
    %c0_62 = arith.constant 0 : index
    %c0_63 = arith.constant 0 : index
    %253 = vector.load %arg14[%252, %c0_62, %c0_63] : memref<8x8x256xf32, #tpu.memory_space<vmem>>, vector<1x8x256xf32>
    %254 = vector.shape_cast %253 : vector<1x8x256xf32> to vector<8x256xf32>
    %255 = vector.extract_strided_slice %251 {offsets = [0, 0], sizes = [8, 256], strides = [1, 1]} : vector<8x512xf32> to vector<8x256xf32>
    %256 = arith.addf %254, %255 : vector<8x256xf32>
    %257 = vector.extract_strided_slice %256 {offsets = [0, 0], sizes = [8, 128], strides = [1, 1]} : vector<8x256xf32> to vector<8x128xf32>
    %258 = arith.negf %257 : vector<8x128xf32>
    %259 = math.exp %258 : vector<8x128xf32>
    %cst_64 = arith.constant 1.000000e+00 : f32
    %260 = vector.broadcast %cst_64 : f32 to vector<8x128xf32>
    %261 = arith.addf %260, %259 : vector<8x128xf32>
    %262 = arith.divf %260, %261 : vector<8x128xf32>
    %263 = vector.extract_strided_slice %256 {offsets = [0, 128], sizes = [8, 64], strides = [1, 1]} : vector<8x256xf32> to vector<8x64xf32>
    %264 = math.tanh %263 : vector<8x64xf32>
    %265 = vector.extract_strided_slice %256 {offsets = [0, 192], sizes = [8, 64], strides = [1, 1]} : vector<8x256xf32> to vector<8x64xf32>
    %266 = arith.negf %265 : vector<8x64xf32>
    %267 = math.exp %266 : vector<8x64xf32>
    %cst_65 = arith.constant 1.000000e+00 : f32
    %268 = vector.broadcast %cst_65 : f32 to vector<8x64xf32>
    %269 = arith.addf %268, %267 : vector<8x64xf32>
    %270 = arith.divf %268, %269 : vector<8x64xf32>
    %271 = vector.extract_strided_slice %262 {offsets = [0, 0], sizes = [8, 64], strides = [1, 1]} : vector<8x128xf32> to vector<8x64xf32>
    %272 = vector.extract_strided_slice %262 {offsets = [0, 64], sizes = [8, 64], strides = [1, 1]} : vector<8x128xf32> to vector<8x64xf32>
    %273 = arith.mulf %272, %217 : vector<8x64xf32>
    %274 = arith.mulf %271, %264 : vector<8x64xf32>
    %275 = arith.addf %273, %274 : vector<8x64xf32>
    %276 = math.tanh %275 : vector<8x64xf32>
    %277 = arith.mulf %270, %276 : vector<8x64xf32>
    %278 = vector.extract_strided_slice %251 {offsets = [0, 256], sizes = [8, 256], strides = [1, 1]} : vector<8x512xf32> to vector<8x256xf32>
    %cst_66 = arith.constant dense<0.000000e+00> : vector<8x256xf32>
    %279 = tpu.matmul %277, %14, %cst_66 {dimension_numbers = #tpu.dot_dimension_numbers<[1], [0], [0], [1], [0, 0, 1, 1], [], []>} : vector<8x64xf32>, vector<64x256xf32>, vector<8x256xf32> -> vector<8x256xf32>
    %280 = arith.addf %278, %279 : vector<8x256xf32>
    %281 = vector.broadcast %15 : vector<1x256xf32> to vector<8x256xf32>
    %282 = arith.addf %280, %281 : vector<8x256xf32>
    %283 = vector.extract_strided_slice %282 {offsets = [0, 0], sizes = [8, 128], strides = [1, 1]} : vector<8x256xf32> to vector<8x128xf32>
    %284 = arith.negf %283 : vector<8x128xf32>
    %285 = math.exp %284 : vector<8x128xf32>
    %cst_67 = arith.constant 1.000000e+00 : f32
    %286 = vector.broadcast %cst_67 : f32 to vector<8x128xf32>
    %287 = arith.addf %286, %285 : vector<8x128xf32>
    %288 = arith.divf %286, %287 : vector<8x128xf32>
    %289 = vector.extract_strided_slice %282 {offsets = [0, 128], sizes = [8, 64], strides = [1, 1]} : vector<8x256xf32> to vector<8x64xf32>
    %290 = math.tanh %289 : vector<8x64xf32>
    %291 = vector.extract_strided_slice %282 {offsets = [0, 192], sizes = [8, 64], strides = [1, 1]} : vector<8x256xf32> to vector<8x64xf32>
    %292 = arith.negf %291 : vector<8x64xf32>
    %293 = math.exp %292 : vector<8x64xf32>
    %cst_68 = arith.constant 1.000000e+00 : f32
    %294 = vector.broadcast %cst_68 : f32 to vector<8x64xf32>
    %295 = arith.addf %294, %293 : vector<8x64xf32>
    %296 = arith.divf %294, %295 : vector<8x64xf32>
    %297 = vector.extract_strided_slice %288 {offsets = [0, 0], sizes = [8, 64], strides = [1, 1]} : vector<8x128xf32> to vector<8x64xf32>
    %298 = vector.extract_strided_slice %288 {offsets = [0, 64], sizes = [8, 64], strides = [1, 1]} : vector<8x128xf32> to vector<8x64xf32>
    %299 = arith.mulf %298, %243 : vector<8x64xf32>
    %300 = arith.mulf %297, %290 : vector<8x64xf32>
    %301 = arith.addf %299, %300 : vector<8x64xf32>
    %302 = math.tanh %301 : vector<8x64xf32>
    %303 = arith.mulf %296, %302 : vector<8x64xf32>
    %304 = arith.index_cast %c4_i32 : i32 to index
    %c0_69 = arith.constant 0 : index
    %c0_70 = arith.constant 0 : index
    %305 = vector.load %arg15[%304, %c0_69, %c0_70] : memref<8x8x64xf32, #tpu.memory_space<vmem>>, vector<1x8x64xf32>
    %306 = vector.shape_cast %305 : vector<1x8x64xf32> to vector<8x64xf32>
    %307 = vector.shape_cast %303 : vector<8x64xf32> to vector<1x8x64xf32>
    tpu.vector_store %arg15[%304, %c0_69, %c0_70], %307 {strides = array<i32>} : memref<8x8x64xf32, #tpu.memory_space<vmem>>, vector<1x8x64xf32>,
    %308 = tpu.concatenate %277, %303 in 1 : vector<8x64xf32>, vector<8x64xf32> -> vector<8x128xf32>
    %c5_i32 = arith.constant 5 : i32
    %cst_71 = arith.constant dense<0.000000e+00> : vector<8x512xf32>
    %309 = tpu.matmul %308, %13, %cst_71 {dimension_numbers = #tpu.dot_dimension_numbers<[1], [0], [0], [1], [0, 0, 1, 1], [], []>} : vector<8x128xf32>, vector<128x512xf32>, vector<8x512xf32> -> vector<8x512xf32>
    %310 = arith.index_cast %c5_i32 : i32 to index
    %c0_72 = arith.constant 0 : index
    %c0_73 = arith.constant 0 : index
    %311 = vector.load %arg14[%310, %c0_72, %c0_73] : memref<8x8x256xf32, #tpu.memory_space<vmem>>, vector<1x8x256xf32>
    %312 = vector.shape_cast %311 : vector<1x8x256xf32> to vector<8x256xf32>
    %313 = vector.extract_strided_slice %309 {offsets = [0, 0], sizes = [8, 256], strides = [1, 1]} : vector<8x512xf32> to vector<8x256xf32>
    %314 = arith.addf %312, %313 : vector<8x256xf32>
    %315 = vector.extract_strided_slice %314 {offsets = [0, 0], sizes = [8, 128], strides = [1, 1]} : vector<8x256xf32> to vector<8x128xf32>
    %316 = arith.negf %315 : vector<8x128xf32>
    %317 = math.exp %316 : vector<8x128xf32>
    %cst_74 = arith.constant 1.000000e+00 : f32
    %318 = vector.broadcast %cst_74 : f32 to vector<8x128xf32>
    %319 = arith.addf %318, %317 : vector<8x128xf32>
    %320 = arith.divf %318, %319 : vector<8x128xf32>
    %321 = vector.extract_strided_slice %314 {offsets = [0, 128], sizes = [8, 64], strides = [1, 1]} : vector<8x256xf32> to vector<8x64xf32>
    %322 = math.tanh %321 : vector<8x64xf32>
    %323 = vector.extract_strided_slice %314 {offsets = [0, 192], sizes = [8, 64], strides = [1, 1]} : vector<8x256xf32> to vector<8x64xf32>
    %324 = arith.negf %323 : vector<8x64xf32>
    %325 = math.exp %324 : vector<8x64xf32>
    %cst_75 = arith.constant 1.000000e+00 : f32
    %326 = vector.broadcast %cst_75 : f32 to vector<8x64xf32>
    %327 = arith.addf %326, %325 : vector<8x64xf32>
    %328 = arith.divf %326, %327 : vector<8x64xf32>
    %329 = vector.extract_strided_slice %320 {offsets = [0, 0], sizes = [8, 64], strides = [1, 1]} : vector<8x128xf32> to vector<8x64xf32>
    %330 = vector.extract_strided_slice %320 {offsets = [0, 64], sizes = [8, 64], strides = [1, 1]} : vector<8x128xf32> to vector<8x64xf32>
    %331 = arith.mulf %330, %275 : vector<8x64xf32>
    %332 = arith.mulf %329, %322 : vector<8x64xf32>
    %333 = arith.addf %331, %332 : vector<8x64xf32>
    %334 = math.tanh %333 : vector<8x64xf32>
    %335 = arith.mulf %328, %334 : vector<8x64xf32>
    %336 = vector.extract_strided_slice %309 {offsets = [0, 256], sizes = [8, 256], strides = [1, 1]} : vector<8x512xf32> to vector<8x256xf32>
    %cst_76 = arith.constant dense<0.000000e+00> : vector<8x256xf32>
    %337 = tpu.matmul %335, %14, %cst_76 {dimension_numbers = #tpu.dot_dimension_numbers<[1], [0], [0], [1], [0, 0, 1, 1], [], []>} : vector<8x64xf32>, vector<64x256xf32>, vector<8x256xf32> -> vector<8x256xf32>
    %338 = arith.addf %336, %337 : vector<8x256xf32>
    %339 = vector.broadcast %15 : vector<1x256xf32> to vector<8x256xf32>
    %340 = arith.addf %338, %339 : vector<8x256xf32>
    %341 = vector.extract_strided_slice %340 {offsets = [0, 0], sizes = [8, 128], strides = [1, 1]} : vector<8x256xf32> to vector<8x128xf32>
    %342 = arith.negf %341 : vector<8x128xf32>
    %343 = math.exp %342 : vector<8x128xf32>
    %cst_77 = arith.constant 1.000000e+00 : f32
    %344 = vector.broadcast %cst_77 : f32 to vector<8x128xf32>
    %345 = arith.addf %344, %343 : vector<8x128xf32>
    %346 = arith.divf %344, %345 : vector<8x128xf32>
    %347 = vector.extract_strided_slice %340 {offsets = [0, 128], sizes = [8, 64], strides = [1, 1]} : vector<8x256xf32> to vector<8x64xf32>
    %348 = math.tanh %347 : vector<8x64xf32>
    %349 = vector.extract_strided_slice %340 {offsets = [0, 192], sizes = [8, 64], strides = [1, 1]} : vector<8x256xf32> to vector<8x64xf32>
    %350 = arith.negf %349 : vector<8x64xf32>
    %351 = math.exp %350 : vector<8x64xf32>
    %cst_78 = arith.constant 1.000000e+00 : f32
    %352 = vector.broadcast %cst_78 : f32 to vector<8x64xf32>
    %353 = arith.addf %352, %351 : vector<8x64xf32>
    %354 = arith.divf %352, %353 : vector<8x64xf32>
    %355 = vector.extract_strided_slice %346 {offsets = [0, 0], sizes = [8, 64], strides = [1, 1]} : vector<8x128xf32> to vector<8x64xf32>
    %356 = vector.extract_strided_slice %346 {offsets = [0, 64], sizes = [8, 64], strides = [1, 1]} : vector<8x128xf32> to vector<8x64xf32>
    %357 = arith.mulf %356, %301 : vector<8x64xf32>
    %358 = arith.mulf %355, %348 : vector<8x64xf32>
    %359 = arith.addf %357, %358 : vector<8x64xf32>
    %360 = math.tanh %359 : vector<8x64xf32>
    %361 = arith.mulf %354, %360 : vector<8x64xf32>
    %362 = arith.index_cast %c5_i32 : i32 to index
    %c0_79 = arith.constant 0 : index
    %c0_80 = arith.constant 0 : index
    %363 = vector.load %arg15[%362, %c0_79, %c0_80] : memref<8x8x64xf32, #tpu.memory_space<vmem>>, vector<1x8x64xf32>
    %364 = vector.shape_cast %363 : vector<1x8x64xf32> to vector<8x64xf32>
    %365 = vector.shape_cast %361 : vector<8x64xf32> to vector<1x8x64xf32>
    tpu.vector_store %arg15[%362, %c0_79, %c0_80], %365 {strides = array<i32>} : memref<8x8x64xf32, #tpu.memory_space<vmem>>, vector<1x8x64xf32>,
    %366 = tpu.concatenate %335, %361 in 1 : vector<8x64xf32>, vector<8x64xf32> -> vector<8x128xf32>
    %c6_i32 = arith.constant 6 : i32
    %cst_81 = arith.constant dense<0.000000e+00> : vector<8x512xf32>
    %367 = tpu.matmul %366, %13, %cst_81 {dimension_numbers = #tpu.dot_dimension_numbers<[1], [0], [0], [1], [0, 0, 1, 1], [], []>} : vector<8x128xf32>, vector<128x512xf32>, vector<8x512xf32> -> vector<8x512xf32>
    %368 = arith.index_cast %c6_i32 : i32 to index
    %c0_82 = arith.constant 0 : index
    %c0_83 = arith.constant 0 : index
    %369 = vector.load %arg14[%368, %c0_82, %c0_83] : memref<8x8x256xf32, #tpu.memory_space<vmem>>, vector<1x8x256xf32>
    %370 = vector.shape_cast %369 : vector<1x8x256xf32> to vector<8x256xf32>
    %371 = vector.extract_strided_slice %367 {offsets = [0, 0], sizes = [8, 256], strides = [1, 1]} : vector<8x512xf32> to vector<8x256xf32>
    %372 = arith.addf %370, %371 : vector<8x256xf32>
    %373 = vector.extract_strided_slice %372 {offsets = [0, 0], sizes = [8, 128], strides = [1, 1]} : vector<8x256xf32> to vector<8x128xf32>
    %374 = arith.negf %373 : vector<8x128xf32>
    %375 = math.exp %374 : vector<8x128xf32>
    %cst_84 = arith.constant 1.000000e+00 : f32
    %376 = vector.broadcast %cst_84 : f32 to vector<8x128xf32>
    %377 = arith.addf %376, %375 : vector<8x128xf32>
    %378 = arith.divf %376, %377 : vector<8x128xf32>
    %379 = vector.extract_strided_slice %372 {offsets = [0, 128], sizes = [8, 64], strides = [1, 1]} : vector<8x256xf32> to vector<8x64xf32>
    %380 = math.tanh %379 : vector<8x64xf32>
    %381 = vector.extract_strided_slice %372 {offsets = [0, 192], sizes = [8, 64], strides = [1, 1]} : vector<8x256xf32> to vector<8x64xf32>
    %382 = arith.negf %381 : vector<8x64xf32>
    %383 = math.exp %382 : vector<8x64xf32>
    %cst_85 = arith.constant 1.000000e+00 : f32
    %384 = vector.broadcast %cst_85 : f32 to vector<8x64xf32>
    %385 = arith.addf %384, %383 : vector<8x64xf32>
    %386 = arith.divf %384, %385 : vector<8x64xf32>
    %387 = vector.extract_strided_slice %378 {offsets = [0, 0], sizes = [8, 64], strides = [1, 1]} : vector<8x128xf32> to vector<8x64xf32>
    %388 = vector.extract_strided_slice %378 {offsets = [0, 64], sizes = [8, 64], strides = [1, 1]} : vector<8x128xf32> to vector<8x64xf32>
    %389 = arith.mulf %388, %333 : vector<8x64xf32>
    %390 = arith.mulf %387, %380 : vector<8x64xf32>
    %391 = arith.addf %389, %390 : vector<8x64xf32>
    %392 = math.tanh %391 : vector<8x64xf32>
    %393 = arith.mulf %386, %392 : vector<8x64xf32>
    %394 = vector.extract_strided_slice %367 {offsets = [0, 256], sizes = [8, 256], strides = [1, 1]} : vector<8x512xf32> to vector<8x256xf32>
    %cst_86 = arith.constant dense<0.000000e+00> : vector<8x256xf32>
    %395 = tpu.matmul %393, %14, %cst_86 {dimension_numbers = #tpu.dot_dimension_numbers<[1], [0], [0], [1], [0, 0, 1, 1], [], []>} : vector<8x64xf32>, vector<64x256xf32>, vector<8x256xf32> -> vector<8x256xf32>
    %396 = arith.addf %394, %395 : vector<8x256xf32>
    %397 = vector.broadcast %15 : vector<1x256xf32> to vector<8x256xf32>
    %398 = arith.addf %396, %397 : vector<8x256xf32>
    %399 = vector.extract_strided_slice %398 {offsets = [0, 0], sizes = [8, 128], strides = [1, 1]} : vector<8x256xf32> to vector<8x128xf32>
    %400 = arith.negf %399 : vector<8x128xf32>
    %401 = math.exp %400 : vector<8x128xf32>
    %cst_87 = arith.constant 1.000000e+00 : f32
    %402 = vector.broadcast %cst_87 : f32 to vector<8x128xf32>
    %403 = arith.addf %402, %401 : vector<8x128xf32>
    %404 = arith.divf %402, %403 : vector<8x128xf32>
    %405 = vector.extract_strided_slice %398 {offsets = [0, 128], sizes = [8, 64], strides = [1, 1]} : vector<8x256xf32> to vector<8x64xf32>
    %406 = math.tanh %405 : vector<8x64xf32>
    %407 = vector.extract_strided_slice %398 {offsets = [0, 192], sizes = [8, 64], strides = [1, 1]} : vector<8x256xf32> to vector<8x64xf32>
    %408 = arith.negf %407 : vector<8x64xf32>
    %409 = math.exp %408 : vector<8x64xf32>
    %cst_88 = arith.constant 1.000000e+00 : f32
    %410 = vector.broadcast %cst_88 : f32 to vector<8x64xf32>
    %411 = arith.addf %410, %409 : vector<8x64xf32>
    %412 = arith.divf %410, %411 : vector<8x64xf32>
    %413 = vector.extract_strided_slice %404 {offsets = [0, 0], sizes = [8, 64], strides = [1, 1]} : vector<8x128xf32> to vector<8x64xf32>
    %414 = vector.extract_strided_slice %404 {offsets = [0, 64], sizes = [8, 64], strides = [1, 1]} : vector<8x128xf32> to vector<8x64xf32>
    %415 = arith.mulf %414, %359 : vector<8x64xf32>
    %416 = arith.mulf %413, %406 : vector<8x64xf32>
    %417 = arith.addf %415, %416 : vector<8x64xf32>
    %418 = math.tanh %417 : vector<8x64xf32>
    %419 = arith.mulf %412, %418 : vector<8x64xf32>
    %420 = arith.index_cast %c6_i32 : i32 to index
    %c0_89 = arith.constant 0 : index
    %c0_90 = arith.constant 0 : index
    %421 = vector.load %arg15[%420, %c0_89, %c0_90] : memref<8x8x64xf32, #tpu.memory_space<vmem>>, vector<1x8x64xf32>
    %422 = vector.shape_cast %421 : vector<1x8x64xf32> to vector<8x64xf32>
    %423 = vector.shape_cast %419 : vector<8x64xf32> to vector<1x8x64xf32>
    tpu.vector_store %arg15[%420, %c0_89, %c0_90], %423 {strides = array<i32>} : memref<8x8x64xf32, #tpu.memory_space<vmem>>, vector<1x8x64xf32>,
    %424 = tpu.concatenate %393, %419 in 1 : vector<8x64xf32>, vector<8x64xf32> -> vector<8x128xf32>
    %c7_i32 = arith.constant 7 : i32
    %cst_91 = arith.constant dense<0.000000e+00> : vector<8x512xf32>
    %425 = tpu.matmul %424, %13, %cst_91 {dimension_numbers = #tpu.dot_dimension_numbers<[1], [0], [0], [1], [0, 0, 1, 1], [], []>} : vector<8x128xf32>, vector<128x512xf32>, vector<8x512xf32> -> vector<8x512xf32>
    %426 = arith.index_cast %c7_i32 : i32 to index
    %c0_92 = arith.constant 0 : index
    %c0_93 = arith.constant 0 : index
    %427 = vector.load %arg14[%426, %c0_92, %c0_93] : memref<8x8x256xf32, #tpu.memory_space<vmem>>, vector<1x8x256xf32>
    %428 = vector.shape_cast %427 : vector<1x8x256xf32> to vector<8x256xf32>
    %429 = vector.extract_strided_slice %425 {offsets = [0, 0], sizes = [8, 256], strides = [1, 1]} : vector<8x512xf32> to vector<8x256xf32>
    %430 = arith.addf %428, %429 : vector<8x256xf32>
    %431 = vector.extract_strided_slice %430 {offsets = [0, 0], sizes = [8, 128], strides = [1, 1]} : vector<8x256xf32> to vector<8x128xf32>
    %432 = arith.negf %431 : vector<8x128xf32>
    %433 = math.exp %432 : vector<8x128xf32>
    %cst_94 = arith.constant 1.000000e+00 : f32
    %434 = vector.broadcast %cst_94 : f32 to vector<8x128xf32>
    %435 = arith.addf %434, %433 : vector<8x128xf32>
    %436 = arith.divf %434, %435 : vector<8x128xf32>
    %437 = vector.extract_strided_slice %430 {offsets = [0, 128], sizes = [8, 64], strides = [1, 1]} : vector<8x256xf32> to vector<8x64xf32>
    %438 = math.tanh %437 : vector<8x64xf32>
    %439 = vector.extract_strided_slice %430 {offsets = [0, 192], sizes = [8, 64], strides = [1, 1]} : vector<8x256xf32> to vector<8x64xf32>
    %440 = arith.negf %439 : vector<8x64xf32>
    %441 = math.exp %440 : vector<8x64xf32>
    %cst_95 = arith.constant 1.000000e+00 : f32
    %442 = vector.broadcast %cst_95 : f32 to vector<8x64xf32>
    %443 = arith.addf %442, %441 : vector<8x64xf32>
    %444 = arith.divf %442, %443 : vector<8x64xf32>
    %445 = vector.extract_strided_slice %436 {offsets = [0, 0], sizes = [8, 64], strides = [1, 1]} : vector<8x128xf32> to vector<8x64xf32>
    %446 = vector.extract_strided_slice %436 {offsets = [0, 64], sizes = [8, 64], strides = [1, 1]} : vector<8x128xf32> to vector<8x64xf32>
    %447 = arith.mulf %446, %391 : vector<8x64xf32>
    %448 = arith.mulf %445, %438 : vector<8x64xf32>
    %449 = arith.addf %447, %448 : vector<8x64xf32>
    %450 = math.tanh %449 : vector<8x64xf32>
    %451 = arith.mulf %444, %450 : vector<8x64xf32>
    %452 = vector.extract_strided_slice %425 {offsets = [0, 256], sizes = [8, 256], strides = [1, 1]} : vector<8x512xf32> to vector<8x256xf32>
    %cst_96 = arith.constant dense<0.000000e+00> : vector<8x256xf32>
    %453 = tpu.matmul %451, %14, %cst_96 {dimension_numbers = #tpu.dot_dimension_numbers<[1], [0], [0], [1], [0, 0, 1, 1], [], []>} : vector<8x64xf32>, vector<64x256xf32>, vector<8x256xf32> -> vector<8x256xf32>
    %454 = arith.addf %452, %453 : vector<8x256xf32>
    %455 = vector.broadcast %15 : vector<1x256xf32> to vector<8x256xf32>
    %456 = arith.addf %454, %455 : vector<8x256xf32>
    %457 = vector.extract_strided_slice %456 {offsets = [0, 0], sizes = [8, 128], strides = [1, 1]} : vector<8x256xf32> to vector<8x128xf32>
    %458 = arith.negf %457 : vector<8x128xf32>
    %459 = math.exp %458 : vector<8x128xf32>
    %cst_97 = arith.constant 1.000000e+00 : f32
    %460 = vector.broadcast %cst_97 : f32 to vector<8x128xf32>
    %461 = arith.addf %460, %459 : vector<8x128xf32>
    %462 = arith.divf %460, %461 : vector<8x128xf32>
    %463 = vector.extract_strided_slice %456 {offsets = [0, 128], sizes = [8, 64], strides = [1, 1]} : vector<8x256xf32> to vector<8x64xf32>
    %464 = math.tanh %463 : vector<8x64xf32>
    %465 = vector.extract_strided_slice %456 {offsets = [0, 192], sizes = [8, 64], strides = [1, 1]} : vector<8x256xf32> to vector<8x64xf32>
    %466 = arith.negf %465 : vector<8x64xf32>
    %467 = math.exp %466 : vector<8x64xf32>
    %cst_98 = arith.constant 1.000000e+00 : f32
    %468 = vector.broadcast %cst_98 : f32 to vector<8x64xf32>
    %469 = arith.addf %468, %467 : vector<8x64xf32>
    %470 = arith.divf %468, %469 : vector<8x64xf32>
    %471 = vector.extract_strided_slice %462 {offsets = [0, 0], sizes = [8, 64], strides = [1, 1]} : vector<8x128xf32> to vector<8x64xf32>
    %472 = vector.extract_strided_slice %462 {offsets = [0, 64], sizes = [8, 64], strides = [1, 1]} : vector<8x128xf32> to vector<8x64xf32>
    %473 = arith.mulf %472, %417 : vector<8x64xf32>
    %474 = arith.mulf %471, %464 : vector<8x64xf32>
    %475 = arith.addf %473, %474 : vector<8x64xf32>
    %476 = math.tanh %475 : vector<8x64xf32>
    %477 = arith.mulf %470, %476 : vector<8x64xf32>
    %478 = arith.index_cast %c7_i32 : i32 to index
    %c0_99 = arith.constant 0 : index
    %c0_100 = arith.constant 0 : index
    %479 = vector.load %arg15[%478, %c0_99, %c0_100] : memref<8x8x64xf32, #tpu.memory_space<vmem>>, vector<1x8x64xf32>
    %480 = vector.shape_cast %479 : vector<1x8x64xf32> to vector<8x64xf32>
    %481 = vector.shape_cast %477 : vector<8x64xf32> to vector<1x8x64xf32>
    tpu.vector_store %arg15[%478, %c0_99, %c0_100], %481 {strides = array<i32>} : memref<8x8x64xf32, #tpu.memory_space<vmem>>, vector<1x8x64xf32>,
    %482 = tpu.concatenate %451, %477 in 1 : vector<8x64xf32>, vector<8x64xf32> -> vector<8x128xf32>
    %c8_i32 = arith.constant 8 : i32
    %c0_101 = arith.constant 0 : index
    %c0_102 = arith.constant 0 : index
    %483 = vector.load %arg17[%c0_101, %c0_102] : memref<8x256xf32, #tpu.memory_space<vmem>>, vector<8x128xf32>
    tpu.vector_store %arg17[%c0_101, %c0_102], %482 {strides = array<i32>} : memref<8x256xf32, #tpu.memory_space<vmem>>, vector<8x128xf32>,
    %c0_103 = arith.constant 0 : index
    %c128_104 = arith.constant 128 : index
    %484 = vector.load %arg17[%c0_103, %c128_104] : memref<8x256xf32, #tpu.memory_space<vmem>>, vector<8x64xf32>
    tpu.vector_store %arg17[%c0_103, %c128_104], %449 {strides = array<i32>} : memref<8x256xf32, #tpu.memory_space<vmem>>, vector<8x64xf32>,
    %c0_105 = arith.constant 0 : index
    %c192_106 = arith.constant 192 : index
    %485 = vector.load %arg17[%c0_105, %c192_106] : memref<8x256xf32, #tpu.memory_space<vmem>>, vector<8x64xf32>
    tpu.vector_store %arg17[%c0_105, %c192_106], %475 {strides = array<i32>} : memref<8x256xf32, #tpu.memory_space<vmem>>, vector<8x64xf32>,
    %c8_i32_107 = arith.constant 8 : i32
    %486 = arith.muli %arg1, %c8_i32_107 : i32
    %487 = tpu.iota {dimensions = array<i32: 0>} : vector<8x8x1xi32>
    %488 = vector.broadcast %486 : i32 to vector<8x8x1xi32>
    %489 = arith.addi %488, %487 : vector<8x8x1xi32>
    %c0_108 = arith.constant 0 : index
    %c0_109 = arith.constant 0 : index
    %490 = vector.load %arg4[%c0_108, %c0_109] : memref<8x1xi32, #tpu.memory_space<vmem>>, vector<8x1xi32>
    %491 = vector.shape_cast %490 : vector<8x1xi32> to vector<1x8x1xi32>
    %492 = vector.broadcast %491 : vector<1x8x1xi32> to vector<8x8x1xi32>
    %493 = arith.cmpi slt, %489, %492 : vector<8x8x1xi32>
    %494 = arith.extui %493 : vector<8x8x1xi1> to vector<8x8x1xi32>
    %495 = arith.sitofp %494 : vector<8x8x1xi32> to vector<8x8x1xf32>
    %c0_110 = arith.constant 0 : index
    %c0_111 = arith.constant 0 : index
    %c0_112 = arith.constant 0 : index
    %496 = vector.load %arg15[%c0_110, %c0_111, %c0_112] : memref<8x8x64xf32, #tpu.memory_space<vmem>>, vector<8x8x64xf32>
    %497 = vector.broadcast %495 : vector<8x8x1xf32> to vector<8x8x64xf32>
    %498 = arith.mulf %496, %497 : vector<8x8x64xf32>
    %499 = vector.shape_cast %498 : vector<8x8x64xf32> to vector<64x64xf32>
    %c0_113 = arith.constant 0 : index
    %c0_114 = arith.constant 0 : index
    %500 = vector.load %arg11[%c0_113, %c0_114] : memref<64x3xf32, #tpu.memory_space<vmem>>, vector<64x3xf32>
    %cst_115 = arith.constant dense<0.000000e+00> : vector<64x3xf32>
    %501 = tpu.matmul %499, %500, %cst_115 {dimension_numbers = #tpu.dot_dimension_numbers<[1], [0], [0], [1], [0, 0, 1, 1], [], []>} : vector<64x64xf32>, vector<64x3xf32>, vector<64x3xf32> -> vector<64x3xf32>
    %c0_116 = arith.constant 0 : index
    %c0_117 = arith.constant 0 : index
    %502 = vector.load %arg12[%c0_116, %c0_117] : memref<1x3xf32, #tpu.memory_space<vmem>>, vector<1x3xf32>
    %503 = vector.broadcast %502 : vector<1x3xf32> to vector<64x3xf32>
    %504 = arith.addf %501, %503 : vector<64x3xf32>
    %505 = vector.shape_cast %504 : vector<64x3xf32> to vector<8x8x3xf32>
    %c0_118 = arith.constant 0 : index
    %c0_119 = arith.constant 0 : index
    %c0_120 = arith.constant 0 : index
    %506 = vector.load %arg13[%c0_118, %c0_119, %c0_120] : memref<8x8x3xf32, #tpu.memory_space<vmem>>, vector<8x8x3xf32>
    tpu.vector_store %arg13[%c0_118, %c0_119, %c0_120], %505 {strides = array<i32>} : memref<8x8x3xf32, #tpu.memory_space<vmem>>, vector<8x8x3xf32>,
    return
  }
  func.func @transform_0(%arg0: i32, %arg1: i32) -> (i32, i32, i32) {
    %c0_i32 = arith.constant 0 : i32
    %c0_i32_0 = arith.constant 0 : i32
    return %arg1, %arg0, %c0_i32 : i32, i32, i32
  }
  func.func @transform_1(%arg0: i32, %arg1: i32) -> (i32, i32) {
    %c0_i32 = arith.constant 0 : i32
    %c0_i32_0 = arith.constant 0 : i32
    return %arg0, %c0_i32 : i32, i32
  }
  func.func @transform_2(%arg0: i32, %arg1: i32) -> (i32, i32) {
    %c0_i32 = arith.constant 0 : i32
    %c0_i32_0 = arith.constant 0 : i32
    return %arg0, %c0_i32 : i32, i32
  }
  func.func @transform_3(%arg0: i32, %arg1: i32) -> (i32, i32) {
    %c0_i32 = arith.constant 0 : i32
    %c0_i32_0 = arith.constant 0 : i32
    %c0_i32_1 = arith.constant 0 : i32
    return %c0_i32, %c0_i32_0 : i32, i32
  }
  func.func @transform_4(%arg0: i32, %arg1: i32) -> (i32, i32) {
    %c0_i32 = arith.constant 0 : i32
    %c0_i32_0 = arith.constant 0 : i32
    %c0_i32_1 = arith.constant 0 : i32
    return %c0_i32, %c0_i32_0 : i32, i32
  }
  func.func @transform_5(%arg0: i32, %arg1: i32) -> (i32, i32) {
    %c0_i32 = arith.constant 0 : i32
    %c0_i32_0 = arith.constant 0 : i32
    %c0_i32_1 = arith.constant 0 : i32
    return %c0_i32, %c0_i32_0 : i32, i32
  }
  func.func @transform_6(%arg0: i32, %arg1: i32) -> (i32, i32) {
    %c0_i32 = arith.constant 0 : i32
    %c0_i32_0 = arith.constant 0 : i32
    %c0_i32_1 = arith.constant 0 : i32
    return %c0_i32, %c0_i32_0 : i32, i32
  }
  func.func @transform_7(%arg0: i32, %arg1: i32) -> (i32, i32) {
    %c0_i32 = arith.constant 0 : i32
    %c0_i32_0 = arith.constant 0 : i32
    %c0_i32_1 = arith.constant 0 : i32
    return %c0_i32, %c0_i32_0 : i32, i32
  }
  func.func @transform_8(%arg0: i32, %arg1: i32) -> (i32, i32) {
    %c0_i32 = arith.constant 0 : i32
    %c0_i32_0 = arith.constant 0 : i32
    %c0_i32_1 = arith.constant 0 : i32
    return %c0_i32, %c0_i32_0 : i32, i32
  }
  func.func @transform_9(%arg0: i32, %arg1: i32) -> (i32, i32) {
    %c0_i32 = arith.constant 0 : i32
    %c0_i32_0 = arith.constant 0 : i32
    %c0_i32_1 = arith.constant 0 : i32
    return %c0_i32, %c0_i32_0 : i32, i32
  }
  func.func @transform_10(%arg0: i32, %arg1: i32) -> (i32, i32) {
    %c0_i32 = arith.constant 0 : i32
    %c0_i32_0 = arith.constant 0 : i32
    %c0_i32_1 = arith.constant 0 : i32
    return %c0_i32, %c0_i32_0 : i32, i32
  }
  func.func @transform_11(%arg0: i32, %arg1: i32) -> (i32, i32, i32) {
    %c0_i32 = arith.constant 0 : i32
    %c0_i32_0 = arith.constant 0 : i32
    return %arg1, %arg0, %c0_i32 : i32, i32, i32
  }
}

</mosaic_0001>

<bundles_post_ra>
// kernel: pvad1et_forward.1
= control target key start
LH: loop header
LB: loop body
LE: loop exit
PB: predicated region body
PF: predicated region fallthrough
CT: control target
= control target key end

     0   :  { %v5672_v3 = vmov 0.0   ;;  %s3418_s23 = smov 64   ;;  %vm213_vm0 = vcmask 326656   ;;  %vm643_vm1 = vcmask 523264   ;;  %vm2720_vm10 = vcmask 1048064   ;;  %s5658_s4 = inlined_call_operand.vmem [shape: f32[256,256], index: 4, kind: input, shape index: {}]   ;;  %s5659_s5 = inlined_call_operand.vmem [shape: f32[128,512], index: 5, kind: input, shape index: {}]   ;;  %s5660_s1 = inlined_call_operand.vmem [shape: f32[8,256], index: 1, kind: input, shape index: {}]   ;;  %s5661_s3 = inlined_call_operand.vmem [shape: f32[40,256], index: 3, kind: input, shape index: {}]   ;;  %s5662_s0 = inlined_call_operand.vmem [shape: f32[8,8,40], index: 0, kind: input, shape index: {}]   ;;  %s5663_s7 = inlined_call_operand.vmem [shape: f32[1,256], index: 7, kind: input, shape index: {}]   ;;  %s5664_s6 = inlined_call_operand.vmem [shape: f32[64,256], index: 6, kind: input, shape index: {}]   ;;  %s5665_s8 = inlined_call_operand.vmem [shape: f32[1,256], index: 8, kind: input, shape index: {}]   ;;  %s5666_s2 = inlined_call_operand.vmem [shape: s32[8,1], index: 2, kind: input, shape index: {}]   ;;  %s5667_s9 = inlined_call_operand.vmem [shape: f32[64,3], index: 9, kind: input, shape index: {}]   ;;  %s5668_s10 = inlined_call_operand.vmem [shape: f32[1,3], index: 10, kind: input, shape index: {}]   ;;  %s5669_s11 = inlined_call_operand.vmem [shape: f32[8,8,3], index: 11, kind: output, shape index: {}]  }
   0x1   :  { %v75_v0 = vld [vmem:[%s5658_s4 + $0xf8] sm:$0xff]  ;;  %v74_v1 = vld [vmem:[%s5658_s4 + $0xf0] sm:$0xff]  ;;  %v73_v2 = vld [vmem:[%s5658_s4 + $0xe8] sm:$0xff]  ;;  %194 = vst [vmem:[#allocation5 + $0x8] sm:$0xff] %v5672_v3  ;;  %532 = vmatprep.mubr.f32.mxu1 %v5672_v3  ;;  %628 = vrot.lane.b32.xlu0 %v5672_v3, %s3418_s23  ;;  %vm2956_vm11 = vcmask 23552  }
   0x2   :  { %120 = vmatprep.subr.mxu0 %v75_v0  ;;  %v72_v4 = vld [vmem:[%s5658_s4 + $0xe0] sm:$0xff]  ;;  %v71_v5 = vld [vmem:[%s5658_s4 + $0xd8] sm:$0xff]  ;;  %v70_v6 = vld [vmem:[%s5658_s4 + $0xd0] sm:$0xff] }
   0x3   :  { %121 = vmatpush1.msra.mxu0 %v74_v1  ;;  %v69_v7 = vld [vmem:[%s5658_s4 + $0xc8] sm:$0xff]  ;;  %v68_v8 = vld [vmem:[%s5658_s4 + $0xc0] sm:$0xff]  ;;  %v67_v9 = vld [vmem:[%s5658_s4 + $0xb8] sm:$0xff] }
   0x4   :  { %122 = vmatprep.subr.mxu0 %v73_v2  ;;  %v66_v10 = vld [vmem:[%s5658_s4 + $0xb0] sm:$0xff]  ;;  %v65_v11 = vld [vmem:[%s5658_s4 + $0xa8] sm:$0xff]  ;;  %v64_v12 = vld [vmem:[%s5658_s4 + $0xa0] sm:$0xff] }
   0x5   :  { %123 = vmatpush1.msra.mxu0 %v72_v4  ;;  %v63_v13 = vld [vmem:[%s5658_s4 + $0x98] sm:$0xff]  ;;  %v62_v14 = vld [vmem:[%s5658_s4 + $0x90] sm:$0xff]  ;;  %v61_v15 = vld [vmem:[%s5658_s4 + $0x88] sm:$0xff] }
   0x6   :  { %124 = vmatprep.subr.mxu0 %v71_v5  ;;  %v60_v16 = vld [vmem:[%s5658_s4 + $0x80] sm:$0xff]  ;;  %v59_v17 = vld [vmem:[%s5658_s4 + $0x78] sm:$0xff]  ;;  %v3538_v18 = vld [vmem:[%s5659_s5 + $0x1e8] sm:$0xff] }
   0x7   :  { %125 = vmatpush1.msra.mxu0 %v70_v6  ;;  %v58_v19 = vld [vmem:[%s5658_s4 + $0x70] sm:$0xff]  ;;  %468 = vmatprep.subr.mxu1 %v3538_v18  ;;  %v3547_v20 = vld [vmem:[%s5659_s5 + $0x1e0] sm:$0xff]  ;;  %v3552_v21 = vld [vmem:[%s5659_s5 + $0x1c8] sm:$0xff] }
   0x8   :  { %126 = vmatprep.subr.mxu0 %v69_v7  ;;  %v57_v22 = vld [vmem:[%s5658_s4 + $0x68] sm:$0xff]  ;;  %469 = vmatpush1.msra.mxu1 %v3547_v20  ;;  %v3561_v23 = vld [vmem:[%s5659_s5 + $0x1c0] sm:$0xff]  ;;  %v55_v27 = vld [vmem:[%s5658_s4 + $0x58] sm:$0xff] }
   0x9   :  { %127 = vmatpush1.msra.mxu0 %v68_v8  ;;  %v56_v24 = vld [vmem:[%s5658_s4 + $0x60] sm:$0xff]  ;;  %470 = vmatprep.subr.mxu1 %v3552_v21  ;;  %v3570_v25 = vld [vmem:[%s5659_s5 + $0x1a8] sm:$0xff]  ;;  %v54_v29 = vld [vmem:[%s5658_s4 + $0x50] sm:$0xff] }
   0xa   :  { %128 = vmatprep.subr.mxu0 %v67_v9  ;;  %v3575_v26 = vld [vmem:[%s5659_s5 + $0x1a0] sm:$0xff]  ;;  %471 = vmatpush1.msra.mxu1 %v3561_v23  ;;  %v3584_v28 = vld [vmem:[%s5659_s5 + $0x188] sm:$0xff]  ;;  %v51_v35 = vld [vmem:[%s5658_s4 + $0x38] sm:$0xff] }
   0xb   :  { %129 = vmatpush1.msra.mxu0 %v66_v10  ;;  %472 = vmatprep.subr.mxu1 %v3570_v25  ;;  %v3593_v30 = vld [vmem:[%s5659_s5 + $0x180] sm:$0xff]  ;;  %v53_v31 = vld [vmem:[%s5658_s4 + $0x48] sm:$0xff]  ;;  %v50_v37 = vld [vmem:[%s5658_s4 + $0x30] sm:$0xff] }
   0xc   :  { %130 = vmatprep.subr.mxu0 %v65_v11  ;;  %473 = vmatpush1.msra.mxu1 %v3575_v26  ;;  %v3602_v32 = vld [vmem:[%s5659_s5 + $0x168] sm:$0xff]  ;;  %v52_v33 = vld [vmem:[%s5658_s4 + $0x40] sm:$0xff]  ;;  %v47_v43 = vld [vmem:[%s5658_s4 + $0x18] sm:$0xff] }
   0xd   :  { %131 = vmatpush1.msra.mxu0 %v64_v12  ;;  %474 = vmatprep.subr.mxu1 %v3584_v28  ;;  %v3611_v34 = vld [vmem:[%s5659_s5 + $0x160] sm:$0xff]  ;;  %v3620_v36 = vld [vmem:[%s5659_s5 + $0x148] sm:$0xff]  ;;  %v46_v45 = vld [vmem:[%s5658_s4 + $0x10] sm:$0xff] }
   0xe   :  { %132 = vmatprep.subr.mxu0 %v63_v13  ;;  %475 = vmatpush1.msra.mxu1 %v3593_v30  ;;  %v3629_v38 = vld [vmem:[%s5659_s5 + $0x140] sm:$0xff]  ;;  %v49_v39 = vld [vmem:[%s5658_s4 + $0x28] sm:$0xff]  ;;  %v107_v51 = vld [vmem:[%s5658_s4 + $0x1f8] sm:$0xff] }
   0xf   :  { %133 = vmatpush1.msra.mxu0 %v62_v14  ;;  %476 = vmatprep.subr.mxu1 %v3602_v32  ;;  %v3638_v40 = vld [vmem:[%s5659_s5 + $0x128] sm:$0xff]  ;;  %v48_v41 = vld [vmem:[%s5658_s4 + $0x20] sm:$0xff]  ;;  %v106_v53 = vld [vmem:[%s5658_s4 + $0x1f0] sm:$0xff] }
  0x10   :  { %134 = vmatprep.subr.mxu0 %v61_v15  ;;  %477 = vmatpush1.msra.mxu1 %v3611_v34  ;;  %v3647_v42 = vld [vmem:[%s5659_s5 + $0x120] sm:$0xff]  ;;  %v3656_v44 = vld [vmem:[%s5659_s5 + $0x108] sm:$0xff]  ;;  %v103_v59 = vld [vmem:[%s5658_s4 + $0x1d8] sm:$0xff] }
  0x11   :  { %135 = vmatpush1.msra.mxu0 %v60_v16  ;;  %478 = vmatprep.subr.mxu1 %v3620_v36  ;;  %v3665_v46 = vld [vmem:[%s5659_s5 + $0x100] sm:$0xff]  ;;  %v45_v47 = vld [vmem:[%s5658_s4 + $0x8] sm:$0xff]  ;;  %v102_v61 = vld [vmem:[%s5658_s4 + $0x1d0] sm:$0xff] }
  0x12   :  { %136 = vmatprep.subr.mxu0 %v59_v17  ;;  %479 = vmatpush1.msra.mxu1 %v3629_v38  ;;  %v3674_v48 = vld [vmem:[%s5659_s5 + $0xe8] sm:$0xff]  ;;  %v44_v49 = vld [vmem:[%s5658_s4] sm:$0xff]  ;;  %v99_v4 = vld [vmem:[%s5658_s4 + $0x1b8] sm:$0xff] }
  0x13   :  { %137 = vmatpush1.msra.mxu0 %v58_v19  ;;  %480 = vmatprep.subr.mxu1 %v3638_v40  ;;  %v3683_v50 = vld [vmem:[%s5659_s5 + $0xe0] sm:$0xff]  ;;  %v3692_v52 = vld [vmem:[%s5659_s5 + $0xc8] sm:$0xff]  ;;  %v98_v6 = vld [vmem:[%s5658_s4 + $0x1b0] sm:$0xff] }
  0x14   :  { %138 = vmatprep.subr.mxu0 %v57_v22  ;;  %481 = vmatpush1.msra.mxu1 %v3647_v42  ;;  %v3701_v54 = vld [vmem:[%s5659_s5 + $0xc0] sm:$0xff]  ;;  %v105_v55 = vld [vmem:[%s5658_s4 + $0x1e8] sm:$0xff]  ;;  %v95_v12 = vld [vmem:[%s5658_s4 + $0x198] sm:$0xff] }
  0x15   :  { %139 = vmatpush1.msra.mxu0 %v56_v24  ;;  %482 = vmatprep.subr.mxu1 %v3656_v44  ;;  %v3710_v56 = vld [vmem:[%s5659_s5 + $0xa8] sm:$0xff]  ;;  %v104_v57 = vld [vmem:[%s5658_s4 + $0x1e0] sm:$0xff]  ;;  %v94_v14 = vld [vmem:[%s5658_s4 + $0x190] sm:$0xff] }
  0x16   :  { %140 = vmatprep.subr.mxu0 %v55_v27  ;;  %483 = vmatpush1.msra.mxu1 %v3665_v46  ;;  %v43_v58 = vld [vmem:[%s5660_s1 + $0x8] sm:$0xff]  ;;  %v3726_v60 = vld [vmem:[%s5659_s5 + $0xa0] sm:$0xff]  ;;  %v91_v22 = vld [vmem:[%s5658_s4 + $0x178] sm:$0xff] }
  0x17   :  { %141 = vmatpush1.msra.mxu0 %v54_v29  ;;  %484 = vmatprep.subr.mxu1 %v3674_v48  ;;  %v3735_v62 = vld [vmem:[%s5659_s5 + $0x88] sm:$0xff]  ;;  %v3743_v0 = vld [vmem:[%s5659_s5 + $0x80] sm:$0xff]  ;;  %v90_v24 = vld [vmem:[%s5658_s4 + $0x170] sm:$0xff] }
  0x18   :  { %142 = vmatprep.subr.mxu0 %v53_v31  ;;  %485 = vmatpush1.msra.mxu1 %v3683_v50  ;;  %v101_v63 = vld [vmem:[%s5658_s4 + $0x1c8] sm:$0xff]  ;;  %v100_v1 = vld [vmem:[%s5658_s4 + $0x1c0] sm:$0xff]  ;;  %v87_v31 = vld [vmem:[%s5658_s4 + $0x158] sm:$0xff] }
  0x19   :  { %143 = vmatpush1.msra.mxu0 %v52_v33  ;;  %486 = vmatprep.subr.mxu1 %v3692_v52  ;;  %v3752_v2 = vld [vmem:[%s5659_s5 + $0x68] sm:$0xff]  ;;  %v3761_v5 = vld [vmem:[%s5659_s5 + $0x60] sm:$0xff]  ;;  %v86_v33 = vld [vmem:[%s5658_s4 + $0x150] sm:$0xff] }
  0x1a   :  { %144 = vmatprep.subr.mxu0 %v51_v35  ;;  %487 = vmatpush1.msra.mxu1 %v3701_v54  ;;  %v3770_v7 = vld [vmem:[%s5659_s5 + $0x48] sm:$0xff]  ;;  %v3779_v9 = vld [vmem:[%s5659_s5 + $0x40] sm:$0xff] }
  0x1b   :  { %145 = vmatpush1.msra.mxu0 %v50_v37  ;;  %488 = vmatprep.subr.mxu1 %v3710_v56  ;;  %v97_v8 = vld [vmem:[%s5658_s4 + $0x1a8] sm:$0xff]  ;;  %v96_v10 = vld [vmem:[%s5658_s4 + $0x1a0] sm:$0xff] }
  0x1c   :  { %146 = vmatprep.subr.mxu0 %v49_v39  ;;  %184 = vmatprep.mubr.f32.mxu0 %v43_v58  ;;  %v3788_v11 = vld [vmem:[%s5659_s5 + $0x28] sm:$0xff]  ;;  %v3797_v13 = vld [vmem:[%s5659_s5 + $0x20] sm:$0xff]  ;;  %v83_v39 = vld [vmem:[%s5658_s4 + $0x138] sm:$0xff] }
  0x1d   :  { %147 = vmatpush1.msra.mxu0 %v48_v41  ;;  %489 = vmatpush1.msra.mxu1 %v3726_v60  ;;  %5864 = vst [vmem:[#allocation6_spill] sm:$0xff] %v3797_v13  ;;  %v3806_v15 = vld [vmem:[%s5659_s5 + $0x8] sm:$0xff]  ;;  %v3815_v17 = vld [vmem:[%s5659_s5] sm:$0xff]  ;;  %v82_v41 = vld [vmem:[%s5658_s4 + $0x130] sm:$0xff] }
  0x1e   :  { %148 = vmatprep.subr.mxu0 %v47_v43  ;;  %490 = vmatprep.subr.mxu1 %v3735_v62  ;;  %5865 = vst [vmem:[#allocation7_spill] sm:$0xff] %v3806_v15  ;;  %v93_v16 = vld [vmem:[%s5658_s4 + $0x188] sm:$0xff]  ;;  %5866 = vst [vmem:[#allocation8_spill] sm:$0xff] %v3815_v17  ;;  %v92_v19 = vld [vmem:[%s5658_s4 + $0x180] sm:$0xff] }
  0x1f   :  { %149 = vmatpush1.msra.mxu0 %v46_v45  ;;  %491 = vmatpush1.msra.mxu1 %v3743_v0  ;;  %v89_v27 = vld [vmem:[%s5658_s4 + $0x168] sm:$0xff]  ;;  %v88_v29 = vld [vmem:[%s5658_s4 + $0x160] sm:$0xff] }
  0x20   :  { %150 = vmatprep.subr.mxu0 %v45_v47  ;;  %492 = vmatprep.subr.mxu1 %v3752_v2  ;;  %v85_v35 = vld [vmem:[%s5658_s4 + $0x148] sm:$0xff]  ;;  %v84_v37 = vld [vmem:[%s5658_s4 + $0x140] sm:$0xff]  ;;  %v79_v47 = vld [vmem:[%s5658_s4 + $0x118] sm:$0xff] }
  0x21   :  { %151 = vmatpush1.msra.mxu0 %v44_v49  ;;  %493 = vmatpush1.msra.mxu1 %v3761_v5  ;;  %v81_v43 = vld [vmem:[%s5658_s4 + $0x128] sm:$0xff]  ;;  %v80_v45 = vld [vmem:[%s5658_s4 + $0x120] sm:$0xff]  ;;  %v78_v49 = vld [vmem:[%s5658_s4 + $0x110] sm:$0xff] }
  0x22   :  { %152 = vmatprep.subr.mxu0 %v107_v51  ;;  %494 = vmatprep.subr.mxu1 %v3770_v7  ;;  %v77_v51 = vld [vmem:[%s5658_s4 + $0x108] sm:$0xff]  ;;  %v211_v58 = vld [vmem:[%s5661_s3 + $0x40] sm:$0xff] }
  0x23   :  { %153 = vmatpush2.msra.mxu0 %v106_v53  ;;  %495 = vmatpush1.msra.mxu1 %v3779_v9  ;;  %v76_v53 = vld [vmem:[%s5658_s4 + $0x100] sm:$0xff] }
  0x24   :  { %154 = vmatprep.subr.mxu0 %v105_v55  ;;  %496 = vmatprep.subr.mxu1 %v3788_v11  ;;  %v42_v55 = vld [vmem:[%s5660_s1] sm:$0xff] }
  0x25   :  { %155 = vmatpush2.msra.mxu0 %v104_v57  ;;  %497 = vmatpush1.msra.mxu1 %v3797_v13  ;;  %v212_v57 = vld [vmem:[%s5661_s3 + $0x48] sm:$0xff] }
  0x26   :  { %156 = vmatprep.subr.mxu0 %v103_v59  ;;  %498 = vmatprep.subr.mxu1 %v3806_v15  ;;  %v210_v59 = vld [vmem:[%s5661_s3 + $0x38] sm:$0xff] }
  0x27   :  { %157 = vmatpush2.msra.mxu0 %v102_v61  ;;  %499 = vmatpush1.msra.mxu1 %v3815_v17  ;;  %v209_v61 = vld [vmem:[%s5661_s3 + $0x30] sm:$0xff] }
  0x28   :  { %158 = vmatprep.subr.mxu0 %v101_v63  ;;  %533 = vmatmul.mubr.f32.vlgmr.msra.gmra.mxu1 %v5672_v3  ;;  %v208_v63 = vld [vmem:[%s5661_s3 + $0x28] sm:$0xff] }
  0x29   :  { %159 = vmatpush2.msra.mxu0 %v100_v1  ;;  %603 = vmatprep.mubr.f32.mxu1 %v5672_v3  ;;  %v207_v1 = vld [vmem:[%s5661_s3 + $0x20] sm:$0xff] }
  0x2a   :  { %160 = vmatprep.subr.mxu0 %v99_v4  ;;  %v206_v4 = vld [vmem:[%s5661_s3 + $0x18] sm:$0xff] }
  0x2b   :  { %161 = vmatpush2.msra.mxu0 %v98_v6  ;;  %v205_v6 = vld [vmem:[%s5661_s3 + $0x10] sm:$0xff] }
  0x2c   :  { %162 = vmatprep.subr.mxu0 %v97_v8  ;;  %v204_v8 = vld [vmem:[%s5661_s3 + $0x8] sm:$0xff] }
  0x2d   :  { %163 = vmatpush2.msra.mxu0 %v96_v10  ;;  %v203_v10 = vld [vmem:[%s5661_s3] sm:$0xff] }
  0x2e   :  { %164 = vmatprep.subr.mxu0 %v95_v12  ;;  %v195_v12 = vld [vmem:[%s5662_s0] sm:$0xff] }
  0x2f   :  { %165 = vmatpush2.msra.mxu0 %v94_v14  ;;  %v196_v14 = vld [vmem:[%s5662_s0 + $0x8] sm:$0xff] }
  0x30   :  { %166 = vmatprep.subr.mxu0 %v93_v16  ;;  %v197_v16 = vld [vmem:[%s5662_s0 + $0x10] sm:$0xff] }
  0x31   :  { %167 = vmatpush2.msra.mxu0 %v92_v19  ;;  %v198_v19 = vld [vmem:[%s5662_s0 + $0x18] sm:$0xff] }
  0x32   :  { %168 = vmatprep.subr.mxu0 %v91_v22  ;;  %v199_v22 = vld [vmem:[%s5662_s0 + $0x20] sm:$0xff] }
  0x33   :  { %169 = vmatpush2.msra.mxu0 %v90_v24  ;;  %v200_v24 = vld [vmem:[%s5662_s0 + $0x28] sm:$0xff] }
  0x34   :  { %170 = vmatprep.subr.mxu0 %v89_v27  ;;  %v201_v27 = vld [vmem:[%s5662_s0 + $0x30] sm:$0xff] }
  0x35   :  { %171 = vmatpush2.msra.mxu0 %v88_v29  ;;  %v202_v29 = vld [vmem:[%s5662_s0 + $0x38] sm:$0xff] }
  0x36   :  { %172 = vmatprep.subr.mxu0 %v87_v31  ;;  %v110_v31 = vlaneseq }
  0x37   :  { %173 = vmatpush2.msra.mxu0 %v86_v33 }
  0x38   :  { %174 = vmatprep.subr.mxu0 %v85_v35  ;;  %v3947_v33 = vshrl.u32 %v110_v31, 7 }
  0x39   :  { %175 = vmatpush2.msra.mxu0 %v84_v37  ;;  %v108_v37 = vld [vmem:[%s5663_s7] sm:$0x3] }
  0x3a   :  { %176 = vmatprep.subr.mxu0 %v83_v39  ;;  %v5671_v35 = vsub.s32 0, %v3947_v33 }
  0x3b   :  { %177 = vmatpush2.msra.mxu0 %v82_v41 }
  0x3c   :  { %178 = vmatprep.subr.mxu0 %v81_v43  ;;  %v113_v41 = vrot.slane %v108_v37, %v5671_v35  ;;  %v4090_v35 = vld [vmem:[%s5659_s5 + $0x138] sm:$0xff] }
  0x3d   :  { %179 = vmatpush2.msra.mxu0 %v80_v45  ;;  %5893 = vst [vmem:[#allocation35_spill] sm:$0xff] %v4090_v35 }
  0x3e   :  { %180 = vmatprep.subr.mxu0 %v79_v47 }
  0x3f   :  { %181 = vmatpush2.msra.mxu0 %v78_v49  ;;  %v5670_v49 = vsub.s32 1, %v3947_v33 }
  0x40   :  { %182 = vmatprep.subr.mxu0 %v77_v51 }
  0x41   :  { %183 = vmatpush2.msra.mxu0 %v76_v53 }
  0x42   :  { %185 = vmatmul.mubr.f32.vlgmr.msra.gmra.mxu0 %v42_v55  ;;  %260 = vmatprep.subr.mxu0 %v212_v57 }
  0x43   :  { %261 = vmatpush1.msra.mxu0 %v211_v58  ;;  %302 = vmatprep.mubr.f32.mxu0 %v5672_v3 }
  0x44   :  { %262 = vmatprep.subr.mxu0 %v210_v59  ;;  %v117_v59 = vrot.slane %v108_v37, %v5670_v49  ;;  %v4083_v49 = vld [vmem:[%s5659_s5 + $0x150] sm:$0xff] }
  0x45   :  { %263 = vmatpush1.msra.mxu0 %v209_v61  ;;  %5892 = vst [vmem:[#allocation34_spill] sm:$0xff] %v4083_v49 }
  0x46   :  { %264 = vmatprep.subr.mxu0 %v208_v63 }
  0x47   :  { %265 = vmatpush1.msra.mxu0 %v207_v1 }
  0x48   :  { %266 = vmatprep.subr.mxu0 %v206_v4 }
  0x49   :  { %267 = vmatpush1.msra.mxu0 %v205_v6 }
  0x4a   :  { %268 = vmatprep.subr.mxu0 %v204_v8 }
  0x4b   :  { %269 = vmatpush1.msra.mxu0 %v203_v10 }
  0x4c   :  { %2969 = vmatmul.mubr.msk.f32.vlgmr.msra.gmra.mxu0 %vm213_vm0, %v195_v12 }
  0x4d   :  { %308 = vmatprep.mubr.f32.mxu0 %v5672_v3 }
  0x50   :  { %2970 = vmatmul.mubr.msk.f32.gmra.mxu0 %vm213_vm0, %v196_v14 }
  0x51   :  { %314 = vmatprep.mubr.f32.mxu0 %v5672_v3 }
  0x54   :  { %2971 = vmatmul.mubr.msk.f32.gmra.mxu0 %vm213_vm0, %v197_v16 }
  0x55   :  { %320 = vmatprep.mubr.f32.mxu0 %v5672_v3 }
  0x58   :  { %2972 = vmatmul.mubr.msk.f32.gmra.mxu0 %vm213_vm0, %v198_v19 }
  0x59   :  { %326 = vmatprep.mubr.f32.mxu0 %v5672_v3 }
  0x5c   :  { %2973 = vmatmul.mubr.msk.f32.gmra.mxu0 %vm213_vm0, %v199_v22 }
  0x5d   :  { %332 = vmatprep.mubr.f32.mxu0 %v5672_v3 }
  0x60   :  { %2974 = vmatmul.mubr.msk.f32.gmra.mxu0 %vm213_vm0, %v200_v24 }
  0x61   :  { %338 = vmatprep.mubr.f32.mxu0 %v5672_v3 }
  0x64   :  { %2975 = vmatmul.mubr.msk.f32.gmra.mxu0 %vm213_vm0, %v201_v27 }
  0x65   :  { %344 = vmatprep.mubr.f32.mxu0 %v5672_v3 }
  0x68   :  { %2976 = vmatmul.mubr.msk.f32.gmra.mxu0 %vm213_vm0, %v202_v29 }
  0x69   :  { %896 = vmatprep.mubr.f32.mxu0 %v5672_v3  ;;  %v4097_v3 = vld [vmem:[%s5659_s5 + $0x130] sm:$0xff] }
  0x6a   :  { %5894 = vst [vmem:[#allocation36_spill] sm:$0xff] %v4097_v3 }
  0xe8   :  { %v534_v53 = vpop.f32.mrf.mxu1 }
  0xea   :  { %v536_v27 = vpop.f32.mrf.mxu1 }
 0x102   :  { %v186_v39 = vpop.f32.mrf.mxu0 }
 0x103   :  { %v3955_v45 = vadd.f32 %v186_v39, %v113_v41 }
 0x104   :  { %v188_v43 = vpop.f32.mrf.mxu0 }
 0x105   :  { %5867 = vst [vmem:[#allocation9_spill] sm:$0xff] %v3955_v45  ;;  %v3965_v4 = vadd.f32 %v188_v43, %v117_v59 }
 0x107   :  { %5870 = vst [vmem:[#allocation12_spill] sm:$0xff] %v3965_v4 }
 0x10c   :  { %v304_v47 = vpop.f32.mrf.mxu0 }
 0x10d   :  { %v353_v51 = vadd.f32 %v304_v47, %v3955_v45 }
 0x10e   :  { %v306_v55 = vpop.f32.mrf.mxu0 }
 0x10f   :  { %v612_v57 = vadd.f32 %v534_v53, %v353_v51  ;;  %v354_v16 = vadd.f32 %v306_v55, %v3965_v4 }
 0x110   :  { %v3959_v58 = vpop.f32.mrf.mxu0 }
 0x111   :  { %5868 = vst [vmem:[#allocation10_spill] sm:$0xff] %v3959_v58  ;;  %v2977_v61 = vmul.f32 -1.442695, %v612_v57  ;;  %v3983_v31 = vadd.f32 %v536_v27, %v354_v16  ;;  %v4011_v27 = vld [vmem:[%s5659_s5 + $0x1f8] sm:$0xff] }
 0x112   :  { %v3963_v63 = vpop.f32.mrf.mxu0  ;;  %539 = vmatprep.subr.mxu1 %v4011_v27  ;;  %832 = vmatprep.subr.mxu0 %v4011_v27 }
 0x113   :  { %5869 = vst [vmem:[#allocation11_spill] sm:$0xff] %v3963_v63  ;;  %3111 = vpow2.f32 %v2977_v61 }
 0x114   :  { %v316_v1 = vpop.f32.mrf.mxu0  ;;  %3113 = vtanh.f32 %v3983_v31 }
 0x115   :  { %v3968_v6 = vadd.f32 %v316_v1, %v3955_v45 }
 0x116   :  { %v318_v8 = vpop.f32.mrf.mxu0 }
 0x117   :  { %5871 = vst [vmem:[#allocation13_spill] sm:$0xff] %v3968_v6  ;;  %v3971_v10 = vadd.f32 %v318_v8, %v3965_v4  ;;  %v4174_v6 = vld [vmem:[%s5659_s5 + $0x78] sm:$0xff] }
 0x118   :  { %v322_v12 = vpop.f32.mrf.mxu0  ;;  %5905 = vst [vmem:[#allocation47_spill] sm:$0xff] %v4174_v6 }
 0x119   :  { %5872 = vst [vmem:[#allocation14_spill] sm:$0xff] %v3971_v10  ;;  %v3974_v14 = vadd.f32 %v322_v12, %v3955_v45  ;;  %v4167_v10 = vld [vmem:[%s5659_s5 + $0x90] sm:$0xff] }
 0x11a   :  { %v324_v19 = vpop.f32.mrf.mxu0  ;;  %5904 = vst [vmem:[#allocation46_spill] sm:$0xff] %v4167_v10 }
 0x11b   :  { %5873 = vst [vmem:[#allocation15_spill] sm:$0xff] %v3974_v14  ;;  %v3978_v22 = vadd.f32 %v324_v19, %v3965_v4  ;;  %v4160_v14 = vld [vmem:[%s5659_s5 + $0x98] sm:$0xff] }
 0x11c   :  { %v328_v24 = vpop.f32.mrf.mxu0  ;;  %5903 = vst [vmem:[#allocation45_spill] sm:$0xff] %v4160_v14 }
 0x11d   :  { %5874 = vst [vmem:[#allocation16_spill] sm:$0xff] %v3978_v22  ;;  %v3981_v29 = vadd.f32 %v328_v24, %v3955_v45  ;;  %v4153_v22 = vld [vmem:[%s5659_s5 + $0xb0] sm:$0xff] }
 0x11e   :  { %v330_v37 = vpop.f32.mrf.mxu0  ;;  %5902 = vst [vmem:[#allocation44_spill] sm:$0xff] %v4153_v22 }
 0x11f   :  { %5875 = vst [vmem:[#allocation17_spill] sm:$0xff] %v3981_v29  ;;  %v3986_v39 = vadd.f32 %v330_v37, %v3965_v4  ;;  %v4016_v37 = vld [vmem:[%s5659_s5 + $0x1f0] sm:$0xff]  ;;  %v4146_v29 = vld [vmem:[%s5659_s5 + $0xb8] sm:$0xff] }
 0x120   :  { %v3112_v41 = vpop.eup %3111  ;;  %v334_v43 = vpop.f32.mrf.mxu0  ;;  %5882 = vst [vmem:[#allocation24_spill] sm:$0xff] %v4016_v37  ;;  %540 = vmatpush1.msra.mxu1 %v4016_v37  ;;  %833 = vmatpush1.msra.mxu0 %v4016_v37  ;;  %5901 = vst [vmem:[#allocation43_spill] sm:$0xff] %v4146_v29 }
 0x121   :  { %5876 = vst [vmem:[#allocation18_spill] sm:$0xff] %v3986_v39  ;;  %v617_v47 = vadd.f32 1.0, %v3112_v41  ;;  %v3989_v51 = vadd.f32 %v334_v43, %v3955_v45  ;;  %v3114_v16 = vpop.eup %3113  ;;  %v4021_v41 = vld [vmem:[%s5659_s5 + $0x1d8] sm:$0xff]  ;;  %v4027_v43 = vld [vmem:[%s5659_s5 + $0x1d0] sm:$0xff] }
 0x122   :  { %v336_v53 = vpop.f32.mrf.mxu0  ;;  %5883 = vst [vmem:[#allocation25_spill] sm:$0xff] %v4021_v41  ;;  %5884 = vst [vmem:[#allocation26_spill] sm:$0xff] %v4027_v43  ;;  %541 = vmatprep.subr.mxu1 %v4021_v41  ;;  %834 = vmatprep.subr.mxu0 %v4021_v41  ;;  %v4139_v39 = vld [vmem:[%s5659_s5 + $0xd0] sm:$0xff] }
 0x123   :  { %5877 = vst [vmem:[#allocation19_spill] sm:$0xff] %v3989_v51  ;;  %3115 = vrcp.f32 %v617_v47  ;;  %v3993_v55 = vadd.f32 %v336_v53, %v3965_v4  ;;  %v4034_v47 = vld [vmem:[%s5659_s5 + $0x1b8] sm:$0xff]  ;;  %v4041_v53 = vld [vmem:[%s5659_s5 + $0x1b0] sm:$0xff]  ;;  %542 = vmatpush1.msra.mxu1 %v4027_v43  ;;  %835 = vmatpush1.msra.mxu0 %v4027_v43  ;;  %5900 = vst [vmem:[#allocation42_spill] sm:$0xff] %v4139_v39 }
 0x124   :  { %v340_v57 = vpop.f32.mrf.mxu0  ;;  %5885 = vst [vmem:[#allocation27_spill] sm:$0xff] %v4034_v47  ;;  %5886 = vst [vmem:[#allocation28_spill] sm:$0xff] %v4041_v53  ;;  %543 = vmatprep.subr.mxu1 %v4034_v47  ;;  %836 = vmatprep.subr.mxu0 %v4034_v47  ;;  %v4132_v51 = vld [vmem:[%s5659_s5 + $0xd8] sm:$0xff] }
 0x125   :  { %5878 = vst [vmem:[#allocation20_spill] sm:$0xff] %v3993_v55  ;;  %v3996_v59 = vadd.f32 %v340_v57, %v3955_v45  ;;  %v4048_v57 = vld [vmem:[%s5659_s5 + $0x198] sm:$0xff]  ;;  %544 = vmatpush1.msra.mxu1 %v4041_v53  ;;  %837 = vmatpush1.msra.mxu0 %v4041_v53  ;;  %v4125_v55 = vld [vmem:[%s5659_s5 + $0xf0] sm:$0xff]  ;;  %5899 = vst [vmem:[#allocation41_spill] sm:$0xff] %v4132_v51  ;;  %v629_v53 = vpop.permute.xlu0 %628 }
 0x126   :  { %v342_v61 = vpop.f32.mrf.mxu0  ;;  %5887 = vst [vmem:[#allocation29_spill] sm:$0xff] %v4048_v57  ;;  %545 = vmatprep.subr.mxu1 %v4048_v57  ;;  %838 = vmatprep.subr.mxu0 %v4048_v57  ;;  %5898 = vst [vmem:[#allocation40_spill] sm:$0xff] %v4125_v55 }
 0x127   :  { %5879 = vst [vmem:[#allocation21_spill] sm:$0xff] %v3996_v59  ;;  %v3999_v1 = vadd.f32 %v342_v61, %v3965_v4  ;;  %v4055_v61 = vld [vmem:[%s5659_s5 + $0x190] sm:$0xff]  ;;  %v4118_v59 = vld [vmem:[%s5659_s5 + $0xf8] sm:$0xff] }
 0x128   :  { %v346_v8 = vpop.f32.mrf.mxu0  ;;  %5888 = vst [vmem:[#allocation30_spill] sm:$0xff] %v4055_v61  ;;  %546 = vmatpush1.msra.mxu1 %v4055_v61  ;;  %839 = vmatpush1.msra.mxu0 %v4055_v61  ;;  %5897 = vst [vmem:[#allocation39_spill] sm:$0xff] %v4118_v59  ;;  %v2978_v61 = vmul.f32 -1.442695, %v3983_v31  ;;  %v5921_v31 = vsub.s32 0, %v3947_v33 }
 0x129   :  { %5880 = vst [vmem:[#allocation22_spill] sm:$0xff] %v3999_v1  ;;  %v4002_v12 = vadd.f32 %v346_v8, %v3955_v45  ;;  %v4062_v8 = vld [vmem:[%s5659_s5 + $0x178] sm:$0xff]  ;;  %v4111_v1 = vld [vmem:[%s5659_s5 + $0x110] sm:$0xff] }
 0x12a   :  { %5889 = vst [vmem:[#allocation31_spill] sm:$0xff] %v4062_v8  ;;  %547 = vmatprep.subr.mxu1 %v4062_v8  ;;  %840 = vmatprep.subr.mxu0 %v4062_v8  ;;  %5896 = vst [vmem:[#allocation38_spill] sm:$0xff] %v4111_v1  ;;  %v4326_v8 = vld [vmem:[%s5664_s6] sm:$0xff]  ;;  %3117 = vpow2.f32 %v2978_v61 }
 0x12b   :  { %5881 = vst [vmem:[#allocation23_spill] sm:$0xff] %v4002_v12  ;;  %v4104_v12 = vld [vmem:[%s5659_s5 + $0x118] sm:$0xff]  ;;  %5919 = vst [vmem:[#allocation60_spill] sm:$0xff] %v4326_v8 }
 0x12c   :  { %5895 = vst [vmem:[#allocation37_spill] sm:$0xff] %v4104_v12 }
 0x130   :  { %v4004_v19 = vpop.eup %3115 }
 0x131   :  { %v632_v24 = vmul.f32 %v4004_v19, %v3114_v16  ;;  %v4069_v16 = vld [vmem:[%s5659_s5 + $0x170] sm:$0xff]  ;;  %v631_v43 = vmul.f32 %v4004_v19, %v629_v53 }
 0x132   :  { %5890 = vst [vmem:[#allocation32_spill] sm:$0xff] %v4069_v16  ;;  %548 = vmatpush1.msra.mxu1 %v4069_v16  ;;  %841 = vmatpush1.msra.mxu0 %v4069_v16  ;;  %v4320_v16 = vld [vmem:[%s5664_s6 + $0x8] sm:$0xff] }
 0x133   :  { %634 = vrot.lane.b32.xlu0 %v632_v24, %s3418_s23  ;;  %v4076_v24 = vld [vmem:[%s5659_s5 + $0x158] sm:$0xff]  ;;  %5918 = vst [vmem:[#allocation59_spill] sm:$0xff] %v4320_v16 }
 0x134   :  { %5891 = vst [vmem:[#allocation33_spill] sm:$0xff] %v4076_v24  ;;  %549 = vmatprep.subr.mxu1 %v4076_v24  ;;  %842 = vmatprep.subr.mxu0 %v4076_v24  ;;  %v4314_v24 = vld [vmem:[%s5664_s6 + $0x10] sm:$0xff] }
 0x135   :  { %550 = vmatpush1.msra.mxu1 %v4083_v49  ;;  %843 = vmatpush1.msra.mxu0 %v4083_v49  ;;  %v4308_v49 = vld [vmem:[%s5664_s6 + $0x18] sm:$0xff]  ;;  %5917 = vst [vmem:[#allocation58_spill] sm:$0xff] %v4314_v24 }
 0x136   :  { %551 = vmatprep.subr.mxu1 %v4090_v35  ;;  %844 = vmatprep.subr.mxu0 %v4090_v35  ;;  %v4302_v35 = vld [vmem:[%s5664_s6 + $0x20] sm:$0xff]  ;;  %5916 = vst [vmem:[#allocation57_spill] sm:$0xff] %v4308_v49 }
 0x137   :  { %552 = vmatpush1.msra.mxu1 %v4097_v3  ;;  %845 = vmatpush1.msra.mxu0 %v4097_v3  ;;  %v4296_v3 = vld [vmem:[%s5664_s6 + $0x28] sm:$0xff]  ;;  %5915 = vst [vmem:[#allocation56_spill] sm:$0xff] %v4302_v35  ;;  %v3118_v57 = vpop.eup %3117 }
 0x138   :  { %553 = vmatprep.subr.mxu1 %v4104_v12  ;;  %846 = vmatprep.subr.mxu0 %v4104_v12  ;;  %v4290_v12 = vld [vmem:[%s5664_s6 + $0x30] sm:$0xff]  ;;  %v624_v47 = vadd.f32 1.0, %v3118_v57  ;;  %v5922_v57 = vsub.s32 1, %v3947_v33 }
 0x139   :  { %554 = vmatpush1.msra.mxu1 %v4111_v1  ;;  %847 = vmatpush1.msra.mxu0 %v4111_v1  ;;  %v4284_v1 = vld [vmem:[%s5664_s6 + $0x38] sm:$0xff] }
 0x13a   :  { %555 = vmatprep.subr.mxu1 %v4118_v59  ;;  %848 = vmatprep.subr.mxu0 %v4118_v59  ;;  %v4278_v59 = vld [vmem:[%s5664_s6 + $0x40] sm:$0xff]  ;;  %3119 = vrcp.f32 %v624_v47 }
 0x13b   :  { %556 = vmatpush1.msra.mxu1 %v4125_v55  ;;  %849 = vmatpush1.msra.mxu0 %v4125_v55  ;;  %v4272_v55 = vld [vmem:[%s5664_s6 + $0x48] sm:$0xff] }
 0x13c   :  { %557 = vmatprep.subr.mxu1 %v4132_v51  ;;  %850 = vmatprep.subr.mxu0 %v4132_v51  ;;  %v5914_v51 = vmov 0.0  }
 0x13d   :  { %558 = vmatpush1.msra.mxu1 %v4139_v39  ;;  %851 = vmatpush1.msra.mxu0 %v4139_v39  ;;  %v4181_v39 = vld [vmem:[%s5659_s5 + $0x70] sm:$0xff] }
 0x13e   :  { %559 = vmatprep.subr.mxu1 %v4146_v29  ;;  %852 = vmatprep.subr.mxu0 %v4146_v29  ;;  %5906 = vst [vmem:[#allocation48_spill] sm:$0xff] %v4181_v39  ;;  %v4188_v29 = vld [vmem:[%s5659_s5 + $0x58] sm:$0xff] }
 0x13f   :  { %560 = vmatpush1.msra.mxu1 %v4153_v22  ;;  %853 = vmatpush1.msra.mxu0 %v4153_v22  ;;  %5907 = vst [vmem:[#allocation49_spill] sm:$0xff] %v4188_v29  ;;  %v4195_v22 = vld [vmem:[%s5659_s5 + $0x50] sm:$0xff] }
 0x140   :  { %561 = vmatprep.subr.mxu1 %v4160_v14  ;;  %854 = vmatprep.subr.mxu0 %v4160_v14  ;;  %5908 = vst [vmem:[#allocation50_spill] sm:$0xff] %v4195_v22  ;;  %v4202_v14 = vld [vmem:[%s5659_s5 + $0x38] sm:$0xff] }
 0x141   :  { %562 = vmatpush1.msra.mxu1 %v4167_v10  ;;  %855 = vmatpush1.msra.mxu0 %v4167_v10  ;;  %5909 = vst [vmem:[#allocation51_spill] sm:$0xff] %v4202_v14  ;;  %v4209_v10 = vld [vmem:[%s5659_s5 + $0x30] sm:$0xff] }
 0x142   :  { %563 = vmatprep.subr.mxu1 %v4174_v6  ;;  %856 = vmatprep.subr.mxu0 %v4174_v6  ;;  %5910 = vst [vmem:[#allocation52_spill] sm:$0xff] %v4209_v10  ;;  %v4216_v6 = vld [vmem:[%s5659_s5 + $0x18] sm:$0xff] }
 0x143   :  { %564 = vmatpush1.msra.mxu1 %v4181_v39  ;;  %857 = vmatpush1.msra.mxu0 %v4181_v39  ;;  %5911 = vst [vmem:[#allocation53_spill] sm:$0xff] %v4216_v6  ;;  %v4223_v39 = vld [vmem:[%s5659_s5 + $0x10] sm:$0xff] }
 0x144   :  { %565 = vmatprep.subr.mxu1 %v4188_v29  ;;  %858 = vmatprep.subr.mxu0 %v4188_v29  ;;  %5912 = vst [vmem:[#allocation54_spill] sm:$0xff] %v4223_v39  ;;  %v4230_v29 = vld [vmem:[%s5664_s6 + $0x78] sm:$0xff] }
 0x145   :  { %566 = vmatpush1.msra.mxu1 %v4195_v22  ;;  %859 = vmatpush1.msra.mxu0 %v4195_v22  ;;  %5913 = vst [vmem:[#allocation55_spill] sm:$0xff] %v4230_v29  ;;  %v4237_v22 = vld [vmem:[%s5664_s6 + $0x70] sm:$0xff] }
 0x146   :  { %567 = vmatprep.subr.mxu1 %v4202_v14  ;;  %860 = vmatprep.subr.mxu0 %v4202_v14  ;;  %v4244_v14 = vld [vmem:[%s5664_s6 + $0x68] sm:$0xff] }
 0x147   :  { %568 = vmatpush1.msra.mxu1 %v4209_v10  ;;  %861 = vmatpush1.msra.mxu0 %v4209_v10  ;;  %v4252_v10 = vld [vmem:[%s5664_s6 + $0x60] sm:$0xff]  ;;  %v3120_v63 = vpop.eup %3119 }
 0x148   :  { %569 = vmatprep.subr.mxu1 %v4216_v6  ;;  %862 = vmatprep.subr.mxu0 %v4216_v6  ;;  %v4258_v6 = vld [vmem:[%s5664_s6 + $0x58] sm:$0xff] }
 0x149   :  { %570 = vmatpush1.msra.mxu1 %v4223_v39  ;;  %863 = vmatpush1.msra.mxu0 %v4223_v39  ;;  %v4265_v39 = vld [vmem:[%s5664_s6 + $0x50] sm:$0xff] }
 0x14a   :  { %604 = vmatmul.mubr.f32.vlgmr.msra.gmra.mxu1 %v5914_v51  ;;  %662 = vmatprep.subr.mxu1 %v4230_v29 }
 0x14b   :  { %663 = vmatpush1.msra.mxu1 %v4237_v22  ;;  %710 = vmatprep.mubr.f32.mxu1 %v5914_v51 }
 0x14c   :  { %664 = vmatprep.subr.mxu1 %v4244_v14  ;;  %1040 = vmatprep.subr.mxu0 %v3538_v18 }
 0x14d   :  { %665 = vmatpush1.msra.mxu1 %v4252_v10 }
 0x14e   :  { %666 = vmatprep.subr.mxu1 %v4258_v6 }
 0x14f   :  { %667 = vmatpush1.msra.mxu1 %v4265_v39 }
 0x150   :  { %668 = vmatprep.subr.mxu1 %v4272_v55 }
 0x151   :  { %669 = vmatpush1.msra.mxu1 %v4278_v59 }
 0x152   :  { %670 = vmatprep.subr.mxu1 %v4284_v1 }
 0x153   :  { %671 = vmatpush1.msra.mxu1 %v4290_v12 }
 0x154   :  { %672 = vmatprep.subr.mxu1 %v4296_v3 }
 0x155   :  { %673 = vmatpush1.msra.mxu1 %v4302_v35 }
 0x156   :  { %674 = vmatprep.subr.mxu1 %v4308_v49 }
 0x157   :  { %675 = vmatpush1.msra.mxu1 %v4314_v24 }
 0x158   :  { %676 = vmatprep.subr.mxu1 %v4320_v16 }
 0x159   :  { %677 = vmatpush1.msra.mxu1 %v4326_v8 }
 0x15a   :  { %761 = vmatprep.subr.mxu1 %v3538_v18 }
 0x1a5   :  { %v635_v41 = vpop.permute.xlu0 %634 }
 0x1a6   :  { %v4334_v37 = vadd.f32 %v635_v41, %v631_v43 }
 0x1a8   :  { %5920 = vst [vmem:[#allocation61_spill] sm:$0xff] %v4334_v37  ;;  %3121 = vtanh.f32 %v4334_v37 }
 0x1b5   :  { %v3122_v4 = vpop.eup %3121 }
 0x1b6   :  { %v639_v58 = vmul.f32 %v3122_v4, %v3120_v63  ;;  %v465_v63 = vld [vmem:[%s5665_s8] sm:$0x3] }
 0x1b7   :  { %v4385_v61 = vrot.slane %v465_v63, %v5922_v57  ;;  %v5935_v57 = vld [vmem:[#allocation26_spill] sm:$0xff] }
 0x1b8   :  { %641 = vrot.lane.b32.xlu1 %v639_v58, %s3418_s23 }
 0x20a   :  { %v605_v58 = vpop.f32.mrf.mxu1 }
 0x20c   :  { %v607_v4 = vpop.f32.mrf.mxu1 }
 0x22a   :  { %v4338_v18 = vpop.permute.xlu1 %641 }
 0x22b   :  { %2979 = vmatmul.mubr.msk.f32.vlgmr.msra.gmra.mxu1 %vm643_vm1, %v4338_v18 }
 0x22c   :  { %762 = vmatpush1.msra.mxu1 %v3547_v20  ;;  %825 = vmatprep.mubr.f32.mxu1 %v5914_v51  ;;  %v4380_v51 = vrot.slane %v465_v63, %v5921_v31 }
 0x22d   :  { %763 = vmatprep.subr.mxu1 %v3552_v21 }
 0x22e   :  { %764 = vmatpush1.msra.mxu1 %v3561_v23 }
 0x22f   :  { %765 = vmatprep.subr.mxu1 %v3570_v25 }
 0x230   :  { %766 = vmatpush1.msra.mxu1 %v3575_v26 }
 0x231   :  { %767 = vmatprep.subr.mxu1 %v3584_v28 }
 0x232   :  { %768 = vmatpush1.msra.mxu1 %v3593_v30 }
 0x233   :  { %769 = vmatprep.subr.mxu1 %v3602_v32 }
 0x234   :  { %770 = vmatpush1.msra.mxu1 %v3611_v34 }
 0x235   :  { %771 = vmatprep.subr.mxu1 %v3620_v36 }
 0x236   :  { %772 = vmatpush1.msra.mxu1 %v3629_v38 }
 0x237   :  { %773 = vmatprep.subr.mxu1 %v3638_v40 }
 0x238   :  { %774 = vmatpush1.msra.mxu1 %v3647_v42 }
 0x239   :  { %775 = vmatprep.subr.mxu1 %v3656_v44 }
 0x23a   :  { %776 = vmatpush1.msra.mxu1 %v3665_v46 }
 0x23b   :  { %777 = vmatprep.subr.mxu1 %v3674_v48 }
 0x23c   :  { %778 = vmatpush1.msra.mxu1 %v3683_v50 }
 0x23d   :  { %779 = vmatprep.subr.mxu1 %v3692_v52 }
 0x23e   :  { %780 = vmatpush1.msra.mxu1 %v3701_v54 }
 0x23f   :  { %781 = vmatprep.subr.mxu1 %v3710_v56 }
 0x240   :  { %782 = vmatpush1.msra.mxu1 %v3726_v60 }
 0x241   :  { %783 = vmatprep.subr.mxu1 %v3735_v62 }
 0x242   :  { %784 = vmatpush1.msra.mxu1 %v3743_v0 }
 0x243   :  { %785 = vmatprep.subr.mxu1 %v3752_v2 }
 0x244   :  { %786 = vmatpush1.msra.mxu1 %v3761_v5 }
 0x245   :  { %787 = vmatprep.subr.mxu1 %v3770_v7 }
 0x246   :  { %788 = vmatpush1.msra.mxu1 %v3779_v9 }
 0x247   :  { %789 = vmatprep.subr.mxu1 %v3788_v11 }
 0x248   :  { %790 = vmatpush1.msra.mxu1 %v3797_v13 }
 0x249   :  { %791 = vmatprep.subr.mxu1 %v3806_v15 }
 0x24a   :  { %792 = vmatpush1.msra.mxu1 %v3815_v17 }
 0x24b   :  { %951 = vmatprep.subr.mxu1 %v4230_v29 }
 0x2eb   :  { %v712_v19 = vpop.f32.mrf.mxu1 }
 0x2ec   :  { %v717_v41 = vadd.f32 %v712_v19, %v605_v58 }
 0x2ed   :  { %v714_v53 = vpop.f32.mrf.mxu1 }
 0x2ee   :  { %v730_v43 = vadd.f32 %v4380_v51, %v717_v41  ;;  %v718_v37 = vadd.f32 %v714_v53, %v607_v4  ;;  %v5934_v53 = vld [vmem:[#allocation25_spill] sm:$0xff] }
 0x2f0   :  { %v2980_v47 = vmul.f32 -1.442695, %v730_v43  ;;  %v731_v45 = vadd.f32 %v4385_v61, %v718_v37 }
 0x2f2   :  { %3123 = vpow2.f32 %v2980_v47  ;;  %v2981_v58 = vmul.f32 -1.442695, %v731_v45  ;;  %v5933_v47 = vld [vmem:[#allocation24_spill] sm:$0xff] }
 0x2f3   :  { %3125 = vtanh.f32 %v731_v45 }
 0x2ff   :  { %v3124_v29 = vpop.eup %3123 }
 0x300   :  { %v735_v17 = vadd.f32 1.0, %v3124_v29  ;;  %v3126_v31 = vpop.eup %3125 }
 0x302   :  { %3127 = vrcp.f32 %v735_v17 }
 0x303   :  { %3129 = vpow2.f32 %v2981_v58  ;;  %v5937_v58 = vld [vmem:[#allocation28_spill] sm:$0xff] }
 0x30f   :  { %v3128_v15 = vpop.eup %3127 }
 0x310   :  { %v746_v13 = vmul.f32 %v3128_v15, %v3126_v31  ;;  %v3130_v19 = vpop.eup %3129  ;;  %v745_v43 = vmul.f32 0.0, %v3128_v15  ;;  %v5936_v31 = vld [vmem:[#allocation27_spill] sm:$0xff] }
 0x311   :  { %v742_v41 = vadd.f32 1.0, %v3130_v19  ;;  %v5938_v19 = vld [vmem:[#allocation29_spill] sm:$0xff] }
 0x312   :  { %748 = vrot.lane.b32.xlu1 %v746_v13, %s3418_s23  ;;  %v4398_v13 = vld [vmem:[#allocation5 + $0x8] sm:$0xff] }
 0x313   :  { %3131 = vrcp.f32 %v742_v41  ;;  %v5939_v41 = vld [vmem:[#allocation30_spill] sm:$0xff] }
 0x320   :  { %v3132_v37 = vpop.eup %3131 }
 0x384   :  { %v749_v33 = vpop.permute.xlu1 %748 }
 0x385   :  { %v4389_v63 = vadd.f32 %v749_v33, %v745_v43  ;;  %v5940_v43 = vld [vmem:[#allocation31_spill] sm:$0xff]  ;;  %v5941_v33 = vld [vmem:[#allocation32_spill] sm:$0xff] }
 0x387   :  { %3133 = vtanh.f32 %v4389_v63 }
 0x394   :  { %v3134_v29 = vpop.eup %3133 }
 0x395   :  { %v4392_v4 = vmul.f32 %v3134_v29, %v3132_v37  ;;  %v5942_v37 = vld [vmem:[#allocation33_spill] sm:$0xff]  ;;  %v5943_v29 = vld [vmem:[#allocation34_spill] sm:$0xff] }
 0x397   :  { %5923 = vst [vmem:[#allocation62_spill] sm:$0xff] %v4392_v4  ;;  %v760_v17 = vsel %vm643_vm1, %v4338_v18, %v4392_v4 }
 0x398   :  { %826 = vmatmul.mubr.f32.vlgmr.msra.gmra.mxu1 %v760_v17  ;;  %897 = vmatmul.mubr.f32.vlgmr.msra.gmra.mxu0 %v760_v17  ;;  %v5944_v17 = vld [vmem:[#allocation35_spill] sm:$0xff] }
 0x399   :  { %952 = vmatpush1.msra.mxu1 %v4237_v22  ;;  %999 = vmatprep.mubr.f32.mxu1 %v4398_v13 }
 0x39a   :  { %953 = vmatprep.subr.mxu1 %v4244_v14  ;;  %1041 = vmatpush1.msra.mxu0 %v3547_v20  ;;  %v5924_v20 = vld [vmem:[#allocation6_spill] sm:$0xff] }
 0x39b   :  { %954 = vmatpush1.msra.mxu1 %v4252_v10  ;;  %1042 = vmatprep.subr.mxu0 %v3552_v21  ;;  %v5925_v21 = vld [vmem:[#allocation7_spill] sm:$0xff] }
 0x39c   :  { %955 = vmatprep.subr.mxu1 %v4258_v6  ;;  %1043 = vmatpush1.msra.mxu0 %v3561_v23  ;;  %v5926_v23 = vld [vmem:[#allocation8_spill] sm:$0xff] }
 0x39d   :  { %956 = vmatpush1.msra.mxu1 %v4265_v39  ;;  %1044 = vmatprep.subr.mxu0 %v3570_v25  ;;  %v5927_v25 = vld [vmem:[#allocation55_spill] sm:$0xff] }
 0x39e   :  { %957 = vmatprep.subr.mxu1 %v4272_v55  ;;  %1045 = vmatpush1.msra.mxu0 %v3575_v26  ;;  %v5928_v26 = vld [vmem:[#allocation9_spill] sm:$0xff] }
 0x39f   :  { %958 = vmatpush1.msra.mxu1 %v4278_v59  ;;  %1046 = vmatprep.subr.mxu0 %v3584_v28  ;;  %v5929_v28 = vld [vmem:[#allocation10_spill] sm:$0xff] }
 0x3a0   :  { %959 = vmatprep.subr.mxu1 %v4284_v1  ;;  %1047 = vmatpush1.msra.mxu0 %v3593_v30  ;;  %v355_v30 = vadd.f32 %v5929_v28, %v5928_v26  ;;  %v5948_v26 = vld [vmem:[#allocation39_spill] sm:$0xff]  ;;  %v5949_v28 = vld [vmem:[#allocation40_spill] sm:$0xff] }
 0x3a1   :  { %960 = vmatpush1.msra.mxu1 %v4290_v12  ;;  %1048 = vmatprep.subr.mxu0 %v3602_v32 }
 0x3a2   :  { %961 = vmatprep.subr.mxu1 %v4296_v3  ;;  %1049 = vmatpush1.msra.mxu0 %v3611_v34 }
 0x3a3   :  { %962 = vmatpush1.msra.mxu1 %v4302_v35  ;;  %1050 = vmatprep.subr.mxu0 %v3620_v36 }
 0x3a4   :  { %963 = vmatprep.subr.mxu1 %v4308_v49  ;;  %1051 = vmatpush1.msra.mxu0 %v3629_v38 }
 0x3a5   :  { %964 = vmatpush1.msra.mxu1 %v4314_v24  ;;  %1052 = vmatprep.subr.mxu0 %v3638_v40  ;;  %v5930_v40 = vld [vmem:[#allocation12_spill] sm:$0xff] }
 0x3a6   :  { %965 = vmatprep.subr.mxu1 %v4320_v16  ;;  %1053 = vmatpush1.msra.mxu0 %v3647_v42  ;;  %v5931_v42 = vld [vmem:[#allocation11_spill] sm:$0xff] }
 0x3a7   :  { %966 = vmatpush1.msra.mxu1 %v4326_v8  ;;  %1054 = vmatprep.subr.mxu0 %v3656_v44  ;;  %v356_v44 = vadd.f32 %v5931_v42, %v5930_v40  ;;  %v5955_v42 = vld [vmem:[#allocation46_spill] sm:$0xff] }
 0x3a8   :  { %1111 = vmatprep.subr.mxu1 %v4011_v27  ;;  %1055 = vmatpush1.msra.mxu0 %v3665_v46 }
 0x3a9   :  { %1056 = vmatprep.subr.mxu0 %v3674_v48  ;;  %1104 = vmatprep.mubr.f32.mxu0 %v4398_v13 }
 0x3aa   :  { %1057 = vmatpush1.msra.mxu0 %v3683_v50 }
 0x3ab   :  { %1058 = vmatprep.subr.mxu0 %v3692_v52 }
 0x3ac   :  { %1059 = vmatpush1.msra.mxu0 %v3701_v54 }
 0x3ad   :  { %1060 = vmatprep.subr.mxu0 %v3710_v56 }
 0x3ae   :  { %1061 = vmatpush1.msra.mxu0 %v3726_v60 }
 0x3af   :  { %1062 = vmatprep.subr.mxu0 %v3735_v62 }
 0x3b0   :  { %1063 = vmatpush1.msra.mxu0 %v3743_v0 }
 0x3b1   :  { %1064 = vmatprep.subr.mxu0 %v3752_v2  ;;  %v5932_v2 = vld [vmem:[#allocation61_spill] sm:$0xff] }
 0x3b2   :  { %1065 = vmatpush1.msra.mxu0 %v3761_v5 }
 0x3b3   :  { %1066 = vmatprep.subr.mxu0 %v3770_v7 }
 0x3b4   :  { %1067 = vmatpush1.msra.mxu0 %v3779_v9 }
 0x3b5   :  { %1068 = vmatprep.subr.mxu0 %v3788_v11 }
 0x3b6   :  { %1069 = vmatpush1.msra.mxu0 %v5924_v20  ;;  %v5945_v20 = vld [vmem:[#allocation36_spill] sm:$0xff] }
 0x3b7   :  { %1070 = vmatprep.subr.mxu0 %v5925_v21  ;;  %v5946_v21 = vld [vmem:[#allocation37_spill] sm:$0xff] }
 0x3b8   :  { %1071 = vmatpush1.msra.mxu0 %v5926_v23  ;;  %v5947_v23 = vld [vmem:[#allocation38_spill] sm:$0xff] }
 0x3b9   :  { %1230 = vmatprep.subr.mxu0 %v5927_v25 }
 0x458   :  { %v827_v32 = vpop.f32.mrf.mxu1 }
 0x459   :  { %v906_v34 = vadd.f32 %v827_v32, %v355_v30  ;;  %v5950_v30 = vld [vmem:[#allocation41_spill] sm:$0xff]  ;;  %v5951_v32 = vld [vmem:[#allocation42_spill] sm:$0xff] }
 0x45a   :  { %v829_v38 = vpop.f32.mrf.mxu1 }
 0x45b   :  { %v2982_v36 = vmul.f32 -1.442695, %v906_v34  ;;  %v907_v46 = vadd.f32 %v829_v38, %v356_v44  ;;  %v5952_v34 = vld [vmem:[#allocation43_spill] sm:$0xff]  ;;  %v5954_v38 = vld [vmem:[#allocation45_spill] sm:$0xff] }
 0x45c   :  { %v5956_v44 = vld [vmem:[#allocation47_spill] sm:$0xff] }
 0x45d   :  { %3135 = vpow2.f32 %v2982_v36  ;;  %v2983_v60 = vmul.f32 -1.442695, %v907_v46  ;;  %v5953_v36 = vld [vmem:[#allocation44_spill] sm:$0xff] }
 0x45e   :  { %3137 = vtanh.f32 %v907_v46  ;;  %v5957_v46 = vld [vmem:[#allocation48_spill] sm:$0xff] }
 0x46a   :  { %v3136_v48 = vpop.eup %3135 }
 0x46b   :  { %v911_v50 = vadd.f32 1.0, %v3136_v48  ;;  %v3138_v52 = vpop.eup %3137  ;;  %v5958_v48 = vld [vmem:[#allocation49_spill] sm:$0xff] }
 0x46d   :  { %3139 = vrcp.f32 %v911_v50  ;;  %v5959_v50 = vld [vmem:[#allocation50_spill] sm:$0xff] }
 0x46e   :  { %3141 = vpow2.f32 %v2983_v60  ;;  %v5963_v60 = vld [vmem:[#allocation54_spill] sm:$0xff] }
 0x47a   :  { %v3140_v54 = vpop.eup %3139 }
 0x47b   :  { %v922_v56 = vmul.f32 %v3140_v54, %v3138_v52  ;;  %v3142_v62 = vpop.eup %3141  ;;  %v921_v5 = vmul.f32 %v3140_v54, %v5932_v2  ;;  %v5960_v52 = vld [vmem:[#allocation51_spill] sm:$0xff]  ;;  %v5961_v54 = vld [vmem:[#allocation52_spill] sm:$0xff] }
 0x47c   :  { %v918_v0 = vadd.f32 1.0, %v3142_v62  ;;  %v4498_v62 = vld [vmem:[%s5659_s5 + $0x1e8] sm:$0xff] }
 0x47d   :  { %924 = vrot.lane.b32.xlu0 %v922_v56, %s3418_s23  ;;  %v5962_v56 = vld [vmem:[#allocation53_spill] sm:$0xff]  ;;  %5964 = vst [vmem:[#allocation6_spill] sm:$0xff] %v4498_v62 }
 0x47e   :  { %3143 = vrcp.f32 %v918_v0  ;;  %v4501_v0 = vpop.f32.mrf.mxu0 }
 0x47f   :  { %5965 = vst [vmem:[#allocation7_spill] sm:$0xff] %v4501_v0 }
 0x480   :  { %v898_v2 = vpop.f32.mrf.mxu0 }
 0x482   :  { %v900_v4 = vpop.f32.mrf.mxu0 }
 0x48b   :  { %v3144_v11 = vpop.eup %3143 }
 0x4ef   :  { %v925_v7 = vpop.permute.xlu0 %924 }
 0x4f0   :  { %v4455_v9 = vadd.f32 %v925_v7, %v921_v5 }
 0x4f2   :  { %3145 = vtanh.f32 %v4455_v9 }
 0x4ff   :  { %v3146_v15 = vpop.eup %3145 }
 0x500   :  { %v929_v45 = vmul.f32 %v3146_v15, %v3144_v11 }
 0x502   :  { %931 = vrot.lane.b32.xlu1 %v929_v45, %s3418_s23 }
 0x574   :  { %v4459_v18 = vpop.permute.xlu1 %931 }
 0x575   :  { %2984 = vmatmul.mubr.msk.f32.vlgmr.msra.gmra.mxu1 %vm643_vm1, %v4459_v18 }
 0x576   :  { %1112 = vmatpush1.msra.mxu1 %v5933_v47  ;;  %1175 = vmatprep.mubr.f32.mxu1 %v4398_v13 }
 0x577   :  { %1113 = vmatprep.subr.mxu1 %v5934_v53 }
 0x578   :  { %1114 = vmatpush1.msra.mxu1 %v5935_v57 }
 0x579   :  { %1115 = vmatprep.subr.mxu1 %v5936_v31 }
 0x57a   :  { %1116 = vmatpush1.msra.mxu1 %v5937_v58 }
 0x57b   :  { %1117 = vmatprep.subr.mxu1 %v5938_v19 }
 0x57c   :  { %1118 = vmatpush1.msra.mxu1 %v5939_v41 }
 0x57d   :  { %1119 = vmatprep.subr.mxu1 %v5940_v43 }
 0x57e   :  { %1120 = vmatpush1.msra.mxu1 %v5941_v33 }
 0x57f   :  { %1121 = vmatprep.subr.mxu1 %v5942_v37 }
 0x580   :  { %1122 = vmatpush1.msra.mxu1 %v5943_v29 }
 0x581   :  { %1123 = vmatprep.subr.mxu1 %v5944_v17 }
 0x582   :  { %1124 = vmatpush1.msra.mxu1 %v5945_v20 }
 0x583   :  { %1125 = vmatprep.subr.mxu1 %v5946_v21 }
 0x584   :  { %1126 = vmatpush1.msra.mxu1 %v5947_v23 }
 0x585   :  { %1127 = vmatprep.subr.mxu1 %v5948_v26 }
 0x586   :  { %1128 = vmatpush1.msra.mxu1 %v5949_v28 }
 0x587   :  { %1129 = vmatprep.subr.mxu1 %v5950_v30 }
 0x588   :  { %1130 = vmatpush1.msra.mxu1 %v5951_v32 }
 0x589   :  { %1131 = vmatprep.subr.mxu1 %v5952_v34 }
 0x58a   :  { %1132 = vmatpush1.msra.mxu1 %v5953_v36 }
 0x58b   :  { %1133 = vmatprep.subr.mxu1 %v5954_v38 }
 0x58c   :  { %1134 = vmatpush1.msra.mxu1 %v5955_v42 }
 0x58d   :  { %1135 = vmatprep.subr.mxu1 %v5956_v44 }
 0x58e   :  { %1136 = vmatpush1.msra.mxu1 %v5957_v46 }
 0x58f   :  { %1137 = vmatprep.subr.mxu1 %v5958_v48 }
 0x590   :  { %1138 = vmatpush1.msra.mxu1 %v5959_v50 }
 0x591   :  { %1139 = vmatprep.subr.mxu1 %v5960_v52 }
 0x592   :  { %1140 = vmatpush1.msra.mxu1 %v5961_v54 }
 0x593   :  { %1141 = vmatprep.subr.mxu1 %v5962_v56 }
 0x594   :  { %1142 = vmatpush1.msra.mxu1 %v5963_v60 }
 0x595   :  { %1319 = vmatprep.subr.mxu1 %v4498_v62 }
 0x635   :  { %v1001_v5 = vpop.f32.mrf.mxu1 }
 0x636   :  { %v1006_v7 = vadd.f32 %v1001_v5, %v898_v2 }
 0x637   :  { %v1003_v45 = vpop.f32.mrf.mxu1 }
 0x638   :  { %v1008_v11 = vadd.f32 %v1006_v7, %v4380_v51  ;;  %v1007_v40 = vadd.f32 %v1003_v45, %v900_v4  ;;  %v4570_v45 = vld [vmem:[%s5659_s5 + $0x168] sm:$0xff] }
 0x63a   :  { %v2985_v15 = vmul.f32 -1.442695, %v1008_v11  ;;  %v1009_v60 = vadd.f32 %v1007_v40, %v4385_v61 }
 0x63c   :  { %3147 = vpow2.f32 %v2985_v15  ;;  %v2986_v0 = vmul.f32 -1.442695, %v1009_v60 }
 0x63d   :  { %3149 = vtanh.f32 %v1009_v60  ;;  %v4549_v60 = vld [vmem:[%s5659_s5 + $0x1a0] sm:$0xff] }
 0x649   :  { %v3148_v56 = vpop.eup %3147 }
 0x64a   :  { %v1013_v54 = vadd.f32 1.0, %v3148_v56  ;;  %v3150_v52 = vpop.eup %3149  ;;  %v4542_v56 = vld [vmem:[%s5659_s5 + $0x1a8] sm:$0xff] }
 0x64c   :  { %3151 = vrcp.f32 %v1013_v54 }
 0x64d   :  { %3153 = vpow2.f32 %v2986_v0  ;;  %v4563_v0 = vld [vmem:[%s5659_s5 + $0x180] sm:$0xff] }
 0x659   :  { %v3152_v62 = vpop.eup %3151 }
 0x65a   :  { %v1024_v50 = vmul.f32 %v3152_v62, %v3150_v52  ;;  %v3154_v2 = vpop.eup %3153  ;;  %v1023_v7 = vmul.f32 %v3152_v62, %v4389_v63  ;;  %v4521_v63 = vld [vmem:[%s5659_s5 + $0x1e0] sm:$0xff]  ;;  %v4556_v62 = vld [vmem:[%s5659_s5 + $0x188] sm:$0xff] }
 0x65b   :  { %v1020_v5 = vadd.f32 1.0, %v3154_v2  ;;  %v4535_v52 = vld [vmem:[%s5659_s5 + $0x1c0] sm:$0xff] }
 0x65c   :  { %1026 = vrot.lane.b32.xlu0 %v1024_v50, %s3418_s23  ;;  %v4577_v2 = vld [vmem:[%s5659_s5 + $0x160] sm:$0xff] }
 0x65d   :  { %3155 = vrcp.f32 %v1020_v5  ;;  %5967 = vst [vmem:[#allocation9_spill] sm:$0xff] %v4577_v2  ;;  %v4584_v5 = vld [vmem:[%s5659_s5 + $0x148] sm:$0xff] }
 0x65e   :  { %5968 = vst [vmem:[#allocation10_spill] sm:$0xff] %v4584_v5 }
 0x66a   :  { %v3156_v4 = vpop.eup %3155 }
 0x6ce   :  { %v1027_v11 = vpop.permute.xlu0 %1026 }
 0x6cf   :  { %v4507_v15 = vadd.f32 %v1027_v11, %v1023_v7  ;;  %v4591_v7 = vld [vmem:[%s5659_s5 + $0x140] sm:$0xff]  ;;  %v4598_v11 = vld [vmem:[%s5659_s5 + $0x128] sm:$0xff] }
 0x6d0   :  { %5969 = vst [vmem:[#allocation11_spill] sm:$0xff] %v4591_v7  ;;  %5970 = vst [vmem:[#allocation61_spill] sm:$0xff] %v4598_v11 }
 0x6d1   :  { %3157 = vtanh.f32 %v4507_v15 }
 0x6de   :  { %v3158_v40 = vpop.eup %3157 }
 0x6df   :  { %v4510_v54 = vmul.f32 %v3158_v40, %v3156_v4  ;;  %v4605_v4 = vld [vmem:[%s5659_s5 + $0x120] sm:$0xff]  ;;  %v4612_v40 = vld [vmem:[%s5659_s5 + $0x108] sm:$0xff] }
 0x6e0   :  { %5971 = vst [vmem:[#allocation24_spill] sm:$0xff] %v4605_v4  ;;  %5972 = vst [vmem:[#allocation25_spill] sm:$0xff] %v4612_v40 }
 0x6e1   :  { %5966 = vst [vmem:[#allocation8_spill] sm:$0xff] %v4510_v54  ;;  %v1039_v50 = vsel %vm643_vm1, %v4459_v18, %v4510_v54  ;;  %v4528_v18 = vld [vmem:[%s5659_s5 + $0x1c8] sm:$0xff] }
 0x6e2   :  { %1105 = vmatmul.mubr.f32.vlgmr.msra.gmra.mxu0 %v1039_v50  ;;  %1176 = vmatmul.mubr.f32.vlgmr.msra.gmra.mxu1 %v1039_v50  ;;  %v4619_v50 = vld [vmem:[%s5659_s5 + $0x100] sm:$0xff]  ;;  %v4625_v54 = vld [vmem:[%s5659_s5 + $0xe8] sm:$0xff] }
 0x6e3   :  { %1231 = vmatpush1.msra.mxu0 %v4237_v22  ;;  %1278 = vmatprep.mubr.f32.mxu0 %v4398_v13  ;;  %5973 = vst [vmem:[#allocation26_spill] sm:$0xff] %v4619_v50  ;;  %5974 = vst [vmem:[#allocation27_spill] sm:$0xff] %v4625_v54 }
 0x6e4   :  { %1232 = vmatprep.subr.mxu0 %v4244_v14  ;;  %1320 = vmatpush1.msra.mxu1 %v4521_v63 }
 0x6e5   :  { %1233 = vmatpush1.msra.mxu0 %v4252_v10  ;;  %1321 = vmatprep.subr.mxu1 %v4528_v18 }
 0x6e6   :  { %1234 = vmatprep.subr.mxu0 %v4258_v6  ;;  %1322 = vmatpush1.msra.mxu1 %v4535_v52 }
 0x6e7   :  { %1235 = vmatpush1.msra.mxu0 %v4265_v39  ;;  %1323 = vmatprep.subr.mxu1 %v4542_v56 }
 0x6e8   :  { %1236 = vmatprep.subr.mxu0 %v4272_v55  ;;  %1324 = vmatpush1.msra.mxu1 %v4549_v60 }
 0x6e9   :  { %1237 = vmatpush1.msra.mxu0 %v4278_v59  ;;  %1325 = vmatprep.subr.mxu1 %v4556_v62 }
 0x6ea   :  { %1238 = vmatprep.subr.mxu0 %v4284_v1  ;;  %1326 = vmatpush1.msra.mxu1 %v4563_v0 }
 0x6eb   :  { %1239 = vmatpush1.msra.mxu0 %v4290_v12  ;;  %1327 = vmatprep.subr.mxu1 %v4570_v45 }
 0x6ec   :  { %1240 = vmatprep.subr.mxu0 %v4296_v3  ;;  %1328 = vmatpush1.msra.mxu1 %v4577_v2 }
 0x6ed   :  { %1241 = vmatpush1.msra.mxu0 %v4302_v35  ;;  %1329 = vmatprep.subr.mxu1 %v4584_v5 }
 0x6ee   :  { %1242 = vmatprep.subr.mxu0 %v4308_v49  ;;  %1330 = vmatpush1.msra.mxu1 %v4591_v7 }
 0x6ef   :  { %1243 = vmatpush1.msra.mxu0 %v4314_v24  ;;  %1331 = vmatprep.subr.mxu1 %v4598_v11  ;;  %v5991_v11 = vld [vmem:[#allocation14_spill] sm:$0xff] }
 0x6f0   :  { %1244 = vmatprep.subr.mxu0 %v4320_v16  ;;  %1332 = vmatpush1.msra.mxu1 %v4605_v4 }
 0x6f1   :  { %1245 = vmatpush1.msra.mxu0 %v4326_v8  ;;  %1333 = vmatprep.subr.mxu1 %v4612_v40  ;;  %v4650_v40 = vld [vmem:[%s5659_s5 + $0xa8] sm:$0xff] }
 0x6f2   :  { %1390 = vmatprep.subr.mxu0 %v4011_v27  ;;  %1334 = vmatpush1.msra.mxu1 %v4619_v50  ;;  %v4632_v27 = vld [vmem:[%s5659_s5 + $0xe0] sm:$0xff]  ;;  %v4638_v50 = vld [vmem:[%s5659_s5 + $0xc8] sm:$0xff]  ;;  %5978 = vst [vmem:[#allocation31_spill] sm:$0xff] %v4650_v40 }
 0x6f3   :  { %1335 = vmatprep.subr.mxu1 %v4625_v54  ;;  %1383 = vmatprep.mubr.f32.mxu1 %v4398_v13  ;;  %5975 = vst [vmem:[#allocation28_spill] sm:$0xff] %v4632_v27  ;;  %5976 = vst [vmem:[#allocation29_spill] sm:$0xff] %v4638_v50  ;;  %v4644_v54 = vld [vmem:[%s5659_s5 + $0xc0] sm:$0xff]  ;;  %v5990_v8 = vld [vmem:[#allocation13_spill] sm:$0xff] }
 0x6f4   :  { %1336 = vmatpush1.msra.mxu1 %v4632_v27  ;;  %5977 = vst [vmem:[#allocation30_spill] sm:$0xff] %v4644_v54  ;;  %v4656_v27 = vld [vmem:[%s5659_s5 + $0xa0] sm:$0xff] }
 0x6f5   :  { %1337 = vmatprep.subr.mxu1 %v4638_v50  ;;  %5979 = vst [vmem:[#allocation32_spill] sm:$0xff] %v4656_v27  ;;  %v4662_v50 = vld [vmem:[%s5659_s5 + $0x88] sm:$0xff] }
 0x6f6   :  { %1338 = vmatpush1.msra.mxu1 %v4644_v54  ;;  %5980 = vst [vmem:[#allocation33_spill] sm:$0xff] %v4662_v50  ;;  %v4668_v54 = vld [vmem:[%s5659_s5 + $0x80] sm:$0xff] }
 0x6f7   :  { %1339 = vmatprep.subr.mxu1 %v4650_v40  ;;  %5981 = vst [vmem:[#allocation34_spill] sm:$0xff] %v4668_v54  ;;  %v4674_v40 = vld [vmem:[%s5659_s5 + $0x68] sm:$0xff] }
 0x6f8   :  { %1340 = vmatpush1.msra.mxu1 %v4656_v27  ;;  %5982 = vst [vmem:[#allocation35_spill] sm:$0xff] %v4674_v40  ;;  %v4680_v27 = vld [vmem:[%s5659_s5 + $0x60] sm:$0xff] }
 0x6f9   :  { %1341 = vmatprep.subr.mxu1 %v4662_v50  ;;  %5983 = vst [vmem:[#allocation36_spill] sm:$0xff] %v4680_v27  ;;  %v4686_v50 = vld [vmem:[%s5659_s5 + $0x48] sm:$0xff] }
 0x6fa   :  { %1342 = vmatpush1.msra.mxu1 %v4668_v54  ;;  %5984 = vst [vmem:[#allocation37_spill] sm:$0xff] %v4686_v50  ;;  %v4692_v54 = vld [vmem:[%s5659_s5 + $0x40] sm:$0xff] }
 0x6fb   :  { %1343 = vmatprep.subr.mxu1 %v4674_v40  ;;  %5985 = vst [vmem:[#allocation38_spill] sm:$0xff] %v4692_v54  ;;  %v4698_v40 = vld [vmem:[%s5659_s5 + $0x28] sm:$0xff] }
 0x6fc   :  { %1344 = vmatpush1.msra.mxu1 %v4680_v27  ;;  %5986 = vst [vmem:[#allocation39_spill] sm:$0xff] %v4698_v40  ;;  %v4704_v27 = vld [vmem:[%s5659_s5 + $0x20] sm:$0xff] }
 0x6fd   :  { %1345 = vmatprep.subr.mxu1 %v4686_v50  ;;  %5987 = vst [vmem:[#allocation40_spill] sm:$0xff] %v4704_v27  ;;  %v4710_v50 = vld [vmem:[%s5659_s5 + $0x8] sm:$0xff] }
 0x6fe   :  { %1346 = vmatpush1.msra.mxu1 %v4692_v54  ;;  %5988 = vst [vmem:[#allocation41_spill] sm:$0xff] %v4710_v50  ;;  %v4716_v54 = vld [vmem:[%s5659_s5] sm:$0xff] }
 0x6ff   :  { %1347 = vmatprep.subr.mxu1 %v4698_v40  ;;  %5989 = vst [vmem:[#allocation42_spill] sm:$0xff] %v4716_v54 }
 0x700   :  { %1348 = vmatpush1.msra.mxu1 %v4704_v27 }
 0x701   :  { %1349 = vmatprep.subr.mxu1 %v4710_v50 }
 0x702   :  { %1350 = vmatpush1.msra.mxu1 %v4716_v54 }
 0x703   :  { %1509 = vmatprep.subr.mxu1 %v5927_v25 }
 0x7a2   :  { %v1106_v40 = vpop.f32.mrf.mxu0 }
 0x7a3   :  { %v1185_v4 = vadd.f32 %v1106_v40, %v5990_v8 }
 0x7a4   :  { %v1108_v16 = vpop.f32.mrf.mxu0 }
 0x7a5   :  { %v2987_v27 = vmul.f32 -1.442695, %v1185_v4  ;;  %v1186_v24 = vadd.f32 %v1108_v16, %v5991_v11 }
 0x7a7   :  { %3159 = vpow2.f32 %v2987_v27  ;;  %v2988_v54 = vmul.f32 -1.442695, %v1186_v24  ;;  %v6013_v27 = vld [vmem:[#allocation29_spill] sm:$0xff] }
 0x7a8   :  { %3161 = vtanh.f32 %v1186_v24  ;;  %v5993_v24 = vld [vmem:[#allocation51_spill] sm:$0xff] }
 0x7b4   :  { %v3160_v7 = vpop.eup %3159 }
 0x7b5   :  { %v1190_v49 = vadd.f32 1.0, %v3160_v7  ;;  %v3162_v50 = vpop.eup %3161 }
 0x7b7   :  { %3163 = vrcp.f32 %v1190_v49 }
 0x7b8   :  { %3165 = vpow2.f32 %v2988_v54  ;;  %v4810_v54 = vld [vmem:[%s5659_s5 + $0x1f8] sm:$0xff] }
 0x7c4   :  { %v3164_v5 = vpop.eup %3163 }
 0x7c5   :  { %v1201_v35 = vmul.f32 %v3164_v5, %v3162_v50  ;;  %v3166_v25 = vpop.eup %3165  ;;  %v1200_v8 = vmul.f32 %v3164_v5, %v4455_v9  ;;  %v5995_v9 = vld [vmem:[#allocation53_spill] sm:$0xff]  ;;  %v6011_v5 = vld [vmem:[#allocation27_spill] sm:$0xff]  ;;  %v6012_v50 = vld [vmem:[#allocation28_spill] sm:$0xff] }
 0x7c6   :  { %v1197_v2 = vadd.f32 1.0, %v3166_v25  ;;  %v5994_v25 = vld [vmem:[#allocation52_spill] sm:$0xff] }
 0x7c7   :  { %1203 = vrot.lane.b32.xlu1 %v1201_v35, %s3418_s23  ;;  %v5992_v35 = vld [vmem:[#allocation50_spill] sm:$0xff] }
 0x7c8   :  { %3167 = vrcp.f32 %v1197_v2  ;;  %v6010_v2 = vld [vmem:[#allocation26_spill] sm:$0xff] }
 0x7d5   :  { %v3168_v16 = vpop.eup %3167 }
 0x839   :  { %v1204_v4 = vpop.permute.xlu1 %1203 }
 0x83a   :  { %v4724_v40 = vadd.f32 %v1204_v4, %v1200_v8  ;;  %v6014_v8 = vld [vmem:[#allocation30_spill] sm:$0xff]  ;;  %v6015_v4 = vld [vmem:[#allocation31_spill] sm:$0xff] }
 0x83c   :  { %3169 = vtanh.f32 %v4724_v40 }
 0x849   :  { %v3170_v7 = vpop.eup %3169 }
 0x84a   :  { %v1208_v49 = vmul.f32 %v3170_v7, %v3168_v16  ;;  %v6016_v16 = vld [vmem:[#allocation32_spill] sm:$0xff]  ;;  %v6017_v7 = vld [vmem:[#allocation33_spill] sm:$0xff] }
 0x84c   :  { %1210 = vrot.lane.b32.xlu0 %v1208_v49, %s3418_s23  ;;  %v6018_v49 = vld [vmem:[#allocation34_spill] sm:$0xff] }
 0x8be   :  { %v4728_v11 = vpop.permute.xlu0 %1210 }
 0x8bf   :  { %2989 = vmatmul.mubr.msk.f32.vlgmr.msra.gmra.mxu0 %vm643_vm1, %v4728_v11 }
 0x8c0   :  { %1391 = vmatpush1.msra.mxu0 %v5933_v47  ;;  %1454 = vmatprep.mubr.f32.mxu0 %v4398_v13  ;;  %v5996_v47 = vld [vmem:[#allocation54_spill] sm:$0xff] }
 0x8c1   :  { %1392 = vmatprep.subr.mxu0 %v5934_v53  ;;  %v5997_v53 = vld [vmem:[#allocation6_spill] sm:$0xff] }
 0x8c2   :  { %1393 = vmatpush1.msra.mxu0 %v5935_v57  ;;  %v1177_v57 = vpop.f32.mrf.mxu1 }
 0x8c3   :  { %1394 = vmatprep.subr.mxu0 %v5936_v31 }
 0x8c4   :  { %1395 = vmatpush1.msra.mxu0 %v5937_v58 }
 0x8c5   :  { %1396 = vmatprep.subr.mxu0 %v5938_v19 }
 0x8c6   :  { %1397 = vmatpush1.msra.mxu0 %v5939_v41 }
 0x8c7   :  { %1398 = vmatprep.subr.mxu0 %v5940_v43 }
 0x8c8   :  { %1399 = vmatpush1.msra.mxu0 %v5941_v33  ;;  %v1179_v33 = vpop.f32.mrf.mxu1 }
 0x8c9   :  { %1400 = vmatprep.subr.mxu0 %v5942_v37 }
 0x8ca   :  { %1401 = vmatpush1.msra.mxu0 %v5943_v29 }
 0x8cb   :  { %1402 = vmatprep.subr.mxu0 %v5944_v17 }
 0x8cc   :  { %1403 = vmatpush1.msra.mxu0 %v5945_v20 }
 0x8cd   :  { %1404 = vmatprep.subr.mxu0 %v5946_v21 }
 0x8ce   :  { %1405 = vmatpush1.msra.mxu0 %v5947_v23 }
 0x8cf   :  { %1406 = vmatprep.subr.mxu0 %v5948_v26 }
 0x8d0   :  { %1407 = vmatpush1.msra.mxu0 %v5949_v28 }
 0x8d1   :  { %1408 = vmatprep.subr.mxu0 %v5950_v30 }
 0x8d2   :  { %1409 = vmatpush1.msra.mxu0 %v5951_v32 }
 0x8d3   :  { %1410 = vmatprep.subr.mxu0 %v5952_v34 }
 0x8d4   :  { %1411 = vmatpush1.msra.mxu0 %v5953_v36 }
 0x8d5   :  { %1412 = vmatprep.subr.mxu0 %v5954_v38 }
 0x8d6   :  { %1413 = vmatpush1.msra.mxu0 %v5955_v42 }
 0x8d7   :  { %1414 = vmatprep.subr.mxu0 %v5956_v44 }
 0x8d8   :  { %1415 = vmatpush1.msra.mxu0 %v5957_v46 }
 0x8d9   :  { %1416 = vmatprep.subr.mxu0 %v5958_v48 }
 0x8da   :  { %1417 = vmatpush1.msra.mxu0 %v5992_v35  ;;  %v6020_v35 = vld [vmem:[#allocation36_spill] sm:$0xff] }
 0x8db   :  { %1418 = vmatprep.subr.mxu0 %v5993_v24  ;;  %v6021_v24 = vld [vmem:[#allocation37_spill] sm:$0xff] }
 0x8dc   :  { %1419 = vmatpush1.msra.mxu0 %v5994_v25  ;;  %v6022_v25 = vld [vmem:[#allocation38_spill] sm:$0xff] }
 0x8dd   :  { %1420 = vmatprep.subr.mxu0 %v5995_v9  ;;  %v6023_v9 = vld [vmem:[#allocation39_spill] sm:$0xff] }
 0x8de   :  { %1421 = vmatpush1.msra.mxu0 %v5996_v47  ;;  %v6024_v47 = vld [vmem:[#allocation40_spill] sm:$0xff] }
 0x8df   :  { %1598 = vmatprep.subr.mxu0 %v5997_v53 }
 0x97f   :  { %v1280_v31 = vpop.f32.mrf.mxu0 }
 0x980   :  { %v1285_v58 = vadd.f32 %v1280_v31, %v1177_v57  ;;  %v6025_v57 = vld [vmem:[#allocation41_spill] sm:$0xff]  ;;  %v6026_v31 = vld [vmem:[#allocation42_spill] sm:$0xff] }
 0x981   :  { %v1282_v43 = vpop.f32.mrf.mxu0 }
 0x982   :  { %v1287_v19 = vadd.f32 %v1285_v58, %v4380_v51  ;;  %v1286_v37 = vadd.f32 %v1282_v43, %v1179_v33  ;;  %v6027_v58 = vld [vmem:[#allocation55_spill] sm:$0xff] }
 0x984   :  { %v2990_v41 = vmul.f32 -1.442695, %v1287_v19  ;;  %v1288_v29 = vadd.f32 %v1286_v37, %v4385_v61 }
 0x986   :  { %3171 = vpow2.f32 %v2990_v41  ;;  %v2991_v28 = vmul.f32 -1.442695, %v1288_v29  ;;  %v6028_v41 = vld [vmem:[#allocation15_spill] sm:$0xff] }
 0x987   :  { %3173 = vtanh.f32 %v1288_v29  ;;  %v6029_v29 = vld [vmem:[#allocation16_spill] sm:$0xff] }
 0x993   :  { %v3172_v17 = vpop.eup %3171 }
 0x994   :  { %v1292_v20 = vadd.f32 1.0, %v3172_v17  ;;  %v3174_v21 = vpop.eup %3173 }
 0x996   :  { %3175 = vrcp.f32 %v1292_v20 }
 0x997   :  { %3177 = vpow2.f32 %v2991_v28 }
 0x9a3   :  { %v3176_v23 = vpop.eup %3175 }
 0x9a4   :  { %v1303_v26 = vmul.f32 %v3176_v23, %v3174_v21  ;;  %v3178_v30 = vpop.eup %3177  ;;  %v1302_v34 = vmul.f32 %v3176_v23, %v4507_v15  ;;  %v6008_v15 = vld [vmem:[#allocation60_spill] sm:$0xff] }
 0x9a5   :  { %v1299_v32 = vadd.f32 1.0, %v3178_v30 }
 0x9a6   :  { %1305 = vrot.lane.b32.xlu1 %v1303_v26, %s3418_s23 }
 0x9a7   :  { %3179 = vrcp.f32 %v1299_v32 }
 0x9b4   :  { %v3180_v42 = vpop.eup %3179 }
 0xa18   :  { %v1306_v36 = vpop.permute.xlu1 %1305 }
 0xa19   :  { %v4769_v38 = vadd.f32 %v1306_v36, %v1302_v34 }
 0xa1b   :  { %3181 = vtanh.f32 %v4769_v38 }
 0xa28   :  { %v3182_v44 = vpop.eup %3181 }
 0xa29   :  { %v4772_v46 = vmul.f32 %v3182_v44, %v3180_v42 }
 0xa2b   :  { %5998 = vst [vmem:[#allocation43_spill] sm:$0xff] %v4772_v46  ;;  %v1318_v48 = vsel %vm643_vm1, %v4728_v11, %v4772_v46  ;;  %v6019_v11 = vld [vmem:[#allocation35_spill] sm:$0xff]  ;;  %v4992_v46 = vld [vmem:[%s5659_s5 + $0x70] sm:$0xff] }
 0xa2c   :  { %1384 = vmatmul.mubr.f32.vlgmr.msra.gmra.mxu1 %v1318_v48  ;;  %1455 = vmatmul.mubr.f32.vlgmr.msra.gmra.mxu0 %v1318_v48 }
 0xa2d   :  { %1510 = vmatpush1.msra.mxu1 %v4237_v22  ;;  %1557 = vmatprep.mubr.f32.mxu1 %v4398_v13  ;;  %v6002_v22 = vld [vmem:[#allocation57_spill] sm:$0xff] }
 0xa2e   :  { %1511 = vmatprep.subr.mxu1 %v4244_v14  ;;  %1599 = vmatpush1.msra.mxu0 %v4521_v63  ;;  %v6001_v14 = vld [vmem:[#allocation10_spill] sm:$0xff] }
 0xa2f   :  { %1512 = vmatpush1.msra.mxu1 %v4252_v10  ;;  %1600 = vmatprep.subr.mxu0 %v4528_v18  ;;  %v6000_v10 = vld [vmem:[#allocation56_spill] sm:$0xff]  ;;  %6045 = vst [vmem:[#allocation10_spill] sm:$0xff] %v4992_v46 }
 0xa30   :  { %1513 = vmatprep.subr.mxu1 %v4258_v6  ;;  %1601 = vmatpush1.msra.mxu0 %v4535_v52  ;;  %v5999_v6 = vld [vmem:[#allocation9_spill] sm:$0xff] }
 0xa31   :  { %1514 = vmatpush1.msra.mxu1 %v4265_v39  ;;  %1602 = vmatprep.subr.mxu0 %v4542_v56  ;;  %v6003_v39 = vld [vmem:[#allocation11_spill] sm:$0xff] }
 0xa32   :  { %1515 = vmatprep.subr.mxu1 %v4272_v55  ;;  %1603 = vmatpush1.msra.mxu0 %v4549_v60  ;;  %v6004_v55 = vld [vmem:[#allocation58_spill] sm:$0xff] }
 0xa33   :  { %1516 = vmatpush1.msra.mxu1 %v4278_v59  ;;  %1604 = vmatprep.subr.mxu0 %v4556_v62  ;;  %v6005_v59 = vld [vmem:[#allocation61_spill] sm:$0xff] }
 0xa34   :  { %1517 = vmatprep.subr.mxu1 %v4284_v1  ;;  %1605 = vmatpush1.msra.mxu0 %v4563_v0  ;;  %v6006_v1 = vld [vmem:[#allocation59_spill] sm:$0xff] }
 0xa35   :  { %1518 = vmatpush1.msra.mxu1 %v4290_v12  ;;  %1606 = vmatprep.subr.mxu0 %v4570_v45  ;;  %v6007_v12 = vld [vmem:[#allocation24_spill] sm:$0xff] }
 0xa36   :  { %1519 = vmatprep.subr.mxu1 %v4296_v3  ;;  %1607 = vmatpush1.msra.mxu0 %v5999_v6  ;;  %v6009_v3 = vld [vmem:[#allocation25_spill] sm:$0xff] }
 0xa37   :  { %1520 = vmatpush1.msra.mxu1 %v6000_v10  ;;  %1608 = vmatprep.subr.mxu0 %v6001_v14 }
 0xa38   :  { %1521 = vmatprep.subr.mxu1 %v6002_v22  ;;  %1609 = vmatpush1.msra.mxu0 %v6003_v39 }
 0xa39   :  { %1522 = vmatpush1.msra.mxu1 %v6004_v55  ;;  %1610 = vmatprep.subr.mxu0 %v6005_v59 }
 0xa3a   :  { %1523 = vmatprep.subr.mxu1 %v6006_v1  ;;  %1611 = vmatpush1.msra.mxu0 %v6007_v12  ;;  %v4854_v1 = vld [vmem:[%s5659_s5 + $0x1d8] sm:$0xff] }
 0xa3b   :  { %1524 = vmatpush1.msra.mxu1 %v6008_v15  ;;  %1612 = vmatprep.subr.mxu0 %v6009_v3  ;;  %v4860_v15 = vld [vmem:[%s5659_s5 + $0x1d0] sm:$0xff] }
 0xa3c   :  { %1669 = vmatprep.subr.mxu1 %v4810_v54  ;;  %1613 = vmatpush1.msra.mxu0 %v6010_v2 }
 0xa3d   :  { %1614 = vmatprep.subr.mxu0 %v6011_v5  ;;  %1662 = vmatprep.mubr.f32.mxu0 %v4398_v13 }
 0xa3e   :  { %1615 = vmatpush1.msra.mxu0 %v6012_v50 }
 0xa3f   :  { %1616 = vmatprep.subr.mxu0 %v6013_v27 }
 0xa40   :  { %1617 = vmatpush1.msra.mxu0 %v6014_v8 }
 0xa41   :  { %1618 = vmatprep.subr.mxu0 %v6015_v4 }
 0xa42   :  { %1619 = vmatpush1.msra.mxu0 %v6016_v16 }
 0xa43   :  { %1620 = vmatprep.subr.mxu0 %v6017_v7 }
 0xa44   :  { %1621 = vmatpush1.msra.mxu0 %v6018_v49 }
 0xa45   :  { %1622 = vmatprep.subr.mxu0 %v6019_v11 }
 0xa46   :  { %1623 = vmatpush1.msra.mxu0 %v6020_v35 }
 0xa47   :  { %1624 = vmatprep.subr.mxu0 %v6021_v24 }
 0xa48   :  { %1625 = vmatpush1.msra.mxu0 %v6022_v25 }
 0xa49   :  { %1626 = vmatprep.subr.mxu0 %v6023_v9 }
 0xa4a   :  { %1627 = vmatpush1.msra.mxu0 %v6024_v47 }
 0xa4b   :  { %1628 = vmatprep.subr.mxu0 %v6025_v57 }
 0xa4c   :  { %1629 = vmatpush1.msra.mxu0 %v6026_v31 }
 0xa4d   :  { %1788 = vmatprep.subr.mxu0 %v6027_v58  ;;  %v4866_v58 = vld [vmem:[%s5659_s5 + $0x1b8] sm:$0xff] }
 0xaec   :  { %v1385_v19 = vpop.f32.mrf.mxu1 }
 0xaed   :  { %v1464_v43 = vadd.f32 %v1385_v19, %v6028_v41  ;;  %v4872_v19 = vld [vmem:[%s5659_s5 + $0x1b0] sm:$0xff]  ;;  %v4878_v41 = vld [vmem:[%s5659_s5 + $0x198] sm:$0xff] }
 0xaee   :  { %v1387_v37 = vpop.f32.mrf.mxu1 }
 0xaef   :  { %v2992_v33 = vmul.f32 -1.442695, %v1464_v43  ;;  %v1465_v17 = vadd.f32 %v1387_v37, %v6029_v29  ;;  %v4884_v43 = vld [vmem:[%s5659_s5 + $0x190] sm:$0xff]  ;;  %v4902_v29 = vld [vmem:[%s5659_s5 + $0x158] sm:$0xff] }
 0xaf0   :  { %v4896_v37 = vld [vmem:[%s5659_s5 + $0x170] sm:$0xff]  ;;  %6030 = vst [vmem:[#allocation44_spill] sm:$0xff] %v4902_v29 }
 0xaf1   :  { %3183 = vpow2.f32 %v2992_v33  ;;  %v2993_v30 = vmul.f32 -1.442695, %v1465_v17  ;;  %v4890_v33 = vld [vmem:[%s5659_s5 + $0x178] sm:$0xff] }
 0xaf2   :  { %3185 = vtanh.f32 %v1465_v17  ;;  %v4908_v17 = vld [vmem:[%s5659_s5 + $0x150] sm:$0xff] }
 0xaf3   :  { %6031 = vst [vmem:[#allocation45_spill] sm:$0xff] %v4908_v17 }
 0xafe   :  { %v3184_v20 = vpop.eup %3183 }
 0xaff   :  { %v1469_v21 = vadd.f32 1.0, %v3184_v20  ;;  %v3186_v23 = vpop.eup %3185  ;;  %v4914_v20 = vld [vmem:[%s5659_s5 + $0x138] sm:$0xff] }
 0xb00   :  { %6032 = vst [vmem:[#allocation46_spill] sm:$0xff] %v4914_v20 }
 0xb01   :  { %3187 = vrcp.f32 %v1469_v21  ;;  %v4920_v21 = vld [vmem:[%s5659_s5 + $0x130] sm:$0xff] }
 0xb02   :  { %3189 = vpow2.f32 %v2993_v30  ;;  %6033 = vst [vmem:[#allocation47_spill] sm:$0xff] %v4920_v21  ;;  %v4944_v30 = vld [vmem:[%s5659_s5 + $0xf0] sm:$0xff] }
 0xb03   :  { %6037 = vst [vmem:[#allocation14_spill] sm:$0xff] %v4944_v30 }
 0xb0e   :  { %v3188_v26 = vpop.eup %3187 }
 0xb0f   :  { %v1480_v28 = vmul.f32 %v3188_v26, %v3186_v23  ;;  %v3190_v32 = vpop.eup %3189  ;;  %v1479_v36 = vmul.f32 %v3188_v26, %v4724_v40  ;;  %v4847_v40 = vld [vmem:[%s5659_s5 + $0x1f0] sm:$0xff]  ;;  %v4926_v23 = vld [vmem:[%s5659_s5 + $0x118] sm:$0xff] }
 0xb10   :  { %v1476_v34 = vadd.f32 1.0, %v3190_v32  ;;  %6034 = vst [vmem:[#allocation48_spill] sm:$0xff] %v4926_v23  ;;  %v4932_v26 = vld [vmem:[%s5659_s5 + $0x110] sm:$0xff]  ;;  %v4950_v32 = vld [vmem:[%s5659_s5 + $0xd8] sm:$0xff] }
 0xb11   :  { %1482 = vrot.lane.b32.xlu0 %v1480_v28, %s3418_s23  ;;  %6035 = vst [vmem:[#allocation49_spill] sm:$0xff] %v4932_v26  ;;  %v4938_v28 = vld [vmem:[%s5659_s5 + $0xf8] sm:$0xff]  ;;  %6038 = vst [vmem:[#allocation50_spill] sm:$0xff] %v4950_v32 }
 0xb12   :  { %3191 = vrcp.f32 %v1476_v34  ;;  %6036 = vst [vmem:[#allocation13_spill] sm:$0xff] %v4938_v28  ;;  %v4956_v34 = vld [vmem:[%s5659_s5 + $0xd0] sm:$0xff] }
 0xb13   :  { %6039 = vst [vmem:[#allocation51_spill] sm:$0xff] %v4956_v34 }
 0xb1f   :  { %v3192_v48 = vpop.eup %3191 }
 0xb83   :  { %v1483_v42 = vpop.permute.xlu0 %1482 }
 0xb84   :  { %v4836_v44 = vadd.f32 %v1483_v42, %v1479_v36  ;;  %v4962_v36 = vld [vmem:[%s5659_s5 + $0xb8] sm:$0xff]  ;;  %v4968_v42 = vld [vmem:[%s5659_s5 + $0xb0] sm:$0xff] }
 0xb85   :  { %6040 = vst [vmem:[#allocation52_spill] sm:$0xff] %v4962_v36  ;;  %6041 = vst [vmem:[#allocation53_spill] sm:$0xff] %v4968_v42 }
 0xb86   :  { %3193 = vtanh.f32 %v4836_v44 }
 0xb93   :  { %v3194_v10 = vpop.eup %3193 }
 0xb94   :  { %v1487_v22 = vmul.f32 %v3194_v10, %v3192_v48  ;;  %v4974_v48 = vld [vmem:[%s5659_s5 + $0x98] sm:$0xff]  ;;  %v4980_v10 = vld [vmem:[%s5659_s5 + $0x90] sm:$0xff] }
 0xb95   :  { %6042 = vst [vmem:[#allocation54_spill] sm:$0xff] %v4974_v48  ;;  %6043 = vst [vmem:[#allocation9_spill] sm:$0xff] %v4980_v10 }
 0xb96   :  { %1489 = vrot.lane.b32.xlu1 %v1487_v22, %s3418_s23  ;;  %v4986_v22 = vld [vmem:[%s5659_s5 + $0x78] sm:$0xff] }
 0xb97   :  { %6044 = vst [vmem:[#allocation56_spill] sm:$0xff] %v4986_v22 }
 0xc08   :  { %v4840_v55 = vpop.permute.xlu1 %1489 }
 0xc09   :  { %2994 = vmatmul.mubr.msk.f32.vlgmr.msra.gmra.mxu1 %vm643_vm1, %v4840_v55 }
 0xc0a   :  { %1670 = vmatpush1.msra.mxu1 %v4847_v40  ;;  %1733 = vmatprep.mubr.f32.mxu1 %v4398_v13 }
 0xc0b   :  { %1671 = vmatprep.subr.mxu1 %v4854_v1 }
 0xc0c   :  { %1672 = vmatpush1.msra.mxu1 %v4860_v15 }
 0xc0d   :  { %1673 = vmatprep.subr.mxu1 %v4866_v58 }
 0xc0e   :  { %1674 = vmatpush1.msra.mxu1 %v4872_v19 }
 0xc0f   :  { %1675 = vmatprep.subr.mxu1 %v4878_v41 }
 0xc10   :  { %1676 = vmatpush1.msra.mxu1 %v4884_v43 }
 0xc11   :  { %1677 = vmatprep.subr.mxu1 %v4890_v33 }
 0xc12   :  { %1678 = vmatpush1.msra.mxu1 %v4896_v37 }
 0xc13   :  { %1679 = vmatprep.subr.mxu1 %v4902_v29 }
 0xc14   :  { %1680 = vmatpush1.msra.mxu1 %v4908_v17 }
 0xc15   :  { %1681 = vmatprep.subr.mxu1 %v4914_v20 }
 0xc16   :  { %1682 = vmatpush1.msra.mxu1 %v4920_v21 }
 0xc17   :  { %1683 = vmatprep.subr.mxu1 %v4926_v23 }
 0xc18   :  { %1684 = vmatpush1.msra.mxu1 %v4932_v26 }
 0xc19   :  { %1685 = vmatprep.subr.mxu1 %v4938_v28 }
 0xc1a   :  { %1686 = vmatpush1.msra.mxu1 %v4944_v30 }
 0xc1b   :  { %1687 = vmatprep.subr.mxu1 %v4950_v32 }
 0xc1c   :  { %1688 = vmatpush1.msra.mxu1 %v4956_v34 }
 0xc1d   :  { %1689 = vmatprep.subr.mxu1 %v4962_v36 }
 0xc1e   :  { %1690 = vmatpush1.msra.mxu1 %v4968_v42 }
 0xc1f   :  { %1691 = vmatprep.subr.mxu1 %v4974_v48  ;;  %v4998_v48 = vld [vmem:[%s5659_s5 + $0x58] sm:$0xff] }
 0xc20   :  { %1692 = vmatpush1.msra.mxu1 %v4980_v10  ;;  %6046 = vst [vmem:[#allocation57_spill] sm:$0xff] %v4998_v48  ;;  %v5004_v10 = vld [vmem:[%s5659_s5 + $0x50] sm:$0xff] }
 0xc21   :  { %1693 = vmatprep.subr.mxu1 %v4986_v22  ;;  %6047 = vst [vmem:[#allocation11_spill] sm:$0xff] %v5004_v10  ;;  %v5010_v22 = vld [vmem:[%s5659_s5 + $0x38] sm:$0xff] }
 0xc22   :  { %1694 = vmatpush1.msra.mxu1 %v4992_v46  ;;  %6048 = vst [vmem:[#allocation58_spill] sm:$0xff] %v5010_v22  ;;  %v5016_v46 = vld [vmem:[%s5659_s5 + $0x30] sm:$0xff] }
 0xc23   :  { %1695 = vmatprep.subr.mxu1 %v4998_v48  ;;  %6049 = vst [vmem:[#allocation61_spill] sm:$0xff] %v5016_v46  ;;  %v5022_v48 = vld [vmem:[%s5659_s5 + $0x18] sm:$0xff] }
 0xc24   :  { %1696 = vmatpush1.msra.mxu1 %v5004_v10  ;;  %6050 = vst [vmem:[#allocation59_spill] sm:$0xff] %v5022_v48  ;;  %v5028_v10 = vld [vmem:[%s5659_s5 + $0x10] sm:$0xff] }
 0xc25   :  { %1697 = vmatprep.subr.mxu1 %v5010_v22  ;;  %6051 = vst [vmem:[#allocation24_spill] sm:$0xff] %v5028_v10  ;;  %v1456_v22 = vpop.f32.mrf.mxu0 }
 0xc26   :  { %1698 = vmatpush1.msra.mxu1 %v5016_v46 }
 0xc27   :  { %1699 = vmatprep.subr.mxu1 %v5022_v48  ;;  %v1458_v30 = vpop.f32.mrf.mxu0 }
 0xc28   :  { %1700 = vmatpush1.msra.mxu1 %v5028_v10 }
 0xc29   :  { %1877 = vmatprep.subr.mxu1 %v5997_v53 }
 0xcc9   :  { %v1559_v42 = vpop.f32.mrf.mxu1 }
 0xcca   :  { %v1564_v36 = vadd.f32 %v1559_v42, %v1456_v22 }
 0xccb   :  { %v1561_v32 = vpop.f32.mrf.mxu1 }
 0xccc   :  { %v1566_v46 = vadd.f32 %v1564_v36, %v4380_v51  ;;  %v1565_v28 = vadd.f32 %v1561_v32, %v1458_v30  ;;  %v5075_v30 = vld [vmem:[%s5664_s6 + $0x50] sm:$0xff]  ;;  %v5082_v32 = vld [vmem:[%s5664_s6 + $0x48] sm:$0xff] }
 0xcce   :  { %v2995_v34 = vmul.f32 -1.442695, %v1566_v46  ;;  %v1567_v48 = vadd.f32 %v1565_v28, %v4385_v61 }
 0xcd0   :  { %3195 = vpow2.f32 %v2995_v34  ;;  %v2996_v53 = vmul.f32 -1.442695, %v1567_v48 }
 0xcd1   :  { %3197 = vtanh.f32 %v1567_v48  ;;  %v5089_v48 = vld [vmem:[%s5664_s6 + $0x40] sm:$0xff] }
 0xcdd   :  { %v3196_v26 = vpop.eup %3195 }
 0xcde   :  { %v1571_v23 = vadd.f32 1.0, %v3196_v26  ;;  %v3198_v21 = vpop.eup %3197 }
 0xce0   :  { %3199 = vrcp.f32 %v1571_v23 }
 0xce1   :  { %3201 = vpow2.f32 %v2996_v53  ;;  %v5047_v53 = vld [vmem:[%s5664_s6 + $0x70] sm:$0xff] }
 0xced   :  { %v3200_v10 = vpop.eup %3199 }
 0xcee   :  { %v1582_v20 = vmul.f32 %v3200_v10, %v3198_v21  ;;  %v3202_v42 = vpop.eup %3201  ;;  %v1581_v46 = vmul.f32 %v3200_v10, %v4769_v38  ;;  %v5054_v38 = vld [vmem:[%s5664_s6 + $0x68] sm:$0xff]  ;;  %v5068_v21 = vld [vmem:[%s5664_s6 + $0x58] sm:$0xff] }
 0xcef   :  { %v1578_v36 = vadd.f32 1.0, %v3202_v42  ;;  %v5096_v10 = vld [vmem:[%s5664_s6 + $0x38] sm:$0xff]  ;;  %v5103_v42 = vld [vmem:[%s5664_s6 + $0x30] sm:$0xff] }
 0xcf0   :  { %1584 = vrot.lane.b32.xlu0 %v1582_v20, %s3418_s23 }
 0xcf1   :  { %3203 = vrcp.f32 %v1578_v36  ;;  %v5110_v36 = vld [vmem:[%s5664_s6 + $0x28] sm:$0xff] }
 0xcfe   :  { %v3204_v26 = vpop.eup %3203 }
 0xd62   :  { %v1585_v34 = vpop.permute.xlu0 %1584 }
 0xd63   :  { %v5036_v22 = vadd.f32 %v1585_v34, %v1581_v46  ;;  %v5117_v46 = vld [vmem:[%s5664_s6 + $0x20] sm:$0xff]  ;;  %v5124_v34 = vld [vmem:[%s5664_s6 + $0x18] sm:$0xff] }
 0xd65   :  { %3205 = vtanh.f32 %v5036_v22 }
 0xd72   :  { %v3206_v28 = vpop.eup %3205 }
 0xd73   :  { %v5039_v23 = vmul.f32 %v3206_v28, %v3204_v26  ;;  %v5131_v26 = vld [vmem:[%s5664_s6 + $0x10] sm:$0xff]  ;;  %v5138_v28 = vld [vmem:[%s5664_s6 + $0x8] sm:$0xff] }
 0xd75   :  { %6052 = vst [vmem:[#allocation60_spill] sm:$0xff] %v5039_v23  ;;  %v1597_v20 = vsel %vm643_vm1, %v4840_v55, %v5039_v23  ;;  %v5061_v55 = vld [vmem:[%s5664_s6 + $0x60] sm:$0xff] }
 0xd76   :  { %1663 = vmatmul.mubr.f32.vlgmr.msra.gmra.mxu0 %v1597_v20  ;;  %1734 = vmatmul.mubr.f32.vlgmr.msra.gmra.mxu1 %v1597_v20  ;;  %v5145_v20 = vld [vmem:[%s5664_s6] sm:$0xff] }
 0xd77   :  { %1789 = vmatpush1.msra.mxu0 %v5047_v53  ;;  %1836 = vmatprep.mubr.f32.mxu0 %v4398_v13 }
 0xd78   :  { %1790 = vmatprep.subr.mxu0 %v5054_v38  ;;  %1878 = vmatpush1.msra.mxu1 %v4521_v63 }
 0xd79   :  { %1791 = vmatpush1.msra.mxu0 %v5061_v55  ;;  %1879 = vmatprep.subr.mxu1 %v4528_v18 }
 0xd7a   :  { %1792 = vmatprep.subr.mxu0 %v5068_v21  ;;  %1880 = vmatpush1.msra.mxu1 %v4535_v52 }
 0xd7b   :  { %1793 = vmatpush1.msra.mxu0 %v5075_v30  ;;  %1881 = vmatprep.subr.mxu1 %v4542_v56 }
 0xd7c   :  { %1794 = vmatprep.subr.mxu0 %v5082_v32  ;;  %1882 = vmatpush1.msra.mxu1 %v4549_v60 }
 0xd7d   :  { %1795 = vmatpush1.msra.mxu0 %v5089_v48  ;;  %1883 = vmatprep.subr.mxu1 %v4556_v62 }
 0xd7e   :  { %1796 = vmatprep.subr.mxu0 %v5096_v10  ;;  %1884 = vmatpush1.msra.mxu1 %v4563_v0 }
 0xd7f   :  { %1797 = vmatpush1.msra.mxu0 %v5103_v42  ;;  %1885 = vmatprep.subr.mxu1 %v4570_v45 }
 0xd80   :  { %1798 = vmatprep.subr.mxu0 %v5110_v36  ;;  %1886 = vmatpush1.msra.mxu1 %v5999_v6 }
 0xd81   :  { %1799 = vmatpush1.msra.mxu0 %v5117_v46  ;;  %1887 = vmatprep.subr.mxu1 %v6001_v14 }
 0xd82   :  { %1800 = vmatprep.subr.mxu0 %v5124_v34  ;;  %1888 = vmatpush1.msra.mxu1 %v6003_v39 }
 0xd83   :  { %1801 = vmatpush1.msra.mxu0 %v5131_v26  ;;  %1889 = vmatprep.subr.mxu1 %v6005_v59 }
 0xd84   :  { %1802 = vmatprep.subr.mxu0 %v5138_v28  ;;  %1890 = vmatpush1.msra.mxu1 %v6007_v12 }
 0xd85   :  { %1803 = vmatpush1.msra.mxu0 %v5145_v20  ;;  %1891 = vmatprep.subr.mxu1 %v6009_v3 }
 0xd86   :  { %1948 = vmatprep.subr.mxu0 %v4810_v54  ;;  %1892 = vmatpush1.msra.mxu1 %v6010_v2 }
 0xd87   :  { %1893 = vmatprep.subr.mxu1 %v6011_v5  ;;  %1941 = vmatprep.mubr.f32.mxu1 %v4398_v13  ;;  %v5171_v13 = vld [vmem:[%s5664_s6 + $0x78] sm:$0xff] }
 0xd88   :  { %1894 = vmatpush1.msra.mxu1 %v6012_v50  ;;  %6053 = vst [vmem:[#allocation25_spill] sm:$0xff] %v5171_v13 }
 0xd89   :  { %1895 = vmatprep.subr.mxu1 %v6013_v27 }
 0xd8a   :  { %1896 = vmatpush1.msra.mxu1 %v6014_v8 }
 0xd8b   :  { %1897 = vmatprep.subr.mxu1 %v6015_v4 }
 0xd8c   :  { %1898 = vmatpush1.msra.mxu1 %v6016_v16 }
 0xd8d   :  { %1899 = vmatprep.subr.mxu1 %v6017_v7 }
 0xd8e   :  { %1900 = vmatpush1.msra.mxu1 %v6018_v49 }
 0xd8f   :  { %1901 = vmatprep.subr.mxu1 %v6019_v11 }
 0xd90   :  { %1902 = vmatpush1.msra.mxu1 %v6020_v35  ;;  %v6054_v35 = vld [vmem:[#allocation17_spill] sm:$0xff] }
 0xd91   :  { %1903 = vmatprep.subr.mxu1 %v6021_v24 }
 0xd92   :  { %1904 = vmatpush1.msra.mxu1 %v6022_v25 }
 0xd93   :  { %1905 = vmatprep.subr.mxu1 %v6023_v9  ;;  %v6055_v9 = vld [vmem:[#allocation18_spill] sm:$0xff] }
 0xd94   :  { %1906 = vmatpush1.msra.mxu1 %v6024_v47 }
 0xd95   :  { %1907 = vmatprep.subr.mxu1 %v6025_v57 }
 0xd96   :  { %1908 = vmatpush1.msra.mxu1 %v6026_v31 }
 0xd97   :  { %2067 = vmatprep.subr.mxu1 %v5171_v13 }
 0xe36   :  { %v1664_v23 = vpop.f32.mrf.mxu0 }
 0xe37   :  { %v1743_v24 = vadd.f32 %v1664_v23, %v6054_v35  ;;  %v6062_v23 = vld [vmem:[#allocation50_spill] sm:$0xff] }
 0xe38   :  { %v1666_v25 = vpop.f32.mrf.mxu0 }
 0xe39   :  { %v2997_v11 = vmul.f32 -1.442695, %v1743_v24  ;;  %v1744_v49 = vadd.f32 %v1666_v25, %v6055_v9 }
 0xe3b   :  { %3207 = vpow2.f32 %v2997_v11  ;;  %v2998_v4 = vmul.f32 -1.442695, %v1744_v49 }
 0xe3c   :  { %3209 = vtanh.f32 %v1744_v49  ;;  %v6058_v49 = vld [vmem:[#allocation48_spill] sm:$0xff] }
 0xe48   :  { %v3208_v47 = vpop.eup %3207 }
 0xe49   :  { %v1748_v7 = vadd.f32 1.0, %v3208_v47  ;;  %v3210_v31 = vpop.eup %3209 }
 0xe4b   :  { %3211 = vrcp.f32 %v1748_v7 }
 0xe4c   :  { %3213 = vpow2.f32 %v2998_v4  ;;  %v5187_v4 = vld [vmem:[#allocation5 + $0x8] sm:$0xff] }
 0xe58   :  { %v3212_v57 = vpop.eup %3211 }
 0xe59   :  { %v1759_v16 = vmul.f32 %v3212_v57, %v3210_v31  ;;  %v3214_v13 = vpop.eup %3213  ;;  %v1758_v35 = vmul.f32 %v3212_v57, %v4836_v44  ;;  %v6059_v57 = vld [vmem:[#allocation49_spill] sm:$0xff]  ;;  %v6061_v44 = vld [vmem:[#allocation14_spill] sm:$0xff] }
 0xe5a   :  { %v1755_v8 = vadd.f32 1.0, %v3214_v13  ;;  %v6060_v31 = vld [vmem:[#allocation13_spill] sm:$0xff]  ;;  %v6063_v13 = vld [vmem:[#allocation51_spill] sm:$0xff] }
 0xe5b   :  { %1761 = vrot.lane.b32.xlu1 %v1759_v16, %s3418_s23  ;;  %v6057_v16 = vld [vmem:[#allocation47_spill] sm:$0xff] }
 0xe5c   :  { %3215 = vrcp.f32 %v1755_v8  ;;  %v6056_v8 = vld [vmem:[#allocation46_spill] sm:$0xff] }
 0xe69   :  { %v3216_v25 = vpop.eup %3215 }
 0xecd   :  { %v1762_v24 = vpop.permute.xlu1 %1761 }
 0xece   :  { %v5178_v11 = vadd.f32 %v1762_v24, %v1758_v35  ;;  %v6064_v35 = vld [vmem:[#allocation52_spill] sm:$0xff]  ;;  %v6065_v24 = vld [vmem:[#allocation53_spill] sm:$0xff] }
 0xed0   :  { %3217 = vtanh.f32 %v5178_v11 }
 0xedd   :  { %v3218_v9 = vpop.eup %3217 }
 0xede   :  { %v1766_v7 = vmul.f32 %v3218_v9, %v3216_v25  ;;  %v6066_v25 = vld [vmem:[#allocation54_spill] sm:$0xff]  ;;  %v6067_v9 = vld [vmem:[#allocation9_spill] sm:$0xff] }
 0xee0   :  { %1768 = vrot.lane.b32.xlu0 %v1766_v7, %s3418_s23  ;;  %v6068_v7 = vld [vmem:[#allocation56_spill] sm:$0xff] }
 0xf52   :  { %v5182_v47 = vpop.permute.xlu0 %1768 }
 0xf53   :  { %2999 = vmatmul.mubr.msk.f32.vlgmr.msra.gmra.mxu0 %vm643_vm1, %v5182_v47 }
 0xf54   :  { %1949 = vmatpush1.msra.mxu0 %v4847_v40  ;;  %2012 = vmatprep.mubr.f32.mxu0 %v5187_v4 }
 0xf55   :  { %1950 = vmatprep.subr.mxu0 %v4854_v1 }
 0xf56   :  { %1951 = vmatpush1.msra.mxu0 %v4860_v15 }
 0xf57   :  { %1952 = vmatprep.subr.mxu0 %v4866_v58 }
 0xf58   :  { %1953 = vmatpush1.msra.mxu0 %v4872_v19 }
 0xf59   :  { %1954 = vmatprep.subr.mxu0 %v4878_v41 }
 0xf5a   :  { %1955 = vmatpush1.msra.mxu0 %v4884_v43 }
 0xf5b   :  { %1956 = vmatprep.subr.mxu0 %v4890_v33 }
 0xf5c   :  { %1957 = vmatpush1.msra.mxu0 %v4896_v37 }
 0xf5d   :  { %1958 = vmatprep.subr.mxu0 %v4902_v29 }
 0xf5e   :  { %1959 = vmatpush1.msra.mxu0 %v4908_v17 }
 0xf5f   :  { %1960 = vmatprep.subr.mxu0 %v6056_v8 }
 0xf60   :  { %1961 = vmatpush1.msra.mxu0 %v6057_v16 }
 0xf61   :  { %1962 = vmatprep.subr.mxu0 %v6058_v49  ;;  %v6069_v49 = vld [vmem:[#allocation10_spill] sm:$0xff] }
 0xf62   :  { %1963 = vmatpush1.msra.mxu0 %v6059_v57  ;;  %v6070_v57 = vld [vmem:[#allocation57_spill] sm:$0xff] }
 0xf63   :  { %1964 = vmatprep.subr.mxu0 %v6060_v31  ;;  %v6071_v31 = vld [vmem:[#allocation11_spill] sm:$0xff] }
 0xf64   :  { %1965 = vmatpush1.msra.mxu0 %v6061_v44  ;;  %v6072_v44 = vld [vmem:[#allocation58_spill] sm:$0xff] }
 0xf65   :  { %1966 = vmatprep.subr.mxu0 %v6062_v23  ;;  %v6073_v23 = vld [vmem:[#allocation61_spill] sm:$0xff] }
 0xf66   :  { %1967 = vmatpush1.msra.mxu0 %v6063_v13  ;;  %v6074_v13 = vld [vmem:[#allocation59_spill] sm:$0xff] }
 0xf67   :  { %1968 = vmatprep.subr.mxu0 %v6064_v35  ;;  %v6075_v35 = vld [vmem:[#allocation24_spill] sm:$0xff] }
 0xf68   :  { %1969 = vmatpush1.msra.mxu0 %v6065_v24  ;;  %v6076_v24 = vld [vmem:[#allocation6_spill] sm:$0xff] }
 0xf69   :  { %1970 = vmatprep.subr.mxu0 %v6066_v25  ;;  %v1735_v25 = vpop.f32.mrf.mxu1 }
 0xf6a   :  { %1971 = vmatpush1.msra.mxu0 %v6067_v9 }
 0xf6b   :  { %1972 = vmatprep.subr.mxu0 %v6068_v7  ;;  %v1737_v8 = vpop.f32.mrf.mxu1 }
 0xf6c   :  { %1973 = vmatpush1.msra.mxu0 %v6069_v49 }
 0xf6d   :  { %1974 = vmatprep.subr.mxu0 %v6070_v57 }
 0xf6e   :  { %1975 = vmatpush1.msra.mxu0 %v6071_v31 }
 0xf6f   :  { %1976 = vmatprep.subr.mxu0 %v6072_v44 }
 0xf70   :  { %1977 = vmatpush1.msra.mxu0 %v6073_v23 }
 0xf71   :  { %1978 = vmatprep.subr.mxu0 %v6074_v13 }
 0xf72   :  { %1979 = vmatpush1.msra.mxu0 %v6075_v35 }
 0xf73   :  { %2156 = vmatprep.subr.mxu0 %v6076_v24 }
0x1013   :  { %v1838_v9 = vpop.f32.mrf.mxu0 }
0x1014   :  { %v1843_v16 = vadd.f32 %v1838_v9, %v1735_v25 }
0x1015   :  { %v1840_v57 = vpop.f32.mrf.mxu0 }
0x1016   :  { %v1845_v7 = vadd.f32 %v1843_v16, %v4380_v51  ;;  %v1844_v31 = vadd.f32 %v1840_v57, %v1737_v8 }
0x1018   :  { %v3000_v49 = vmul.f32 -1.442695, %v1845_v7  ;;  %v1846_v44 = vadd.f32 %v1844_v31, %v4385_v61 }
0x101a   :  { %3219 = vpow2.f32 %v3000_v49  ;;  %v3001_v24 = vmul.f32 -1.442695, %v1846_v44 }
0x101b   :  { %3221 = vtanh.f32 %v1846_v44 }
0x1027   :  { %v3220_v17 = vpop.eup %3219 }
0x1028   :  { %v1850_v23 = vadd.f32 1.0, %v3220_v17  ;;  %v3222_v13 = vpop.eup %3221 }
0x102a   :  { %3223 = vrcp.f32 %v1850_v23 }
0x102b   :  { %3225 = vpow2.f32 %v3001_v24 }
0x1037   :  { %v3224_v35 = vpop.eup %3223 }
0x1038   :  { %v1861_v29 = vmul.f32 %v3224_v35, %v3222_v13  ;;  %v3226_v25 = vpop.eup %3225  ;;  %v1860_v49 = vmul.f32 %v3224_v35, %v5036_v22 }
0x1039   :  { %v1857_v16 = vadd.f32 1.0, %v3226_v25 }
0x103a   :  { %1863 = vrot.lane.b32.xlu1 %v1861_v29, %s3418_s23 }
0x103b   :  { %3227 = vrcp.f32 %v1857_v16 }
0x1048   :  { %v3228_v17 = vpop.eup %3227 }
0x10ac   :  { %v1864_v9 = vpop.permute.xlu1 %1863 }
0x10ad   :  { %v5225_v7 = vadd.f32 %v1864_v9, %v1860_v49 }
0x10af   :  { %3229 = vtanh.f32 %v5225_v7 }
0x10bc   :  { %v3230_v8 = vpop.eup %3229 }
0x10bd   :  { %v5228_v57 = vmul.f32 %v3230_v8, %v3228_v17 }
0x10bf   :  { %6077 = vst [vmem:[#allocation26_spill] sm:$0xff] %v5228_v57  ;;  %v1876_v29 = vsel %vm643_vm1, %v5182_v47, %v5228_v57  ;;  %v6093_v47 = vld [vmem:[#allocation20_spill] sm:$0xff] }
0x10c0   :  { %1942 = vmatmul.mubr.f32.vlgmr.msra.gmra.mxu1 %v1876_v29  ;;  %2013 = vmatmul.mubr.f32.vlgmr.msra.gmra.mxu0 %v1876_v29 }
0x10c1   :  { %2068 = vmatpush1.msra.mxu1 %v5047_v53  ;;  %2115 = vmatprep.mubr.f32.mxu1 %v5187_v4 }
0x10c2   :  { %2069 = vmatprep.subr.mxu1 %v5054_v38  ;;  %2157 = vmatpush1.msra.mxu0 %v4521_v63  ;;  %v6078_v63 = vld [vmem:[#allocation30_spill] sm:$0xff] }
0x10c3   :  { %2070 = vmatpush1.msra.mxu1 %v5061_v55  ;;  %2158 = vmatprep.subr.mxu0 %v4528_v18  ;;  %v6079_v18 = vld [vmem:[#allocation31_spill] sm:$0xff] }
0x10c4   :  { %2071 = vmatprep.subr.mxu1 %v5068_v21  ;;  %2159 = vmatpush1.msra.mxu0 %v4535_v52  ;;  %v6080_v52 = vld [vmem:[#allocation32_spill] sm:$0xff] }
0x10c5   :  { %2072 = vmatpush1.msra.mxu1 %v5075_v30  ;;  %2160 = vmatprep.subr.mxu0 %v4542_v56  ;;  %v6081_v56 = vld [vmem:[#allocation33_spill] sm:$0xff] }
0x10c6   :  { %2073 = vmatprep.subr.mxu1 %v5082_v32  ;;  %2161 = vmatpush1.msra.mxu0 %v4549_v60  ;;  %v6082_v60 = vld [vmem:[#allocation34_spill] sm:$0xff] }
0x10c7   :  { %2074 = vmatpush1.msra.mxu1 %v5089_v48  ;;  %2162 = vmatprep.subr.mxu0 %v4556_v62  ;;  %v6083_v62 = vld [vmem:[#allocation35_spill] sm:$0xff] }
0x10c8   :  { %2075 = vmatprep.subr.mxu1 %v5096_v10  ;;  %2163 = vmatpush1.msra.mxu0 %v4563_v0  ;;  %v6084_v0 = vld [vmem:[#allocation36_spill] sm:$0xff] }
0x10c9   :  { %2076 = vmatpush1.msra.mxu1 %v5103_v42  ;;  %2164 = vmatprep.subr.mxu0 %v4570_v45  ;;  %v6085_v45 = vld [vmem:[#allocation37_spill] sm:$0xff] }
0x10ca   :  { %2077 = vmatprep.subr.mxu1 %v5110_v36  ;;  %2165 = vmatpush1.msra.mxu0 %v5999_v6  ;;  %v6086_v6 = vld [vmem:[#allocation38_spill] sm:$0xff] }
0x10cb   :  { %2078 = vmatpush1.msra.mxu1 %v5117_v46  ;;  %2166 = vmatprep.subr.mxu0 %v6001_v14  ;;  %v6087_v14 = vld [vmem:[#allocation39_spill] sm:$0xff] }
0x10cc   :  { %2079 = vmatprep.subr.mxu1 %v5124_v34  ;;  %2167 = vmatpush1.msra.mxu0 %v6003_v39  ;;  %v6088_v39 = vld [vmem:[#allocation40_spill] sm:$0xff] }
0x10cd   :  { %2080 = vmatpush1.msra.mxu1 %v5131_v26  ;;  %2168 = vmatprep.subr.mxu0 %v6005_v59  ;;  %v6089_v59 = vld [vmem:[#allocation41_spill] sm:$0xff] }
0x10ce   :  { %2081 = vmatprep.subr.mxu1 %v5138_v28  ;;  %2169 = vmatpush1.msra.mxu0 %v6007_v12  ;;  %v6090_v12 = vld [vmem:[#allocation42_spill] sm:$0xff] }
0x10cf   :  { %2082 = vmatpush1.msra.mxu1 %v5145_v20  ;;  %2170 = vmatprep.subr.mxu0 %v6009_v3  ;;  %v6091_v3 = vld [vmem:[#allocation25_spill] sm:$0xff] }
0x10d0   :  { %2227 = vmatprep.subr.mxu1 %v4810_v54  ;;  %2171 = vmatpush1.msra.mxu0 %v6010_v2 }
0x10d1   :  { %2172 = vmatprep.subr.mxu0 %v6011_v5  ;;  %2220 = vmatprep.mubr.f32.mxu0 %v5187_v4  ;;  %v6092_v5 = vld [vmem:[#allocation19_spill] sm:$0xff] }
0x10d2   :  { %2173 = vmatpush1.msra.mxu0 %v6012_v50 }
0x10d3   :  { %2174 = vmatprep.subr.mxu0 %v6013_v27 }
0x10d4   :  { %2175 = vmatpush1.msra.mxu0 %v6078_v63 }
0x10d5   :  { %2176 = vmatprep.subr.mxu0 %v6079_v18 }
0x10d6   :  { %2177 = vmatpush1.msra.mxu0 %v6080_v52 }
0x10d7   :  { %2178 = vmatprep.subr.mxu0 %v6081_v56  ;;  %v6095_v56 = vld [vmem:[#allocation45_spill] sm:$0xff] }
0x10d8   :  { %2179 = vmatpush1.msra.mxu0 %v6082_v60  ;;  %v6096_v60 = vld [vmem:[#allocation46_spill] sm:$0xff] }
0x10d9   :  { %2180 = vmatprep.subr.mxu0 %v6083_v62  ;;  %v6097_v62 = vld [vmem:[#allocation47_spill] sm:$0xff] }
0x10da   :  { %2181 = vmatpush1.msra.mxu0 %v6084_v0  ;;  %v6098_v0 = vld [vmem:[#allocation48_spill] sm:$0xff] }
0x10db   :  { %2182 = vmatprep.subr.mxu0 %v6085_v45  ;;  %v6099_v45 = vld [vmem:[#allocation49_spill] sm:$0xff] }
0x10dc   :  { %2183 = vmatpush1.msra.mxu0 %v6086_v6  ;;  %v6100_v6 = vld [vmem:[#allocation13_spill] sm:$0xff] }
0x10dd   :  { %2184 = vmatprep.subr.mxu0 %v6087_v14  ;;  %v6101_v14 = vld [vmem:[#allocation14_spill] sm:$0xff] }
0x10de   :  { %2185 = vmatpush1.msra.mxu0 %v6088_v39  ;;  %v6102_v39 = vld [vmem:[#allocation50_spill] sm:$0xff] }
0x10df   :  { %2186 = vmatprep.subr.mxu0 %v6089_v59  ;;  %v6103_v59 = vld [vmem:[#allocation51_spill] sm:$0xff] }
0x10e0   :  { %2187 = vmatpush1.msra.mxu0 %v6090_v12  ;;  %v6104_v12 = vld [vmem:[#allocation52_spill] sm:$0xff] }
0x10e1   :  { %2346 = vmatprep.subr.mxu0 %v6091_v3 }
0x1180   :  { %v1943_v2 = vpop.f32.mrf.mxu1 }
0x1181   :  { %v2022_v50 = vadd.f32 %v1943_v2, %v6092_v5  ;;  %v6105_v2 = vld [vmem:[#allocation53_spill] sm:$0xff]  ;;  %v6106_v5 = vld [vmem:[#allocation54_spill] sm:$0xff] }
0x1182   :  { %v1945_v22 = vpop.f32.mrf.mxu1 }
0x1183   :  { %v3002_v27 = vmul.f32 -1.442695, %v2022_v50  ;;  %v2023_v31 = vadd.f32 %v1945_v22, %v6093_v47  ;;  %v6107_v50 = vld [vmem:[#allocation9_spill] sm:$0xff]  ;;  %v6109_v22 = vld [vmem:[#allocation10_spill] sm:$0xff] }
0x1184   :  { %v6110_v47 = vld [vmem:[#allocation57_spill] sm:$0xff] }
0x1185   :  { %3231 = vpow2.f32 %v3002_v27  ;;  %v3003_v25 = vmul.f32 -1.442695, %v2023_v31  ;;  %v6108_v27 = vld [vmem:[#allocation56_spill] sm:$0xff] }
0x1186   :  { %3233 = vtanh.f32 %v2023_v31  ;;  %v6111_v31 = vld [vmem:[#allocation11_spill] sm:$0xff] }
0x1192   :  { %v3232_v44 = vpop.eup %3231 }
0x1193   :  { %v2027_v23 = vadd.f32 1.0, %v3232_v44  ;;  %v3234_v13 = vpop.eup %3233  ;;  %v6112_v44 = vld [vmem:[#allocation58_spill] sm:$0xff] }
0x1195   :  { %3235 = vrcp.f32 %v2027_v23  ;;  %v6113_v23 = vld [vmem:[#allocation61_spill] sm:$0xff] }
0x1196   :  { %3237 = vpow2.f32 %v3003_v25  ;;  %v2014_v25 = vpop.f32.mrf.mxu0 }
0x11a2   :  { %v3236_v35 = vpop.eup %3235 }
0x11a3   :  { %v2038_v24 = vmul.f32 %v3236_v35, %v3234_v13  ;;  %v3238_v16 = vpop.eup %3237  ;;  %v2037_v9 = vmul.f32 %v3236_v35, %v5178_v11  ;;  %v6094_v11 = vld [vmem:[#allocation44_spill] sm:$0xff]  ;;  %v6114_v13 = vld [vmem:[#allocation59_spill] sm:$0xff] }
0x11a4   :  { %v2034_v49 = vadd.f32 1.0, %v3238_v16  ;;  %v6115_v35 = vld [vmem:[#allocation24_spill] sm:$0xff] }
0x11a5   :  { %2040 = vrot.lane.b32.xlu0 %v2038_v24, %s3418_s23  ;;  %v3385_v24 = vld [vmem:[%s5659_s5 + $0x1e8] sm:$0xff] }
0x11a6   :  { %3239 = vrcp.f32 %v2034_v49 }
0x11b3   :  { %v3240_v29 = vpop.eup %3239 }
0x1217   :  { %v2041_v17 = vpop.permute.xlu0 %2040 }
0x1218   :  { %v5287_v8 = vadd.f32 %v2041_v17, %v2037_v9 }
0x121a   :  { %3241 = vtanh.f32 %v5287_v8 }
0x1227   :  { %v3242_v63 = vpop.eup %3241 }
0x1228   :  { %v2045_v18 = vmul.f32 %v3242_v63, %v3240_v29  ;;  %v2016_v63 = vpop.f32.mrf.mxu0 }
0x122a   :  { %2047 = vrot.lane.b32.xlu1 %v2045_v18, %s3418_s23 }
0x129c   :  { %v5291_v52 = vpop.permute.xlu1 %2047 }
0x129d   :  { %3004 = vmatmul.mubr.msk.f32.vlgmr.msra.gmra.mxu1 %vm643_vm1, %v5291_v52 }
0x129e   :  { %2228 = vmatpush1.msra.mxu1 %v4847_v40  ;;  %2291 = vmatprep.mubr.f32.mxu1 %v5187_v4 }
0x129f   :  { %2229 = vmatprep.subr.mxu1 %v4854_v1 }
0x12a0   :  { %2230 = vmatpush1.msra.mxu1 %v4860_v15 }
0x12a1   :  { %2231 = vmatprep.subr.mxu1 %v4866_v58 }
0x12a2   :  { %2232 = vmatpush1.msra.mxu1 %v4872_v19 }
0x12a3   :  { %2233 = vmatprep.subr.mxu1 %v4878_v41 }
0x12a4   :  { %2234 = vmatpush1.msra.mxu1 %v4884_v43 }
0x12a5   :  { %2235 = vmatprep.subr.mxu1 %v4890_v33 }
0x12a6   :  { %2236 = vmatpush1.msra.mxu1 %v4896_v37 }
0x12a7   :  { %2237 = vmatprep.subr.mxu1 %v6094_v11 }
0x12a8   :  { %2238 = vmatpush1.msra.mxu1 %v6095_v56 }
0x12a9   :  { %2239 = vmatprep.subr.mxu1 %v6096_v60 }
0x12aa   :  { %2240 = vmatpush1.msra.mxu1 %v6097_v62 }
0x12ab   :  { %2241 = vmatprep.subr.mxu1 %v6098_v0 }
0x12ac   :  { %2242 = vmatpush1.msra.mxu1 %v6099_v45 }
0x12ad   :  { %2243 = vmatprep.subr.mxu1 %v6100_v6 }
0x12ae   :  { %2244 = vmatpush1.msra.mxu1 %v6101_v14 }
0x12af   :  { %2245 = vmatprep.subr.mxu1 %v6102_v39 }
0x12b0   :  { %2246 = vmatpush1.msra.mxu1 %v6103_v59 }
0x12b1   :  { %2247 = vmatprep.subr.mxu1 %v6104_v12 }
0x12b2   :  { %2248 = vmatpush1.msra.mxu1 %v6105_v2 }
0x12b3   :  { %2249 = vmatprep.subr.mxu1 %v6106_v5 }
0x12b4   :  { %2250 = vmatpush1.msra.mxu1 %v6107_v50 }
0x12b5   :  { %2251 = vmatprep.subr.mxu1 %v6108_v27 }
0x12b6   :  { %2252 = vmatpush1.msra.mxu1 %v6109_v22 }
0x12b7   :  { %2253 = vmatprep.subr.mxu1 %v6110_v47 }
0x12b8   :  { %2254 = vmatpush1.msra.mxu1 %v6111_v31 }
0x12b9   :  { %2255 = vmatprep.subr.mxu1 %v6112_v44 }
0x12ba   :  { %2256 = vmatpush1.msra.mxu1 %v6113_v23 }
0x12bb   :  { %2257 = vmatprep.subr.mxu1 %v6114_v13 }
0x12bc   :  { %2258 = vmatpush1.msra.mxu1 %v6115_v35 }
0x12bd   :  { %2435 = vmatprep.subr.mxu1 %v3385_v24 }
0x135d   :  { %v2117_v16 = vpop.f32.mrf.mxu1 }
0x135e   :  { %v2122_v49 = vadd.f32 %v2117_v16, %v2014_v25 }
0x135f   :  { %v2119_v29 = vpop.f32.mrf.mxu1 }
0x1360   :  { %v2124_v9 = vadd.f32 %v2122_v49, %v4380_v51  ;;  %v2123_v18 = vadd.f32 %v2119_v29, %v2016_v63  ;;  %v3391_v63 = vld [vmem:[%s5659_s5 + $0x188] sm:$0xff] }
0x1362   :  { %v3005_v17 = vmul.f32 -1.442695, %v2124_v9  ;;  %v2125_v57 = vadd.f32 %v2123_v18, %v4385_v61  ;;  %v3392_v18 = vld [vmem:[%s5659_s5 + $0x180] sm:$0xff] }
0x1364   :  { %3243 = vpow2.f32 %v3005_v17  ;;  %v3006_v24 = vmul.f32 -1.442695, %v2125_v57 }
0x1365   :  { %3245 = vtanh.f32 %v2125_v57  ;;  %v3387_v57 = vld [vmem:[%s5659_s5 + $0x1c8] sm:$0xff] }
0x1371   :  { %v3244_v13 = vpop.eup %3243 }
0x1372   :  { %v2129_v23 = vadd.f32 1.0, %v3244_v13  ;;  %v3246_v35 = vpop.eup %3245 }
0x1374   :  { %3247 = vrcp.f32 %v2129_v23 }
0x1375   :  { %3249 = vpow2.f32 %v3006_v24  ;;  %v3393_v24 = vld [vmem:[%s5659_s5 + $0x168] sm:$0xff] }
0x1381   :  { %v3248_v44 = vpop.eup %3247 }
0x1382   :  { %v2140_v31 = vmul.f32 %v3248_v44, %v3246_v35  ;;  %v3250_v25 = vpop.eup %3249  ;;  %v2139_v49 = vmul.f32 %v3248_v44, %v5225_v7  ;;  %v3386_v7 = vld [vmem:[%s5659_s5 + $0x1e0] sm:$0xff]  ;;  %v3389_v44 = vld [vmem:[%s5659_s5 + $0x1a8] sm:$0xff] }
0x1383   :  { %v2136_v16 = vadd.f32 1.0, %v3250_v25  ;;  %v3390_v35 = vld [vmem:[%s5659_s5 + $0x1a0] sm:$0xff] }
0x1384   :  { %2142 = vrot.lane.b32.xlu0 %v2140_v31, %s3418_s23  ;;  %v3394_v25 = vld [vmem:[%s5659_s5 + $0x160] sm:$0xff] }
0x1385   :  { %3251 = vrcp.f32 %v2136_v16  ;;  %v3395_v16 = vld [vmem:[%s5659_s5 + $0x148] sm:$0xff] }
0x1392   :  { %v3252_v13 = vpop.eup %3251 }
0x13f6   :  { %v2143_v9 = vpop.permute.xlu0 %2142 }
0x13f7   :  { %v5334_v17 = vadd.f32 %v2143_v9, %v2139_v49  ;;  %v3396_v49 = vld [vmem:[%s5659_s5 + $0x140] sm:$0xff]  ;;  %v3397_v9 = vld [vmem:[%s5659_s5 + $0x128] sm:$0xff] }
0x13f9   :  { %3253 = vtanh.f32 %v5334_v17 }
0x1406   :  { %v3254_v29 = vpop.eup %3253 }
0x1407   :  { %v5337_v23 = vmul.f32 %v3254_v29, %v3252_v13  ;;  %v3398_v13 = vld [vmem:[%s5659_s5 + $0x120] sm:$0xff]  ;;  %v3399_v29 = vld [vmem:[%s5659_s5 + $0x108] sm:$0xff] }
0x1409   :  { %v2155_v31 = vsel %vm643_vm1, %v5291_v52, %v5337_v23  ;;  %v3388_v52 = vld [vmem:[%s5659_s5 + $0x1c0] sm:$0xff] }
0x140a   :  { %2221 = vmatmul.mubr.f32.vlgmr.msra.gmra.mxu0 %v2155_v31  ;;  %2292 = vmatmul.mubr.f32.vlgmr.msra.gmra.mxu1 %v2155_v31  ;;  %v3400_v31 = vld [vmem:[%s5659_s5 + $0x100] sm:$0xff] }
0x140b   :  { %2347 = vmatpush1.msra.mxu0 %v5047_v53  ;;  %2394 = vmatprep.mubr.f32.mxu0 %v5187_v4 }
0x140c   :  { %2348 = vmatprep.subr.mxu0 %v5054_v38  ;;  %2436 = vmatpush1.msra.mxu1 %v3386_v7  ;;  %v3401_v7 = vld [vmem:[%s5659_s5 + $0xe8] sm:$0xff] }
0x140d   :  { %2349 = vmatpush1.msra.mxu0 %v5061_v55  ;;  %2437 = vmatprep.subr.mxu1 %v3387_v57  ;;  %v3402_v57 = vld [vmem:[%s5659_s5 + $0xe0] sm:$0xff] }
0x140e   :  { %2350 = vmatprep.subr.mxu0 %v5068_v21  ;;  %2438 = vmatpush1.msra.mxu1 %v3388_v52  ;;  %v3404_v52 = vld [vmem:[%s5659_s5 + $0xc0] sm:$0xff] }
0x140f   :  { %2351 = vmatpush1.msra.mxu0 %v5075_v30  ;;  %2439 = vmatprep.subr.mxu1 %v3389_v44  ;;  %v3405_v44 = vld [vmem:[%s5659_s5 + $0xa8] sm:$0xff] }
0x1410   :  { %2352 = vmatprep.subr.mxu0 %v5082_v32  ;;  %2440 = vmatpush1.msra.mxu1 %v3390_v35  ;;  %v3406_v35 = vld [vmem:[%s5659_s5 + $0xa0] sm:$0xff] }
0x1411   :  { %2353 = vmatpush1.msra.mxu0 %v5089_v48  ;;  %2441 = vmatprep.subr.mxu1 %v3391_v63  ;;  %v3407_v63 = vld [vmem:[%s5659_s5 + $0x88] sm:$0xff] }
0x1412   :  { %2354 = vmatprep.subr.mxu0 %v5096_v10  ;;  %2442 = vmatpush1.msra.mxu1 %v3392_v18  ;;  %v3408_v18 = vld [vmem:[%s5659_s5 + $0x80] sm:$0xff] }
0x1413   :  { %2355 = vmatpush1.msra.mxu0 %v5103_v42  ;;  %2443 = vmatprep.subr.mxu1 %v3393_v24  ;;  %v3409_v24 = vld [vmem:[%s5659_s5 + $0x68] sm:$0xff] }
0x1414   :  { %2356 = vmatprep.subr.mxu0 %v5110_v36  ;;  %2444 = vmatpush1.msra.mxu1 %v3394_v25  ;;  %v3410_v25 = vld [vmem:[%s5659_s5 + $0x60] sm:$0xff] }
0x1415   :  { %2357 = vmatpush1.msra.mxu0 %v5117_v46  ;;  %2445 = vmatprep.subr.mxu1 %v3395_v16  ;;  %v3411_v16 = vld [vmem:[%s5659_s5 + $0x48] sm:$0xff] }
0x1416   :  { %2358 = vmatprep.subr.mxu0 %v5124_v34  ;;  %2446 = vmatpush1.msra.mxu1 %v3396_v49  ;;  %v3412_v49 = vld [vmem:[%s5659_s5 + $0x40] sm:$0xff] }
0x1417   :  { %2359 = vmatpush1.msra.mxu0 %v5131_v26  ;;  %2447 = vmatprep.subr.mxu1 %v3397_v9  ;;  %v3413_v9 = vld [vmem:[%s5659_s5 + $0x28] sm:$0xff] }
0x1418   :  { %2360 = vmatprep.subr.mxu0 %v5138_v28  ;;  %2448 = vmatpush1.msra.mxu1 %v3398_v13  ;;  %v3414_v13 = vld [vmem:[%s5659_s5 + $0x20] sm:$0xff] }
0x1419   :  { %2361 = vmatpush1.msra.mxu0 %v5145_v20  ;;  %2449 = vmatprep.subr.mxu1 %v3399_v29  ;;  %v3415_v29 = vld [vmem:[%s5659_s5 + $0x8] sm:$0xff] }
0x141a   :  { %2506 = vmatprep.subr.mxu0 %v4810_v54  ;;  %2450 = vmatpush1.msra.mxu1 %v3400_v31  ;;  %v3403_v54 = vld [vmem:[%s5659_s5 + $0xc8] sm:$0xff]  ;;  %v3416_v31 = vld [vmem:[%s5659_s5] sm:$0xff] }
0x141b   :  { %2451 = vmatprep.subr.mxu1 %v3401_v7  ;;  %2499 = vmatprep.mubr.f32.mxu1 %v5187_v4 }
0x141c   :  { %2452 = vmatpush1.msra.mxu1 %v3402_v57  ;;  %v6116_v57 = vld [vmem:[#allocation21_spill] sm:$0xff] }
0x141d   :  { %2453 = vmatprep.subr.mxu1 %v3403_v54 }
0x141e   :  { %2454 = vmatpush1.msra.mxu1 %v3404_v52 }
0x141f   :  { %2455 = vmatprep.subr.mxu1 %v3405_v44 }
0x1420   :  { %2456 = vmatpush1.msra.mxu1 %v3406_v35  ;;  %v6117_v35 = vld [vmem:[#allocation22_spill] sm:$0xff] }
0x1421   :  { %2457 = vmatprep.subr.mxu1 %v3407_v63 }
0x1422   :  { %2458 = vmatpush1.msra.mxu1 %v3408_v18 }
0x1423   :  { %2459 = vmatprep.subr.mxu1 %v3409_v24 }
0x1424   :  { %2460 = vmatpush1.msra.mxu1 %v3410_v25 }
0x1425   :  { %2461 = vmatprep.subr.mxu1 %v3411_v16 }
0x1426   :  { %2462 = vmatpush1.msra.mxu1 %v3412_v49 }
0x1427   :  { %2463 = vmatprep.subr.mxu1 %v3413_v9 }
0x1428   :  { %2464 = vmatpush1.msra.mxu1 %v3414_v13 }
0x1429   :  { %2465 = vmatprep.subr.mxu1 %v3415_v29 }
0x142a   :  { %2466 = vmatpush1.msra.mxu1 %v3416_v31 }
0x142b   :  { %2625 = vmatprep.subr.mxu1 %v6091_v3 }
0x14ca   :  { %v2222_v7 = vpop.f32.mrf.mxu0 }
0x14cb   :  { %v2301_v54 = vadd.f32 %v2222_v7, %v6116_v57 }
0x14cc   :  { %v2224_v44 = vpop.f32.mrf.mxu0 }
0x14cd   :  { %v3007_v52 = vmul.f32 -1.442695, %v2301_v54  ;;  %v2302_v63 = vadd.f32 %v2224_v44, %v6117_v35 }
0x14cf   :  { %3255 = vpow2.f32 %v3007_v52  ;;  %v3008_v9 = vmul.f32 -1.442695, %v2302_v63 }
0x14d0   :  { %3257 = vtanh.f32 %v2302_v63 }
0x14dc   :  { %v3256_v18 = vpop.eup %3255 }
0x14dd   :  { %v2306_v24 = vadd.f32 1.0, %v3256_v18  ;;  %v3258_v25 = vpop.eup %3257 }
0x14df   :  { %3259 = vrcp.f32 %v2306_v24 }
0x14e0   :  { %3261 = vpow2.f32 %v3008_v9  ;;  %v5537_v9 = vld [vmem:[%s5666_s2] sm:$0xff] }
0x14e1   :  { %vm3017_vm2 = vcmp.gt.s32.totalorder %v5537_v9, 0  ;;  %vm3018_vm3 = vcmp.gt.s32.totalorder %v5537_v9, 1  ;;  %vm3023_vm4 = vcmp.gt.s32.totalorder %v5537_v9, 6  ;;  %vm3024_vm5 = vcmp.gt.s32.totalorder %v5537_v9, 7 }
0x14e2   :  { %vm3019_vm6 = vcmp.gt.s32.totalorder %v5537_v9, 2  ;;  %vm3020_vm7 = vcmp.gt.s32.totalorder %v5537_v9, 3  ;;  %vm3021_vm8 = vcmp.gt.s32.totalorder %v5537_v9, 4  ;;  %vm3022_vm9 = vcmp.gt.s32.totalorder %v5537_v9, 5 }
0x14ec   :  { %v3260_v16 = vpop.eup %3259 }
0x14ed   :  { %v2317_v49 = vmul.f32 %v3260_v16, %v3258_v25  ;;  %v3262_v3 = vpop.eup %3261  ;;  %v2316_v29 = vmul.f32 %v3260_v16, %v5287_v8 }
0x14ee   :  { %v2313_v13 = vadd.f32 1.0, %v3262_v3 }
0x14ef   :  { %2319 = vrot.lane.b32.xlu1 %v2317_v49, %s3418_s23 }
0x14f0   :  { %3263 = vrcp.f32 %v2313_v13 }
0x14fd   :  { %v3264_v57 = vpop.eup %3263 }
0x1561   :  { %v2320_v31 = vpop.permute.xlu1 %2319 }
0x1562   :  { %v5458_v7 = vadd.f32 %v2320_v31, %v2316_v29  ;;  %v3025_v31 = vsel %vm3017_vm2, 1.0, %v5187_v4 }
0x1564   :  { %3265 = vtanh.f32 %v5458_v7 }
0x1571   :  { %v3266_v54 = vpop.eup %3265 }
0x1572   :  { %v2324_v52 = vmul.f32 %v3266_v54, %v3264_v57  ;;  %v6126_v57 = vld [vmem:[#allocation62_spill] sm:$0xff] }
0x1574   :  { %2326 = vrot.lane.b32.xlu0 %v2324_v52, %s3418_s23  ;;  %v6127_v52 = vld [vmem:[#allocation60_spill] sm:$0xff] }
0x15e6   :  { %v5462_v44 = vpop.permute.xlu0 %2326 }
0x15e7   :  { %3009 = vmatmul.mubr.msk.f32.vlgmr.msra.gmra.mxu0 %vm643_vm1, %v5462_v44 }
0x15e8   :  { %2507 = vmatpush1.msra.mxu0 %v4847_v40  ;;  %2570 = vmatprep.mubr.f32.mxu0 %v5187_v4  ;;  %v6118_v40 = vld [vmem:[#allocation11_spill] sm:$0xff] }
0x15e9   :  { %2508 = vmatprep.subr.mxu0 %v4854_v1  ;;  %v6119_v1 = vld [vmem:[#allocation58_spill] sm:$0xff] }
0x15ea   :  { %2509 = vmatpush1.msra.mxu0 %v4860_v15  ;;  %v6120_v15 = vld [vmem:[#allocation61_spill] sm:$0xff] }
0x15eb   :  { %2510 = vmatprep.subr.mxu0 %v4866_v58  ;;  %v6121_v58 = vld [vmem:[#allocation59_spill] sm:$0xff] }
0x15ec   :  { %2511 = vmatpush1.msra.mxu0 %v4872_v19  ;;  %v6122_v19 = vld [vmem:[#allocation24_spill] sm:$0xff] }
0x15ed   :  { %2512 = vmatprep.subr.mxu0 %v4878_v41  ;;  %v2293_v41 = vpop.f32.mrf.mxu1 }
0x15ee   :  { %2513 = vmatpush1.msra.mxu0 %v4884_v43 }
0x15ef   :  { %2514 = vmatprep.subr.mxu0 %v4890_v33 }
0x15f0   :  { %2515 = vmatpush1.msra.mxu0 %v4896_v37 }
0x15f1   :  { %2516 = vmatprep.subr.mxu0 %v6094_v11 }
0x15f2   :  { %2517 = vmatpush1.msra.mxu0 %v6095_v56  ;;  %v2295_v56 = vpop.f32.mrf.mxu1 }
0x15f3   :  { %2518 = vmatprep.subr.mxu0 %v6096_v60 }
0x15f4   :  { %2519 = vmatpush1.msra.mxu0 %v6097_v62 }
0x15f5   :  { %2520 = vmatprep.subr.mxu0 %v6098_v0 }
0x15f6   :  { %2521 = vmatpush1.msra.mxu0 %v6099_v45 }
0x15f7   :  { %2522 = vmatprep.subr.mxu0 %v6100_v6 }
0x15f8   :  { %2523 = vmatpush1.msra.mxu0 %v6101_v14 }
0x15f9   :  { %2524 = vmatprep.subr.mxu0 %v6102_v39 }
0x15fa   :  { %2525 = vmatpush1.msra.mxu0 %v6103_v59 }
0x15fb   :  { %2526 = vmatprep.subr.mxu0 %v6104_v12 }
0x15fc   :  { %2527 = vmatpush1.msra.mxu0 %v6105_v2 }
0x15fd   :  { %2528 = vmatprep.subr.mxu0 %v6106_v5 }
0x15fe   :  { %2529 = vmatpush1.msra.mxu0 %v6107_v50 }
0x15ff   :  { %2530 = vmatprep.subr.mxu0 %v6108_v27 }
0x1600   :  { %2531 = vmatpush1.msra.mxu0 %v6109_v22 }
0x1601   :  { %2532 = vmatprep.subr.mxu0 %v6110_v47 }
0x1602   :  { %2533 = vmatpush1.msra.mxu0 %v6118_v40  ;;  %v3031_v40 = vsel %vm3023_vm4, 1.0, %v5187_v4 }
0x1603   :  { %2534 = vmatprep.subr.mxu0 %v6119_v1  ;;  %v3032_v1 = vsel %vm3024_vm5, 1.0, %v5187_v4 }
0x1604   :  { %2535 = vmatpush1.msra.mxu0 %v6120_v15  ;;  %v3106_v15 = vpack.i.bf16 %v3032_v1, %v3031_v40 }
0x1605   :  { %2536 = vmatprep.subr.mxu0 %v6121_v58 }
0x1606   :  { %2537 = vmatpush1.msra.mxu0 %v6122_v19 }
0x16a7   :  { %v2396_v43 = vpop.f32.mrf.mxu0 }
0x16a8   :  { %v2401_v33 = vadd.f32 %v2396_v43, %v2293_v41 }
0x16a9   :  { %v2398_v11 = vpop.f32.mrf.mxu0 }
0x16aa   :  { %v2403_v37 = vadd.f32 %v2401_v33, %v4380_v51  ;;  %v2402_v60 = vadd.f32 %v2398_v11, %v2295_v56 }
0x16ac   :  { %v3010_v8 = vmul.f32 -1.442695, %v2403_v37  ;;  %v2404_v62 = vadd.f32 %v2402_v60, %v4385_v61  ;;  %v2819_v60 = vld [vmem:[%s5667_s9 + $0x38] sm:$0xff] }
0x16ad   :  { %3058 = vmatprep.subr.mxu0 %v2819_v60 }
0x16ae   :  { %3267 = vpow2.f32 %v3010_v8  ;;  %v3011_v59 = vmul.f32 -1.442695, %v2404_v62 }
0x16af   :  { %3269 = vtanh.f32 %v2404_v62 }
0x16bb   :  { %v3268_v0 = vpop.eup %3267 }
0x16bc   :  { %v2408_v45 = vadd.f32 1.0, %v3268_v0  ;;  %v3270_v6 = vpop.eup %3269 }
0x16be   :  { %3271 = vrcp.f32 %v2408_v45 }
0x16bf   :  { %3273 = vpow2.f32 %v3011_v59 }
0x16cb   :  { %v3272_v14 = vpop.eup %3271 }
0x16cc   :  { %v2419_v39 = vmul.f32 %v3272_v14, %v3270_v6  ;;  %v3274_v12 = vpop.eup %3273  ;;  %v2418_v5 = vmul.f32 %v3272_v14, %v5334_v17 }
0x16cd   :  { %v2415_v2 = vadd.f32 1.0, %v3274_v12 }
0x16ce   :  { %2421 = vrot.lane.b32.xlu1 %v2419_v39, %s3418_s23 }
0x16cf   :  { %3275 = vrcp.f32 %v2415_v2 }
0x16dc   :  { %v3276_v22 = vpop.eup %3275 }
0x1740   :  { %v2422_v50 = vpop.permute.xlu1 %2421 }
0x1741   :  { %v5502_v27 = vadd.f32 %v2422_v50, %v2418_v5 }
0x1743   :  { %3277 = vtanh.f32 %v5502_v27 }
0x1750   :  { %v3278_v47 = vpop.eup %3277 }
0x1751   :  { %v5505_v35 = vmul.f32 %v3278_v47, %v3276_v22  ;;  %v2818_v22 = vld [vmem:[%s5667_s9 + $0x30] sm:$0xff]  ;;  %v2815_v47 = vld [vmem:[%s5667_s9 + $0x18] sm:$0xff] }
0x1753   :  { %v2434_v63 = vsel %vm643_vm1, %v5462_v44, %v5505_v35  ;;  %v6128_v44 = vld [vmem:[#allocation26_spill] sm:$0xff] }
0x1754   :  { %2500 = vmatmul.mubr.f32.vlgmr.msra.gmra.mxu1 %v2434_v63  ;;  %2571 = vmatmul.mubr.f32.vlgmr.msra.gmra.mxu0 %v2434_v63  ;;  %v2813_v63 = vld [vmem:[%s5667_s9 + $0x8] sm:$0xff] }
0x1755   :  { %2626 = vmatpush1.msra.mxu1 %v5047_v53  ;;  %2673 = vmatprep.mubr.f32.mxu1 %v5187_v4 }
0x1756   :  { %2627 = vmatprep.subr.mxu1 %v5054_v38  ;;  %v6123_v38 = vld [vmem:[#allocation23_spill] sm:$0xff]  ;;  %3059 = vmatpush3.msra.mxu0 %v2819_v60 }
0x1757   :  { %2628 = vmatpush1.msra.mxu1 %v5061_v55  ;;  %3060 = vmatprep.subr.mxu0 %v2818_v22 }
0x1758   :  { %2629 = vmatprep.subr.mxu1 %v5068_v21  ;;  %3061 = vmatpush3.msra.mxu0 %v2818_v22 }
0x1759   :  { %2630 = vmatpush1.msra.mxu1 %v5075_v30 }
0x175a   :  { %2631 = vmatprep.subr.mxu1 %v5082_v32  ;;  %v6124_v32 = vld [vmem:[#allocation12_spill] sm:$0xff] }
0x175b   :  { %2632 = vmatpush1.msra.mxu1 %v5089_v48  ;;  %v6125_v48 = vld [vmem:[#allocation7_spill] sm:$0xff] }
0x175c   :  { %2633 = vmatprep.subr.mxu1 %v5096_v10  ;;  %v368_v10 = vadd.f32 %v6125_v48, %v6124_v32  ;;  %v3027_v32 = vsel %vm3019_vm6, 1.0, %v5187_v4  ;;  %v3028_v48 = vsel %vm3020_vm7, 1.0, %v5187_v4 }
0x175d   :  { %2634 = vmatpush1.msra.mxu1 %v5103_v42 }
0x175e   :  { %2635 = vmatprep.subr.mxu1 %v5110_v36 }
0x175f   :  { %2636 = vmatpush1.msra.mxu1 %v5117_v46 }
0x1760   :  { %2637 = vmatprep.subr.mxu1 %v5124_v34 }
0x1761   :  { %2638 = vmatpush1.msra.mxu1 %v5131_v26 }
0x1762   :  { %2639 = vmatprep.subr.mxu1 %v5138_v28  ;;  %v3419_v28 = vmov 0  }
0x1763   :  { %2640 = vmatpush1.msra.mxu1 %v5145_v20  ;;  %3089 = vset.pattern.permute.xlu1 %v3419_v28 }
0x1764   :  { %3095 = vset.pattern.permute.xlu0 %v3419_v28 }
0x1814   :  { %v2501_v53 = vpop.f32.mrf.mxu1  ;;  %v2572_v62 = vpop.f32.mrf.mxu0 }
0x1815   :  { %v2580_v55 = vadd.f32 %v2501_v53, %v6123_v38 }
0x1816   :  { %v2503_v30 = vpop.f32.mrf.mxu1  ;;  %v2574_v59 = vpop.f32.mrf.mxu0 }
0x1817   :  { %v3012_v21 = vmul.f32 -1.442695, %v2580_v55  ;;  %v2581_v42 = vadd.f32 %v2503_v30, %v368_v10  ;;  %v2812_v55 = vld [vmem:[%s5667_s9] sm:$0xff]  ;;  %v6130_v10 = vld [vmem:[#allocation43_spill] sm:$0xff] }
0x1818   :  { %v6129_v30 = vld [vmem:[#allocation8_spill] sm:$0xff] }
0x1819   :  { %3279 = vpow2.f32 %v3012_v21  ;;  %v3013_v20 = vmul.f32 -1.442695, %v2581_v42 }
0x181a   :  { %3281 = vtanh.f32 %v2581_v42  ;;  %v3096_v42 = vpack.i.bf16 %v3028_v48, %v3027_v32 }
0x1826   :  { %v3280_v36 = vpop.eup %3279 }
0x1827   :  { %v2585_v46 = vadd.f32 1.0, %v3280_v36  ;;  %v3282_v34 = vpop.eup %3281  ;;  %v3029_v36 = vsel %vm3021_vm8, 1.0, %v5187_v4 }
0x1829   :  { %3283 = vrcp.f32 %v2585_v46  ;;  %v3030_v46 = vsel %vm3022_vm9, 1.0, %v5187_v4 }
0x182a   :  { %3285 = vpow2.f32 %v3013_v20 }
0x1836   :  { %v3284_v26 = vpop.eup %3283 }
0x1837   :  { %v2596_v17 = vmul.f32 %v3284_v26, %v3282_v34  ;;  %v3286_v18 = vpop.eup %3285  ;;  %v2595_v25 = vmul.f32 %v3284_v26, %v5458_v7  ;;  %v3026_v7 = vsel %vm3018_vm3, 1.0, %v5187_v4  ;;  %v3101_v34 = vpack.i.bf16 %v3030_v46, %v3029_v36 }
0x1838   :  { %v2592_v24 = vadd.f32 1.0, %v3286_v18  ;;  %v3090_v54 = vpack.i.bf16 %v3026_v7, %v3025_v31 }
0x1839   :  { %2598 = vrot.lane.b32.xlu0 %v2596_v17, %s3418_s23 }
0x183a   :  { %3287 = vrcp.f32 %v2592_v24 }
0x1847   :  { %v3288_v3 = vpop.eup %3287 }
0x18ab   :  { %v2599_v16 = vpop.permute.xlu0 %2598 }
0x18ac   :  { %v5531_v49 = vadd.f32 %v2599_v16, %v2595_v25 }
0x18ae   :  { %3289 = vtanh.f32 %v5531_v49 }
0x18bb   :  { %v3290_v13 = vpop.eup %3289 }
0x18bc   :  { %v2603_v29 = vmul.f32 %v3290_v13, %v3288_v3 }
0x18be   :  { %2605 = vrot.lane.b32.xlu1 %v2603_v29, %s3418_s23 }
0x18c2   :  { %755 = vrot.lane.b32.xlu1 %v6126_v57, %s3418_s23 }
0x18c6   :  { %3091 = vperm.xlu1 %3089, %v3090_v54  }
0x18ca   :  { %1591 = vrot.lane.b32.xlu1 %v6127_v52, %s3418_s23 }
0x18ce   :  { %1870 = vrot.lane.b32.xlu1 %v6128_v44, %s3418_s23 }
0x18d2   :  { %2149 = vrot.lane.b32.xlu1 %v5337_v23, %s3418_s23 }
0x18d6   :  { %2428 = vrot.lane.b32.xlu1 %v5505_v35, %s3418_s23  ;;  %v2814_v35 = vld [vmem:[%s5667_s9 + $0x10] sm:$0xff] }
0x18da   :  { %3107 = vperm.xlu1 %3089, %v3106_v15  }
0x1930   :  { %v2606_v58 = vpop.permute.xlu1 %2605 }
0x1931   :  { %3014 = vmatmul.mubr.msk.f32.vlgmr.msra.gmra.mxu1 %vm643_vm1, %v2606_v58 }
0x1934   :  { %v756_v19 = vpop.permute.xlu1 %755 }
0x1935   :  { %758 = vst.msk [vmem:[#allocation3] sm:$0xff] %vm643_vm1, %v756_v19 }
0x193c   :  { %v2756_v23 = vld [vmem:[#allocation3] sm:$0xff] }
0x1941   :  { %v5560_v41 = vpop.permute.xlu1 %3091 }
0x1942   :  { %v3093_v43 = vunpack.i.l.bf16 %v5560_v41  ;;  %v3094_v9 = vunpack.i.h.bf16 %v5560_v41 }
0x1944   :  { %v2804_v33 = vmul.f32 %v3093_v43, %v2756_v23 }
0x1945   :  { %v1592_v37 = vpop.permute.xlu1 %1591 }
0x1946   :  { %1595 = vst.msk [vmem:[#allocation3 + $0x18] sm:$0xff] %vm643_vm1, %v1592_v37  ;;  %3074 = vmatprep.mubr.msk.f32.mxu0 %vm643_vm1, %v2804_v33 }
0x1949   :  { %v1871_v8 = vpop.permute.xlu1 %1870 }
0x194a   :  { %1874 = vst.msk [vmem:[#allocation3 + $0x20] sm:$0xff] %vm643_vm1, %v1871_v8 }
0x194d   :  { %v2150_v11 = vpop.permute.xlu1 %2149  ;;  %v2759_v44 = vld [vmem:[#allocation3 + $0x18] sm:$0xff] }
0x194e   :  { %2153 = vst.msk [vmem:[#allocation3 + $0x28] sm:$0xff] %vm643_vm1, %v2150_v11 }
0x1951   :  { %v2429_v56 = vpop.permute.xlu1 %2428  ;;  %v2760_v23 = vld [vmem:[#allocation3 + $0x20] sm:$0xff] }
0x1952   :  { %2432 = vst.msk [vmem:[#allocation3 + $0x30] sm:$0xff] %vm643_vm1, %v2429_v56 }
0x1955   :  { %v3108_v54 = vpop.permute.xlu1 %3107  ;;  %v2761_v33 = vld [vmem:[#allocation3 + $0x28] sm:$0xff] }
0x1956   :  { %v3109_v58 = vunpack.i.l.bf16 %v3108_v54  ;;  %v3110_v60 = vunpack.i.h.bf16 %v3108_v54 }
0x1959   :  { %v2762_v43 = vld [vmem:[#allocation3 + $0x30] sm:$0xff] }
0x195a   :  { %v2810_v11 = vmul.f32 %v3109_v58, %v2762_v43 }
0x19f1   :  { %v2675_v0 = vpop.f32.mrf.mxu1 }
0x19f2   :  { %v2680_v45 = vadd.f32 %v2675_v0, %v2572_v62 }
0x19f3   :  { %v2677_v39 = vpop.f32.mrf.mxu1 }
0x19f4   :  { %v2682_v6 = vadd.f32 %v2680_v45, %v4380_v51  ;;  %v2681_v12 = vadd.f32 %v2677_v39, %v2574_v59  ;;  %v2817_v51 = vld [vmem:[%s5667_s9 + $0x28] sm:$0xff]  ;;  %v3033_v45 = vld [vmem:[%s5668_s10] ss:$0 sm:$0xff] }
0x19f5   :  { %3062 = vmatprep.subr.mxu0 %v2817_v51 }
0x19f6   :  { %v3015_v14 = vmul.f32 -1.442695, %v2682_v6  ;;  %v2683_v2 = vadd.f32 %v2681_v12, %v4385_v61  ;;  %3063 = vmatpush3.msra.mxu0 %v2817_v51  ;;  %v2816_v61 = vld [vmem:[%s5667_s9 + $0x20] sm:$0xff] }
0x19f7   :  { %3064 = vmatprep.subr.mxu0 %v2816_v61 }
0x19f8   :  { %3291 = vpow2.f32 %v3015_v14  ;;  %3065 = vmatpush3.msra.mxu0 %v2816_v61  ;;  %v3016_v26 = vmul.f32 -1.442695, %v2683_v2 }
0x19f9   :  { %3293 = vtanh.f32 %v2683_v2  ;;  %3066 = vmatprep.subr.mxu0 %v2815_v47 }
0x19fa   :  { %3067 = vmatpush3.msra.mxu0 %v2815_v47 }
0x19fb   :  { %3068 = vmatprep.subr.mxu0 %v2814_v35 }
0x19fc   :  { %3069 = vmatpush3.msra.mxu0 %v2814_v35 }
0x19fd   :  { %3070 = vmatprep.subr.mxu0 %v2813_v63 }
0x19fe   :  { %3071 = vmatpush3.msra.mxu0 %v2813_v63 }
0x19ff   :  { %3072 = vmatprep.subr.mxu0 %v2812_v55 }
0x1a00   :  { %3073 = vmatpush3.msra.mxu0 %v2812_v55 }
0x1a05   :  { %v3292_v5 = vpop.eup %3291 }
0x1a06   :  { %v2687_v50 = vadd.f32 1.0, %v3292_v5  ;;  %v3294_v53 = vpop.eup %3293 }
0x1a08   :  { %3295 = vrcp.f32 %v2687_v50 }
0x1a09   :  { %3297 = vpow2.f32 %v3016_v26 }
0x1a15   :  { %v3296_v38 = vpop.eup %3295 }
0x1a16   :  { %v2698_v21 = vmul.f32 %v3296_v38, %v3294_v53  ;;  %v3298_v17 = vpop.eup %3297  ;;  %v2697_v20 = vmul.f32 %v3296_v38, %v5502_v27 }
0x1a17   :  { %v2694_v28 = vadd.f32 1.0, %v3298_v17 }
0x1a18   :  { %2700 = vrot.lane.b32.xlu0 %v2698_v21, %s3418_s23 }
0x1a19   :  { %3299 = vrcp.f32 %v2694_v28 }
0x1a1c   :  { %1033 = vrot.lane.b32.xlu0 %v6129_v30, %s3418_s23 }
0x1a20   :  { %1312 = vrot.lane.b32.xlu0 %v6130_v10, %s3418_s23 }
0x1a24   :  { %3097 = vperm.xlu0 %3095, %v3096_v42  }
0x1a26   :  { %v3300_v13 = vpop.eup %3299 }
0x1a28   :  { %3102 = vperm.xlu0 %3095, %v3101_v34  }
0x1a8a   :  { %v2701_v18 = vpop.permute.xlu0 %2700 }
0x1a8b   :  { %v2703_v24 = vadd.f32 %v2701_v18, %v2697_v20 }
0x1a8d   :  { %3301 = vtanh.f32 %v2703_v24 }
0x1a8e   :  { %v1034_v25 = vpop.permute.xlu0 %1033 }
0x1a8f   :  { %1037 = vst.msk [vmem:[#allocation3 + $0x8] sm:$0xff] %vm643_vm1, %v1034_v25 }
0x1a92   :  { %v1313_v16 = vpop.permute.xlu0 %1312 }
0x1a93   :  { %1316 = vst.msk [vmem:[#allocation3 + $0x10] sm:$0xff] %vm643_vm1, %v1313_v16 }
0x1a96   :  { %v2757_v4 = vld [vmem:[#allocation3 + $0x8] sm:$0xff] }
0x1a97   :  { %v2805_v3 = vmul.f32 %v3094_v9, %v2757_v4 }
0x1a99   :  { %3075 = vmatmul.mubr.msk.f32.vlgmr.msra.gmra.mxu0 %vm643_vm1, %v2805_v3 }
0x1a9a   :  { %v3302_v29 = vpop.eup %3301  ;;  %v2758_v52 = vld [vmem:[#allocation3 + $0x10] sm:$0xff] }
0x1a9b   :  { %v2705_v31 = vmul.f32 %v3302_v29, %v3300_v13 }
0x1a9d   :  { %2707 = vrot.lane.b32.xlu0 %v2705_v31, %s3418_s23 }
0x1a9f   :  { %v3098_v27 = vpop.permute.xlu0 %3097 }
0x1aa0   :  { %v3100_v7 = vunpack.i.h.bf16 %v3098_v27  ;;  %v3099_v57 = vunpack.i.l.bf16 %v3098_v27 }
0x1aa1   :  { %2716 = vrot.lane.b32.xlu0 %v5531_v49, %s3418_s23 }
0x1aa2   :  { %v2806_v40 = vmul.f32 %v3099_v57, %v2758_v52  ;;  %v2807_v1 = vmul.f32 %v3100_v7, %v2759_v44 }
0x1aa3   :  { %v3103_v15 = vpop.permute.xlu0 %3102 }
0x1aa4   :  { %v3105_v19 = vunpack.i.h.bf16 %v3103_v15  ;;  %v3104_v41 = vunpack.i.l.bf16 %v3103_v15  ;;  %3077 = vmatprep.mubr.msk.f32.mxu0 %vm643_vm1, %v2806_v40 }
0x1aa5   :  { %3078 = vmatmul.mubr.msk.f32.gmra.mxu0 %vm643_vm1, %v2807_v1 }
0x1aa6   :  { %v2808_v37 = vmul.f32 %v3104_v41, %v2760_v23  ;;  %v2809_v8 = vmul.f32 %v3105_v19, %v2761_v33 }
0x1aa8   :  { %3080 = vmatprep.mubr.msk.f32.mxu0 %vm643_vm1, %v2808_v37 }
0x1aa9   :  { %3081 = vmatmul.mubr.msk.f32.gmra.mxu0 %vm643_vm1, %v2809_v8 }
0x1aaa   :  { %3083 = vmatprep.mubr.msk.f32.mxu0 %vm643_vm1, %v2810_v11 }
0x1b0f   :  { %v2708_v49 = vpop.permute.xlu0 %2707 }
0x1b10   :  { %2711 = vst.msk [vmem:[#allocation3 + $0x38] sm:$0xff] %vm643_vm1, %v2708_v49 }
0x1b13   :  { %v2717_v56 = vpop.permute.xlu0 %2716 }
0x1b14   :  { %2719 = vst.msk [vmem:[#allocation5 + $0x8] sm:$0xff] %vm643_vm1, %v2717_v56 }
0x1b15   :  { %2721 = vst.msk [vmem:[#allocation5 + $0x8] sm:$0xff] %vm2720_vm10, %v2703_v24 }
0x1b17   :  { %v2763_v62 = vld [vmem:[#allocation3 + $0x38] sm:$0xff] }
0x1b18   :  { %v2811_v0 = vmul.f32 %v3110_v60, %v2763_v62 }
0x1b1a   :  { %3084 = vmatmul.mubr.msk.f32.gmra.mxu0 %vm643_vm1, %v2811_v0 }
0x1b59   :  { %v3076_v6 = vpop.f32.mrf.mxu0 }
0x1b5a   :  { %v2923_v14 = vadd.f32 %v3076_v6, %v3033_v45 }
0x1b5b   :  { %v2917_v39 = vpop.f32.mrf.mxu0 }
0x1b5c   :  { %2958 = vst.msk [vmem:[%s5669_s11 + $0x8] sm:$0xff] %vm2956_vm11, %v2923_v14  ;;  %v2918_v59 = vadd.f32 %v3033_v45, %v2917_v39 }
0x1b5e   :  { %2957 = vst.msk [vmem:[%s5669_s11] sm:$0xff] %vm2956_vm11, %v2918_v59 }
0x1b65   :  { %v3079_v12 = vpop.f32.mrf.mxu0 }
0x1b66   :  { %v2933_v2 = vadd.f32 %v3079_v12, %v3033_v45 }
0x1b67   :  { %v2927_v5 = vpop.f32.mrf.mxu0 }
0x1b68   :  { %2960 = vst.msk [vmem:[%s5669_s11 + $0x18] sm:$0xff] %vm2956_vm11, %v2933_v2  ;;  %v2928_v50 = vadd.f32 %v3033_v45, %v2927_v5 }
0x1b69   :  { %v3082_v22 = vpop.f32.mrf.mxu0 }
0x1b6a   :  { %2959 = vst.msk [vmem:[%s5669_s11 + $0x10] sm:$0xff] %vm2956_vm11, %v2928_v50  ;;  %v2943_v51 = vadd.f32 %v3082_v22, %v3033_v45 }
0x1b6b   :  { %v2937_v61 = vpop.f32.mrf.mxu0 }
0x1b6c   :  { %2962 = vst.msk [vmem:[%s5669_s11 + $0x28] sm:$0xff] %vm2956_vm11, %v2943_v51  ;;  %v2938_v47 = vadd.f32 %v3033_v45, %v2937_v61 }
0x1b6e   :  { %2961 = vst.msk [vmem:[%s5669_s11 + $0x20] sm:$0xff] %vm2956_vm11, %v2938_v47 }
0x1bda   :  { %v3085_v35 = vpop.f32.mrf.mxu0 }
0x1bdb   :  { %v2953_v63 = vadd.f32 %v3085_v35, %v3033_v45 }
0x1bdc   :  { %v2947_v53 = vpop.f32.mrf.mxu0 }
0x1bdd   :  { %2964 = vst.msk [vmem:[%s5669_s11 + $0x38] sm:$0xff] %vm2956_vm11, %v2953_v63  ;;  %v2948_v38 = vadd.f32 %v3033_v45, %v2947_v53 }
0x1bdf   :  { %2963 = vst.msk [vmem:[%s5669_s11 + $0x30] sm:$0xff] %vm2956_vm11, %v2948_v38 }

</bundles_post_ra>
